<compile_context>
chip_gen: v5e
topology: v5e:2x2
jax: 0.10.0
libtpu: 0.0.40
codegen_flags: <defaults>
</compile_context>

<pallas_src>
import functools

import jax
import jax.numpy as jnp
from jax.experimental import pallas as pl
from jax.experimental.pallas import tpu as pltpu


def encoder_image_kernel(
    xp_ref,                                    # (TB*56, patch_dim) flattened patch tokens
    sp_ref,                                    # (TB, rows)  pooling selector: 1/49 on valid tokens
    g_ref,                                     # (rows, 64)  token-position one-hot (cols >= 56 zero)
    gt_ref,                                    # (64, rows)  its transpose (built host-side)
    cnn_w_ref, cnn_b_ref,                      # CNN stand-in
    fc_w_ref, fc_b_ref,                        # self.fc
    w1f_ref, w2f_ref,                          # fused PIENet + uncertainty attention weights
    p_fcw_ref, p_fcb_ref, ln_g_ref, ln_b_ref,  # PIENet fc + layer_norm
    w_sig_ref, b_sig_ref,                      # fused UncertaintyModuleImage fc's
    vecs_ref,                                  # (TB, 3*embed)  [emb | residual | logsigma]
    attn_ref,                                  # (TB, 128)      [attn(64) | uncertainty attn(64)]
    *, n_tok,
):
    f32 = jnp.float32
    sp = sp_ref[...]                           # (TB, rows), 1/49 where (image, token) valid
    s01 = (sp > 0.0).astype(f32)               # 0/1 validity+segment mask (tiny VPU work)
    g = g_ref[...]
    gt = gt_ref[...]
    tb = sp.shape[0]

    # ---- CNN backbone stand-in: patch-embed matmul + ReLU, M = TB*56 --------
    # TODO(synk): real module uses a pretrained torchvision ResNet; replaced by
    # one conv-as-matmul patch embedding (no checkpoint-free in-kernel equiv).
    feats = jnp.dot(xp_ref[...], cnn_w_ref[...], preferred_element_type=f32)
    feats = jnp.maximum(feats + cnn_b_ref[...], 0.0)              # (rows, C) — no validity mul

    # ---- fused PIENet + uncertainty attention logits -------------------------
    hidden = jnp.tanh(jnp.dot(feats, w1f_ref[...], preferred_element_type=f32))
    logits = jnp.dot(hidden, w2f_ref[...], preferred_element_type=f32)   # (rows, 2)

    # ---- compact per-image logits via MXU selection: (TB, 64) ----------------
    # lc[b, t] = logits[56*b + t, j] on valid tokens, 0 elsewhere.
    lcp = jnp.dot(s01, logits[:, 0:1] * g, preferred_element_type=f32)
    lcu = jnp.dot(s01, logits[:, 1:2] * g, preferred_element_type=f32)

    # ---- per-image masked softmax on the tiny (TB, 64) slab -------------------
    col = jax.lax.broadcasted_iota(jnp.int32, (1, g.shape[1]), 1)
    cmask = col < n_tok
    neg = jnp.float32(-1e30)
    zp = jnp.where(cmask, lcp, neg)
    zu = jnp.where(cmask, lcu, neg)
    ep = jnp.exp(zp - jnp.max(zp, axis=-1, keepdims=True))        # per-image max shift
    eu = jnp.exp(zu - jnp.max(zu, axis=-1, keepdims=True))
    ap = ep * (1.0 / jnp.sum(ep, axis=-1, keepdims=True))         # (TB, 64), zeros on pad cols
    au = eu * (1.0 / jnp.sum(eu, axis=-1, keepdims=True))

    # ---- scatter attention weights back onto the flattened-rows axis ---------
    # (ap @ gt)[b, r] = ap[b, r % 56]; s01 keeps only image b's valid tokens.
    A_p = jnp.dot(ap, gt, preferred_element_type=f32) * s01       # (TB, rows)
    A_u = jnp.dot(au, gt, preferred_element_type=f32) * s01

    # ---- one fused segment-reduction matmul over feats ------------------------
    L = jnp.concatenate([sp, A_p, A_u], axis=0)                   # (3*TB, rows)
    R = jnp.dot(L, feats, preferred_element_type=f32)             # (3*TB, C)
    pooled = R[0:tb]
    res_p = R[tb:2 * tb]
    res_u = R[2 * tb:3 * tb]

    # ---- fc + PIENet residual + layer norm -------------------------------------
    out = jnp.dot(pooled, fc_w_ref[...], preferred_element_type=f32) + fc_b_ref[...]
    residual = jax.nn.sigmoid(
        jnp.dot(res_p, p_fcw_ref[...], preferred_element_type=f32) + p_fcb_ref[...])
    h = out + residual
    mu = jnp.mean(h, axis=-1, keepdims=True)
    var = jnp.mean((h - mu) ** 2, axis=-1, keepdims=True)
    out_ln = (h - mu) * jax.lax.rsqrt(var + 1e-5) * ln_g_ref[...] + ln_b_ref[...]

    # ---- fused logsigma: [res_u | pooled] @ [u_fc2w ; u_fcw] + (u_fc2b+u_fcb) --
    cat = jnp.concatenate([res_u, pooled], axis=-1)               # (TB, 2C)
    logsigma = jnp.dot(cat, w_sig_ref[...], preferred_element_type=f32) + b_sig_ref[...]

    # ---- l2 normalize: rsqrt-multiply, no divide -------------------------------
    sq = jnp.sum(out_ln * out_ln, axis=-1, keepdims=True)
    emb = out_ln * jax.lax.rsqrt(jnp.maximum(sq, 1e-24))

    # ---- packed stores ----------------------------------------------------------
    vecs_ref[...] = jnp.concatenate([emb, residual, logsigma], axis=-1)
    attn_ref[...] = jnp.concatenate([ap, au], axis=-1)            # (TB, 128) full-lane store


def make_params(key, patch_dim, cnn_dim, embed_dim):
    d_h = cnn_dim // 2
    ks = jax.random.split(key, 10)
    s = lambda k, shape: (jax.random.normal(k, shape, jnp.float32) * 0.1)
    return {
        "cnn_w": s(ks[0], (patch_dim, cnn_dim)),
        "cnn_b": s(ks[1], (1, cnn_dim)),
        "fc_w":  s(ks[2], (cnn_dim, embed_dim)),
        "fc_b":  jnp.zeros((1, embed_dim), jnp.float32),     # init_weights: bias = 0
        "p_w1":  s(ks[3], (cnn_dim, d_h)),
        "p_w2":  s(ks[4], (d_h, 1)),
        "p_fcw": s(ks[5], (cnn_dim, embed_dim)),
        "p_fcb": s(ks[6], (1, embed_dim)),
        "ln_g":  jnp.ones((1, embed_dim), jnp.float32),
        "ln_b":  jnp.zeros((1, embed_dim), jnp.float32),
        "u_w1":  s(ks[7], (cnn_dim, d_h)),
        "u_w2":  s(ks[8], (d_h, 1)),
        "u_fcw": s(ks[9], (cnn_dim, embed_dim)),
        "u_fcb": jnp.zeros((1, embed_dim), jnp.float32),
        "u_fc2w": s(jax.random.fold_in(key, 100), (cnn_dim, embed_dim)),
        "u_fc2b": jnp.zeros((1, embed_dim), jnp.float32),
    }


def patchify(images, patch):
    # conv(stride=patch) expressed as a reshape: NCHW -> (B, 49, C*patch*patch)
    B, C, H, W = images.shape
    hp, wp = H // patch, W // patch
    x = images.reshape(B, C, hp, patch, wp, patch)
    x = x.transpose(0, 2, 4, 1, 3, 5).reshape(B, hp * wp, C * patch * patch)
    return x


def encoder_image_forward(images, params, patch=2, tb=8):
    B, C, H, W = images.shape
    x = patchify(images, patch)                      # (B, 49, patch_dim)
    n_tok, pdim = x.shape[1], x.shape[2]
    assert n_tok == 49, "feature map must be 7x7"
    assert tb % 8 == 0, "batch tile must fill sublanes"
    n_pad = 56                                       # 49 tokens padded to a multiple of 8
    rows = tb * n_pad
    attn_half = 64                                   # 2*64 = 128 lanes -> unmasked output store

    cnn_dim = params["cnn_w"].shape[1]
    embed_dim = params["fc_w"].shape[1]
    d_h = params["p_w1"].shape[1]

    # ---- host-side prep: pad tokens/batch, flatten for M = TB*56 matmuls -----
    b_pad = ((B + tb - 1) // tb) * tb
    x = jnp.pad(x, ((0, b_pad - B), (0, n_pad - n_tok), (0, 0)))
    x_flat = x.reshape(b_pad * n_pad, pdim)

    # ---- constant selection tensors (tiny, host-built) ------------------------
    tok = jnp.arange(rows)
    img_id = tok // n_pad
    tok_pos = tok % n_pad
    valid = tok_pos < n_tok
    # pooling selector with validity folded in: 1/49 where (image matches AND token valid)
    sp = jnp.where((img_id[None, :] == jnp.arange(tb)[:, None]) & valid[None, :],
                   1.0 / n_tok, 0.0).astype(jnp.float32)                        # (tb, rows)
    g = (tok_pos[:, None] == jnp.arange(attn_half)[None, :]).astype(jnp.float32)  # (rows, 64)
    gt = jnp.transpose(g)                                                        # (64, rows)

    # ---- host-side weight fusion -----------------------------------------------
    w1f = jnp.concatenate([params["p_w1"], params["u_w1"]], axis=1)          # (C, 2*d_h)
    zcol = jnp.zeros((d_h, 1), jnp.float32)
    w2f = jnp.concatenate(
        [jnp.concatenate([params["p_w2"], zcol], axis=1),
         jnp.concatenate([zcol, params["u_w2"]], axis=1)], axis=0)           # (2*d_h, 2)
    w_sig = jnp.concatenate([params["u_fc2w"], params["u_fcw"]], axis=0)     # (2C, E)
    b_sig = params["u_fc2b"] + params["u_fcb"]

    # TODO(synk): at real sizes cast the big weights below (and x_flat) to bf16,
    # add pipeline_mode=pl.Buffered(1) on the constant-index weight specs and
    # raise vmem_limit_bytes in CompilerParams (esp. v7x 64 MiB VMEM); raise tb
    # to 16-32 on v6e/v5e.  Skipped at these toy shapes to keep f32 accuracy.
    weights = [params["cnn_w"], params["cnn_b"], params["fc_w"], params["fc_b"],
               w1f, w2f, params["p_fcw"], params["p_fcb"],
               params["ln_g"], params["ln_b"], w_sig, b_sig]

    consts = [sp, g, gt]
    const_specs = [pl.BlockSpec(c.shape, lambda b: (0, 0)) for c in consts]
    w_specs = [pl.BlockSpec(w.shape, lambda b: (0, 0)) for w in weights]
    in_specs = [pl.BlockSpec((rows, pdim), lambda b: (b, 0))] + const_specs + w_specs

    out_shape = (
        jax.ShapeDtypeStruct((b_pad, 3 * embed_dim), jnp.float32),  # emb | residual | logsigma
        jax.ShapeDtypeStruct((b_pad, 2 * attn_half), jnp.float32),  # attn | uncertainty attn
    )
    out_specs = (
        pl.BlockSpec((tb, 3 * embed_dim), lambda b: (b, 0)),
        pl.BlockSpec((tb, 2 * attn_half), lambda b: (b, 0)),
    )

    kernel = functools.partial(encoder_image_kernel, n_tok=n_tok)
    vecs, attn_pk = pl.pallas_call(
        kernel,
        grid=(b_pad // tb,),
        in_specs=in_specs,
        out_specs=out_specs,
        out_shape=out_shape,
        compiler_params=pltpu.CompilerParams(dimension_semantics=("parallel",)),
    )(x_flat, *consts, *weights)

    E = embed_dim
    return {
        "embedding": vecs[:B, 0:E],
        "attention": attn_pk[:B, 0:n_tok].reshape(B, n_tok, 1),
        "residual": vecs[:B, E:2 * E],
        "logsigma": vecs[:B, 2 * E:3 * E],
        "uncertainty_attention": attn_pk[:B, attn_half:attn_half + n_tok].reshape(B, n_tok, 1),
    }


def encoder_image_reference(images, params, patch=2):
    """Pure-jnp reference for a correctness check."""
    x = patchify(images, patch)                                     # (B, 49, pdim)
    feats = jnp.maximum(jnp.einsum("btp,pc->btc", x, params["cnn_w"]) + params["cnn_b"], 0.0)
    pooled = jnp.mean(feats, axis=1)                                # (B, cnn_dim)
    out = pooled @ params["fc_w"] + params["fc_b"]
    a = jnp.tanh(jnp.einsum("btc,ch->bth", feats, params["p_w1"]))
    logits = jnp.einsum("bth,ho->bto", a, params["p_w2"])
    attn = jax.nn.softmax(logits, axis=1)
    res_feat = jnp.einsum("bto,btc->bc", attn, feats)
    residual = jax.nn.sigmoid(res_feat @ params["p_fcw"] + params["p_fcb"])
    h = out + residual
    mu = jnp.mean(h, axis=-1, keepdims=True)
    var = jnp.mean((h - mu) ** 2, axis=-1, keepdims=True)
    out_ln = (h - mu) * jax.lax.rsqrt(var + 1e-5) * params["ln_g"] + params["ln_b"]
    ua = jnp.tanh(jnp.einsum("btc,ch->bth", feats, params["u_w1"]))
    uattn = jax.nn.softmax(jnp.einsum("bth,ho->bto", ua, params["u_w2"]), axis=1)
    ures = jnp.einsum("bto,btc->bc", uattn, feats)
    logsigma = (ures @ params["u_fc2w"] + params["u_fc2b"]
                + pooled @ params["u_fcw"] + params["u_fcb"])
    emb = out_ln / jnp.maximum(
        jnp.sqrt(jnp.sum(out_ln * out_ln, axis=-1, keepdims=True)), 1e-12)
    return {"embedding": emb, "attention": attn, "residual": residual,
            "logsigma": logsigma, "uncertainty_attention": uattn}


if __name__ == "__main__":
    # 14x14 image, 2x2 patches -> 7x7 feature map; B=12 with TB=8 -> grid of 2
    # (exercises batch padding and keeps >=2 grid steps for v7x's 2 TCs).
    # NOTE: these toy dims (cnn=embed=32, pdim=12) pad every MXU tile; do not
    # tune TB / buffering / dtypes from this config — benchmark at real sizes.
    B, C, H, W = 12, 3, 14, 14
    cnn_dim, embed_dim, patch = 32, 32, 2
    patch_dim = C * patch * patch

    key = jax.random.PRNGKey(0)
    k_img, k_par = jax.random.split(key)
    images = jax.random.normal(k_img, (B, C, H, W), jnp.float32)
    params = make_params(k_par, patch_dim, cnn_dim, embed_dim)

    out = encoder_image_forward(images, params, patch=patch, tb=8)
    jax.block_until_ready(out)

    ref = encoder_image_reference(images, params, patch=patch)
    for name in ("embedding", "attention", "residual", "logsigma", "uncertainty_attention"):
        assert out[name].shape == ref[name].shape, name
        assert jnp.allclose(out[name], ref[name], rtol=1e-4, atol=1e-4), name

    print("KERNEL_OK")
</pallas_src>

<mosaic_0001>
module attributes {stable_mosaic.version = 11 : i64} {
  func.func @encoder_image_kernel(%arg0: i32, %arg1: memref<448x12xf32, #tpu.memory_space<vmem>>, %arg2: memref<8x448xf32, #tpu.memory_space<vmem>>, %arg3: memref<448x64xf32, #tpu.memory_space<vmem>>, %arg4: memref<64x448xf32, #tpu.memory_space<vmem>>, %arg5: memref<12x32xf32, #tpu.memory_space<vmem>>, %arg6: memref<1x32xf32, #tpu.memory_space<vmem>>, %arg7: memref<32x32xf32, #tpu.memory_space<vmem>>, %arg8: memref<1x32xf32, #tpu.memory_space<vmem>>, %arg9: memref<32x32xf32, #tpu.memory_space<vmem>>, %arg10: memref<32x2xf32, #tpu.memory_space<vmem>>, %arg11: memref<32x32xf32, #tpu.memory_space<vmem>>, %arg12: memref<1x32xf32, #tpu.memory_space<vmem>>, %arg13: memref<1x32xf32, #tpu.memory_space<vmem>>, %arg14: memref<1x32xf32, #tpu.memory_space<vmem>>, %arg15: memref<64x32xf32, #tpu.memory_space<vmem>>, %arg16: memref<1x32xf32, #tpu.memory_space<vmem>>, %arg17: memref<8x96xf32, #tpu.memory_space<vmem>>, %arg18: memref<8x128xf32, #tpu.memory_space<vmem>>) attributes {dimension_semantics = [#tpu.dimension_semantics<parallel>], iteration_bounds = array<i64: 2>, scalar_prefetch = 0 : i64, scratch_operands = 0 : i64, tpu.core_type = #tpu.core_type<tc>, window_params = [{transform_indices = @transform_0, window_bounds = array<i64: 448, 12>}, {pipeline_mode = #tpu.pipeline_mode<synchronous>, transform_indices = @transform_1, window_bounds = array<i64: 8, 448>}, {pipeline_mode = #tpu.pipeline_mode<synchronous>, transform_indices = @transform_2, window_bounds = array<i64: 448, 64>}, {pipeline_mode = #tpu.pipeline_mode<synchronous>, transform_indices = @transform_3, window_bounds = array<i64: 64, 448>}, {pipeline_mode = #tpu.pipeline_mode<synchronous>, transform_indices = @transform_4, window_bounds = array<i64: 12, 32>}, {pipeline_mode = #tpu.pipeline_mode<synchronous>, transform_indices = @transform_5, window_bounds = array<i64: 1, 32>}, {pipeline_mode = #tpu.pipeline_mode<synchronous>, transform_indices = @transform_6, window_bounds = array<i64: 32, 32>}, {pipeline_mode = #tpu.pipeline_mode<synchronous>, transform_indices = @transform_7, window_bounds = array<i64: 1, 32>}, {pipeline_mode = #tpu.pipeline_mode<synchronous>, transform_indices = @transform_8, window_bounds = array<i64: 32, 32>}, {pipeline_mode = #tpu.pipeline_mode<synchronous>, transform_indices = @transform_9, window_bounds = array<i64: 32, 2>}, {pipeline_mode = #tpu.pipeline_mode<synchronous>, transform_indices = @transform_10, window_bounds = array<i64: 32, 32>}, {pipeline_mode = #tpu.pipeline_mode<synchronous>, transform_indices = @transform_11, window_bounds = array<i64: 1, 32>}, {pipeline_mode = #tpu.pipeline_mode<synchronous>, transform_indices = @transform_12, window_bounds = array<i64: 1, 32>}, {pipeline_mode = #tpu.pipeline_mode<synchronous>, transform_indices = @transform_13, window_bounds = array<i64: 1, 32>}, {pipeline_mode = #tpu.pipeline_mode<synchronous>, transform_indices = @transform_14, window_bounds = array<i64: 64, 32>}, {pipeline_mode = #tpu.pipeline_mode<synchronous>, transform_indices = @transform_15, window_bounds = array<i64: 1, 32>}, {transform_indices = @transform_16, window_bounds = array<i64: 8, 96>}, {transform_indices = @transform_17, window_bounds = array<i64: 8, 128>}]} {
    %c0 = arith.constant 0 : index
    %c0_0 = arith.constant 0 : index
    %0 = vector.load %arg2[%c0, %c0_0] : memref<8x448xf32, #tpu.memory_space<vmem>>, vector<8x448xf32>
    %cst = arith.constant 0.000000e+00 : f32
    %1 = vector.broadcast %cst : f32 to vector<8x448xf32>
    %2 = arith.cmpf ogt, %0, %1 : vector<8x448xf32>
    %3 = arith.extui %2 : vector<8x448xi1> to vector<8x448xi32>
    %4 = arith.sitofp %3 : vector<8x448xi32> to vector<8x448xf32>
    %c0_1 = arith.constant 0 : index
    %c0_2 = arith.constant 0 : index
    %5 = vector.load %arg3[%c0_1, %c0_2] : memref<448x64xf32, #tpu.memory_space<vmem>>, vector<448x64xf32>
    %c0_3 = arith.constant 0 : index
    %c0_4 = arith.constant 0 : index
    %6 = vector.load %arg4[%c0_3, %c0_4] : memref<64x448xf32, #tpu.memory_space<vmem>>, vector<64x448xf32>
    %c0_5 = arith.constant 0 : index
    %c0_6 = arith.constant 0 : index
    %7 = vector.load %arg1[%c0_5, %c0_6] : memref<448x12xf32, #tpu.memory_space<vmem>>, vector<448x12xf32>
    %c0_7 = arith.constant 0 : index
    %c0_8 = arith.constant 0 : index
    %8 = vector.load %arg5[%c0_7, %c0_8] : memref<12x32xf32, #tpu.memory_space<vmem>>, vector<12x32xf32>
    %cst_9 = arith.constant dense<0.000000e+00> : vector<448x32xf32>
    %9 = tpu.matmul %7, %8, %cst_9 {dimension_numbers = #tpu.dot_dimension_numbers<[1], [0], [0], [1], [0, 0, 1, 1], [], []>} : vector<448x12xf32>, vector<12x32xf32>, vector<448x32xf32> -> vector<448x32xf32>
    %c0_10 = arith.constant 0 : index
    %c0_11 = arith.constant 0 : index
    %10 = vector.load %arg6[%c0_10, %c0_11] : memref<1x32xf32, #tpu.memory_space<vmem>>, vector<1x32xf32>
    %11 = vector.broadcast %10 : vector<1x32xf32> to vector<448x32xf32>
    %12 = arith.addf %9, %11 : vector<448x32xf32>
    %cst_12 = arith.constant 0.000000e+00 : f32
    %13 = vector.broadcast %cst_12 : f32 to vector<448x32xf32>
    %14 = arith.maximumf %12, %13 : vector<448x32xf32>
    %c0_13 = arith.constant 0 : index
    %c0_14 = arith.constant 0 : index
    %15 = vector.load %arg9[%c0_13, %c0_14] : memref<32x32xf32, #tpu.memory_space<vmem>>, vector<32x32xf32>
    %cst_15 = arith.constant dense<0.000000e+00> : vector<448x32xf32>
    %16 = tpu.matmul %14, %15, %cst_15 {dimension_numbers = #tpu.dot_dimension_numbers<[1], [0], [0], [1], [0, 0, 1, 1], [], []>} : vector<448x32xf32>, vector<32x32xf32>, vector<448x32xf32> -> vector<448x32xf32>
    %17 = math.tanh %16 : vector<448x32xf32>
    %c0_16 = arith.constant 0 : index
    %c0_17 = arith.constant 0 : index
    %18 = vector.load %arg10[%c0_16, %c0_17] : memref<32x2xf32, #tpu.memory_space<vmem>>, vector<32x2xf32>
    %cst_18 = arith.constant dense<0.000000e+00> : vector<448x2xf32>
    %19 = tpu.matmul %17, %18, %cst_18 {dimension_numbers = #tpu.dot_dimension_numbers<[1], [0], [0], [1], [0, 0, 1, 1], [], []>} : vector<448x32xf32>, vector<32x2xf32>, vector<448x2xf32> -> vector<448x2xf32>
    %20 = vector.extract_strided_slice %19 {offsets = [0, 0], sizes = [448, 1], strides = [1, 1]} : vector<448x2xf32> to vector<448x1xf32>
    %21 = vector.broadcast %20 : vector<448x1xf32> to vector<448x64xf32>
    %22 = arith.mulf %21, %5 : vector<448x64xf32>
    %cst_19 = arith.constant dense<0.000000e+00> : vector<8x64xf32>
    %23 = tpu.matmul %4, %22, %cst_19 {dimension_numbers = #tpu.dot_dimension_numbers<[1], [0], [0], [1], [0, 0, 1, 1], [], []>} : vector<8x448xf32>, vector<448x64xf32>, vector<8x64xf32> -> vector<8x64xf32>
    %24 = vector.extract_strided_slice %19 {offsets = [0, 1], sizes = [448, 1], strides = [1, 1]} : vector<448x2xf32> to vector<448x1xf32>
    %25 = vector.broadcast %24 : vector<448x1xf32> to vector<448x64xf32>
    %26 = arith.mulf %25, %5 : vector<448x64xf32>
    %cst_20 = arith.constant dense<0.000000e+00> : vector<8x64xf32>
    %27 = tpu.matmul %4, %26, %cst_20 {dimension_numbers = #tpu.dot_dimension_numbers<[1], [0], [0], [1], [0, 0, 1, 1], [], []>} : vector<8x448xf32>, vector<448x64xf32>, vector<8x64xf32> -> vector<8x64xf32>
    %28 = tpu.iota {dimensions = array<i32: 1>} : vector<1x64xi32>
    %c49_i32 = arith.constant 49 : i32
    %29 = vector.broadcast %c49_i32 : i32 to vector<1x64xi32>
    %30 = arith.cmpi slt, %28, %29 : vector<1x64xi32>
    %cst_21 = arith.constant -1.000000e+30 : f32
    %31 = vector.shape_cast %30 : vector<1x64xi1> to vector<1x64xi1>
    %32 = vector.broadcast %31 : vector<1x64xi1> to vector<8x64xi1>
    %33 = vector.broadcast %cst_21 : f32 to vector<8x64xf32>
    %34 = arith.select %32, %23, %33 : vector<8x64xi1>, vector<8x64xf32>
    %cst_22 = arith.constant -1.000000e+30 : f32
    %35 = vector.shape_cast %30 : vector<1x64xi1> to vector<1x64xi1>
    %36 = vector.broadcast %35 : vector<1x64xi1> to vector<8x64xi1>
    %37 = vector.broadcast %cst_22 : f32 to vector<8x64xf32>
    %38 = arith.select %36, %27, %37 : vector<8x64xi1>, vector<8x64xf32>
    %cst_23 = arith.constant dense<0xFF800000> : vector<8xf32>
    %39 = vector.multi_reduction <maximumf>, %34, %cst_23 [1] : vector<8x64xf32> to vector<8xf32>
    %40 = vector.shape_cast %39 : vector<8xf32> to vector<8x1xf32>
    %41 = vector.broadcast %40 : vector<8x1xf32> to vector<8x64xf32>
    %42 = arith.subf %34, %41 : vector<8x64xf32>
    %43 = math.exp %42 : vector<8x64xf32>
    %cst_24 = arith.constant dense<0xFF800000> : vector<8xf32>
    %44 = vector.multi_reduction <maximumf>, %38, %cst_24 [1] : vector<8x64xf32> to vector<8xf32>
    %45 = vector.shape_cast %44 : vector<8xf32> to vector<8x1xf32>
    %46 = vector.broadcast %45 : vector<8x1xf32> to vector<8x64xf32>
    %47 = arith.subf %38, %46 : vector<8x64xf32>
    %48 = math.exp %47 : vector<8x64xf32>
    %cst_25 = arith.constant dense<0.000000e+00> : vector<8xf32>
    %49 = vector.multi_reduction <add>, %43, %cst_25 [1] : vector<8x64xf32> to vector<8xf32>
    %50 = vector.shape_cast %49 : vector<8xf32> to vector<8x1xf32>
    %cst_26 = arith.constant 1.000000e+00 : f32
    %51 = vector.broadcast %cst_26 : f32 to vector<8x1xf32>
    %52 = arith.divf %51, %50 : vector<8x1xf32>
    %53 = vector.broadcast %52 : vector<8x1xf32> to vector<8x64xf32>
    %54 = arith.mulf %43, %53 : vector<8x64xf32>
    %cst_27 = arith.constant dense<0.000000e+00> : vector<8xf32>
    %55 = vector.multi_reduction <add>, %48, %cst_27 [1] : vector<8x64xf32> to vector<8xf32>
    %56 = vector.shape_cast %55 : vector<8xf32> to vector<8x1xf32>
    %cst_28 = arith.constant 1.000000e+00 : f32
    %57 = vector.broadcast %cst_28 : f32 to vector<8x1xf32>
    %58 = arith.divf %57, %56 : vector<8x1xf32>
    %59 = vector.broadcast %58 : vector<8x1xf32> to vector<8x64xf32>
    %60 = arith.mulf %48, %59 : vector<8x64xf32>
    %cst_29 = arith.constant dense<0.000000e+00> : vector<8x448xf32>
    %61 = tpu.matmul %54, %6, %cst_29 {dimension_numbers = #tpu.dot_dimension_numbers<[1], [0], [0], [1], [0, 0, 1, 1], [], []>} : vector<8x64xf32>, vector<64x448xf32>, vector<8x448xf32> -> vector<8x448xf32>
    %62 = arith.mulf %61, %4 : vector<8x448xf32>
    %cst_30 = arith.constant dense<0.000000e+00> : vector<8x448xf32>
    %63 = tpu.matmul %60, %6, %cst_30 {dimension_numbers = #tpu.dot_dimension_numbers<[1], [0], [0], [1], [0, 0, 1, 1], [], []>} : vector<8x64xf32>, vector<64x448xf32>, vector<8x448xf32> -> vector<8x448xf32>
    %64 = arith.mulf %63, %4 : vector<8x448xf32>
    %65 = tpu.concatenate %0, %62, %64 in 0 : vector<8x448xf32>, vector<8x448xf32>, vector<8x448xf32> -> vector<24x448xf32>
    %cst_31 = arith.constant dense<0.000000e+00> : vector<24x32xf32>
    %66 = tpu.matmul %65, %14, %cst_31 {dimension_numbers = #tpu.dot_dimension_numbers<[1], [0], [0], [1], [0, 0, 1, 1], [], []>} : vector<24x448xf32>, vector<448x32xf32>, vector<24x32xf32> -> vector<24x32xf32>
    %67 = vector.extract_strided_slice %66 {offsets = [0, 0], sizes = [8, 32], strides = [1, 1]} : vector<24x32xf32> to vector<8x32xf32>
    %68 = vector.extract_strided_slice %66 {offsets = [8, 0], sizes = [8, 32], strides = [1, 1]} : vector<24x32xf32> to vector<8x32xf32>
    %69 = vector.extract_strided_slice %66 {offsets = [16, 0], sizes = [8, 32], strides = [1, 1]} : vector<24x32xf32> to vector<8x32xf32>
    %c0_32 = arith.constant 0 : index
    %c0_33 = arith.constant 0 : index
    %70 = vector.load %arg7[%c0_32, %c0_33] : memref<32x32xf32, #tpu.memory_space<vmem>>, vector<32x32xf32>
    %cst_34 = arith.constant dense<0.000000e+00> : vector<8x32xf32>
    %71 = tpu.matmul %67, %70, %cst_34 {dimension_numbers = #tpu.dot_dimension_numbers<[1], [0], [0], [1], [0, 0, 1, 1], [], []>} : vector<8x32xf32>, vector<32x32xf32>, vector<8x32xf32> -> vector<8x32xf32>
    %c0_35 = arith.constant 0 : index
    %c0_36 = arith.constant 0 : index
    %72 = vector.load %arg8[%c0_35, %c0_36] : memref<1x32xf32, #tpu.memory_space<vmem>>, vector<1x32xf32>
    %73 = vector.broadcast %72 : vector<1x32xf32> to vector<8x32xf32>
    %74 = arith.addf %71, %73 : vector<8x32xf32>
    %c0_37 = arith.constant 0 : index
    %c0_38 = arith.constant 0 : index
    %75 = vector.load %arg11[%c0_37, %c0_38] : memref<32x32xf32, #tpu.memory_space<vmem>>, vector<32x32xf32>
    %cst_39 = arith.constant dense<0.000000e+00> : vector<8x32xf32>
    %76 = tpu.matmul %68, %75, %cst_39 {dimension_numbers = #tpu.dot_dimension_numbers<[1], [0], [0], [1], [0, 0, 1, 1], [], []>} : vector<8x32xf32>, vector<32x32xf32>, vector<8x32xf32> -> vector<8x32xf32>
    %c0_40 = arith.constant 0 : index
    %c0_41 = arith.constant 0 : index
    %77 = vector.load %arg12[%c0_40, %c0_41] : memref<1x32xf32, #tpu.memory_space<vmem>>, vector<1x32xf32>
    %78 = vector.broadcast %77 : vector<1x32xf32> to vector<8x32xf32>
    %79 = arith.addf %76, %78 : vector<8x32xf32>
    %80 = arith.negf %79 : vector<8x32xf32>
    %81 = math.exp %80 : vector<8x32xf32>
    %cst_42 = arith.constant 1.000000e+00 : f32
    %82 = vector.broadcast %cst_42 : f32 to vector<8x32xf32>
    %83 = arith.addf %82, %81 : vector<8x32xf32>
    %84 = arith.divf %82, %83 : vector<8x32xf32>
    %85 = arith.addf %74, %84 : vector<8x32xf32>
    %cst_43 = arith.constant dense<0.000000e+00> : vector<8xf32>
    %86 = vector.multi_reduction <add>, %85, %cst_43 [1] : vector<8x32xf32> to vector<8xf32>
    %87 = vector.shape_cast %86 : vector<8xf32> to vector<8x1xf32>
    %cst_44 = arith.constant 3.200000e+01 : f32
    %88 = vector.broadcast %cst_44 : f32 to vector<8x1xf32>
    %89 = arith.divf %87, %88 : vector<8x1xf32>
    %90 = vector.broadcast %89 : vector<8x1xf32> to vector<8x32xf32>
    %91 = arith.subf %85, %90 : vector<8x32xf32>
    %92 = arith.mulf %91, %91 : vector<8x32xf32>
    %cst_45 = arith.constant dense<0.000000e+00> : vector<8xf32>
    %93 = vector.multi_reduction <add>, %92, %cst_45 [1] : vector<8x32xf32> to vector<8xf32>
    %94 = vector.shape_cast %93 : vector<8xf32> to vector<8x1xf32>
    %cst_46 = arith.constant 3.200000e+01 : f32
    %95 = vector.broadcast %cst_46 : f32 to vector<8x1xf32>
    %96 = arith.divf %94, %95 : vector<8x1xf32>
    %97 = vector.broadcast %89 : vector<8x1xf32> to vector<8x32xf32>
    %98 = arith.subf %85, %97 : vector<8x32xf32>
    %cst_47 = arith.constant 9.99999974E-6 : f32
    %99 = vector.broadcast %cst_47 : f32 to vector<8x1xf32>
    %100 = arith.addf %96, %99 : vector<8x1xf32>
    %101 = math.rsqrt %100 : vector<8x1xf32>
    %102 = vector.broadcast %101 : vector<8x1xf32> to vector<8x32xf32>
    %103 = arith.mulf %98, %102 : vector<8x32xf32>
    %c0_48 = arith.constant 0 : index
    %c0_49 = arith.constant 0 : index
    %104 = vector.load %arg13[%c0_48, %c0_49] : memref<1x32xf32, #tpu.memory_space<vmem>>, vector<1x32xf32>
    %105 = vector.broadcast %104 : vector<1x32xf32> to vector<8x32xf32>
    %106 = arith.mulf %103, %105 : vector<8x32xf32>
    %c0_50 = arith.constant 0 : index
    %c0_51 = arith.constant 0 : index
    %107 = vector.load %arg14[%c0_50, %c0_51] : memref<1x32xf32, #tpu.memory_space<vmem>>, vector<1x32xf32>
    %108 = vector.broadcast %107 : vector<1x32xf32> to vector<8x32xf32>
    %109 = arith.addf %106, %108 : vector<8x32xf32>
    %110 = tpu.concatenate %69, %67 in 1 : vector<8x32xf32>, vector<8x32xf32> -> vector<8x64xf32>
    %c0_52 = arith.constant 0 : index
    %c0_53 = arith.constant 0 : index
    %111 = vector.load %arg15[%c0_52, %c0_53] : memref<64x32xf32, #tpu.memory_space<vmem>>, vector<64x32xf32>
    %cst_54 = arith.constant dense<0.000000e+00> : vector<8x32xf32>
    %112 = tpu.matmul %110, %111, %cst_54 {dimension_numbers = #tpu.dot_dimension_numbers<[1], [0], [0], [1], [0, 0, 1, 1], [], []>} : vector<8x64xf32>, vector<64x32xf32>, vector<8x32xf32> -> vector<8x32xf32>
    %c0_55 = arith.constant 0 : index
    %c0_56 = arith.constant 0 : index
    %113 = vector.load %arg16[%c0_55, %c0_56] : memref<1x32xf32, #tpu.memory_space<vmem>>, vector<1x32xf32>
    %114 = vector.broadcast %113 : vector<1x32xf32> to vector<8x32xf32>
    %115 = arith.addf %112, %114 : vector<8x32xf32>
    %116 = arith.mulf %109, %109 : vector<8x32xf32>
    %cst_57 = arith.constant dense<0.000000e+00> : vector<8xf32>
    %117 = vector.multi_reduction <add>, %116, %cst_57 [1] : vector<8x32xf32> to vector<8xf32>
    %118 = vector.shape_cast %117 : vector<8xf32> to vector<8x1xf32>
    %cst_58 = arith.constant 1.000000e-24 : f32
    %119 = vector.broadcast %cst_58 : f32 to vector<8x1xf32>
    %120 = arith.maximumf %118, %119 : vector<8x1xf32>
    %121 = math.rsqrt %120 : vector<8x1xf32>
    %122 = vector.broadcast %121 : vector<8x1xf32> to vector<8x32xf32>
    %123 = arith.mulf %109, %122 : vector<8x32xf32>
    %124 = tpu.concatenate %123, %84, %115 in 1 : vector<8x32xf32>, vector<8x32xf32>, vector<8x32xf32> -> vector<8x96xf32>
    %c0_59 = arith.constant 0 : index
    %c0_60 = arith.constant 0 : index
    %125 = vector.load %arg17[%c0_59, %c0_60] : memref<8x96xf32, #tpu.memory_space<vmem>>, vector<8x96xf32>
    tpu.vector_store %arg17[%c0_59, %c0_60], %124 {strides = array<i32>} : memref<8x96xf32, #tpu.memory_space<vmem>>, vector<8x96xf32>,
    %126 = tpu.concatenate %54, %60 in 1 : vector<8x64xf32>, vector<8x64xf32> -> vector<8x128xf32>
    %c0_61 = arith.constant 0 : index
    %c0_62 = arith.constant 0 : index
    %127 = vector.load %arg18[%c0_61, %c0_62] : memref<8x128xf32, #tpu.memory_space<vmem>>, vector<8x128xf32>
    tpu.vector_store %arg18[%c0_61, %c0_62], %126 {strides = array<i32>} : memref<8x128xf32, #tpu.memory_space<vmem>>, vector<8x128xf32>,
    return
  }
  func.func @transform_0(%arg0: i32) -> (i32, i32) {
    %c0_i32 = arith.constant 0 : i32
    %c0_i32_0 = arith.constant 0 : i32
    return %arg0, %c0_i32 : i32, i32
  }
  func.func @transform_1(%arg0: i32) -> (i32, i32) {
    %c0_i32 = arith.constant 0 : i32
    %c0_i32_0 = arith.constant 0 : i32
    %c0_i32_1 = arith.constant 0 : i32
    return %c0_i32, %c0_i32_0 : i32, i32
  }
  func.func @transform_2(%arg0: i32) -> (i32, i32) {
    %c0_i32 = arith.constant 0 : i32
    %c0_i32_0 = arith.constant 0 : i32
    %c0_i32_1 = arith.constant 0 : i32
    return %c0_i32, %c0_i32_0 : i32, i32
  }
  func.func @transform_3(%arg0: i32) -> (i32, i32) {
    %c0_i32 = arith.constant 0 : i32
    %c0_i32_0 = arith.constant 0 : i32
    %c0_i32_1 = arith.constant 0 : i32
    return %c0_i32, %c0_i32_0 : i32, i32
  }
  func.func @transform_4(%arg0: i32) -> (i32, i32) {
    %c0_i32 = arith.constant 0 : i32
    %c0_i32_0 = arith.constant 0 : i32
    %c0_i32_1 = arith.constant 0 : i32
    return %c0_i32, %c0_i32_0 : i32, i32
  }
  func.func @transform_5(%arg0: i32) -> (i32, i32) {
    %c0_i32 = arith.constant 0 : i32
    %c0_i32_0 = arith.constant 0 : i32
    %c0_i32_1 = arith.constant 0 : i32
    return %c0_i32, %c0_i32_0 : i32, i32
  }
  func.func @transform_6(%arg0: i32) -> (i32, i32) {
    %c0_i32 = arith.constant 0 : i32
    %c0_i32_0 = arith.constant 0 : i32
    %c0_i32_1 = arith.constant 0 : i32
    return %c0_i32, %c0_i32_0 : i32, i32
  }
  func.func @transform_7(%arg0: i32) -> (i32, i32) {
    %c0_i32 = arith.constant 0 : i32
    %c0_i32_0 = arith.constant 0 : i32
    %c0_i32_1 = arith.constant 0 : i32
    return %c0_i32, %c0_i32_0 : i32, i32
  }
  func.func @transform_8(%arg0: i32) -> (i32, i32) {
    %c0_i32 = arith.constant 0 : i32
    %c0_i32_0 = arith.constant 0 : i32
    %c0_i32_1 = arith.constant 0 : i32
    return %c0_i32, %c0_i32_0 : i32, i32
  }
  func.func @transform_9(%arg0: i32) -> (i32, i32) {
    %c0_i32 = arith.constant 0 : i32
    %c0_i32_0 = arith.constant 0 : i32
    %c0_i32_1 = arith.constant 0 : i32
    return %c0_i32, %c0_i32_0 : i32, i32
  }
  func.func @transform_10(%arg0: i32) -> (i32, i32) {
    %c0_i32 = arith.constant 0 : i32
    %c0_i32_0 = arith.constant 0 : i32
    %c0_i32_1 = arith.constant 0 : i32
    return %c0_i32, %c0_i32_0 : i32, i32
  }
  func.func @transform_11(%arg0: i32) -> (i32, i32) {
    %c0_i32 = arith.constant 0 : i32
    %c0_i32_0 = arith.constant 0 : i32
    %c0_i32_1 = arith.constant 0 : i32
    return %c0_i32, %c0_i32_0 : i32, i32
  }
  func.func @transform_12(%arg0: i32) -> (i32, i32) {
    %c0_i32 = arith.constant 0 : i32
    %c0_i32_0 = arith.constant 0 : i32
    %c0_i32_1 = arith.constant 0 : i32
    return %c0_i32, %c0_i32_0 : i32, i32
  }
  func.func @transform_13(%arg0: i32) -> (i32, i32) {
    %c0_i32 = arith.constant 0 : i32
    %c0_i32_0 = arith.constant 0 : i32
    %c0_i32_1 = arith.constant 0 : i32
    return %c0_i32, %c0_i32_0 : i32, i32
  }
  func.func @transform_14(%arg0: i32) -> (i32, i32) {
    %c0_i32 = arith.constant 0 : i32
    %c0_i32_0 = arith.constant 0 : i32
    %c0_i32_1 = arith.constant 0 : i32
    return %c0_i32, %c0_i32_0 : i32, i32
  }
  func.func @transform_15(%arg0: i32) -> (i32, i32) {
    %c0_i32 = arith.constant 0 : i32
    %c0_i32_0 = arith.constant 0 : i32
    %c0_i32_1 = arith.constant 0 : i32
    return %c0_i32, %c0_i32_0 : i32, i32
  }
  func.func @transform_16(%arg0: i32) -> (i32, i32) {
    %c0_i32 = arith.constant 0 : i32
    %c0_i32_0 = arith.constant 0 : i32
    return %arg0, %c0_i32 : i32, i32
  }
  func.func @transform_17(%arg0: i32) -> (i32, i32) {
    %c0_i32 = arith.constant 0 : i32
    %c0_i32_0 = arith.constant 0 : i32
    return %arg0, %c0_i32 : i32, i32
  }
}

</mosaic_0001>

<bundles_post_ra>
// kernel: tpu_custom_call.1
= control target key start
LH: loop header
LB: loop body
LE: loop exit
PB: predicated region body
PF: predicated region fallthrough
CT: control target
= control target key end

     0   :  { %s5888_s0 = inlined_call_operand.vmem [shape: f32[896,12], index: 0, kind: input, shape index: {}]   ;;  %s5889_s1 = inlined_call_operand.vmem [shape: f32[8,448], index: 1, kind: input, shape index: {}]   ;;  %s5890_s2 = inlined_call_operand.vmem [shape: f32[448,64], index: 2, kind: input, shape index: {}]   ;;  %s5891_s3 = inlined_call_operand.vmem [shape: f32[64,448], index: 3, kind: input, shape index: {}]   ;;  %s5892_s4 = inlined_call_operand.vmem [shape: f32[12,32], index: 4, kind: input, shape index: {}]   ;;  %s5893_s5 = inlined_call_operand.vmem [shape: f32[1,32], index: 5, kind: input, shape index: {}]   ;;  %s5894_s6 = inlined_call_operand.vmem [shape: f32[32,32], index: 6, kind: input, shape index: {}]   ;;  %s5895_s7 = inlined_call_operand.vmem [shape: f32[1,32], index: 7, kind: input, shape index: {}]   ;;  %s5896_s8 = inlined_call_operand.vmem [shape: f32[32,32], index: 8, kind: input, shape index: {}]   ;;  %s5897_s9 = inlined_call_operand.vmem [shape: f32[32,2], index: 9, kind: input, shape index: {}]   ;;  %s5898_s10 = inlined_call_operand.vmem [shape: f32[32,32], index: 10, kind: input, shape index: {}]   ;;  %s5899_s11 = inlined_call_operand.vmem [shape: f32[1,32], index: 11, kind: input, shape index: {}]   ;;  %s5900_s12 = inlined_call_operand.vmem [shape: f32[1,32], index: 12, kind: input, shape index: {}]   ;;  %s5901_s13 = inlined_call_operand.vmem [shape: f32[1,32], index: 13, kind: input, shape index: {}]   ;;  %s5902_s14 = inlined_call_operand.vmem [shape: f32[64,32], index: 14, kind: input, shape index: {}]   ;;  %s5903_s15 = inlined_call_operand.vmem [shape: f32[1,32], index: 15, kind: input, shape index: {}]   ;;  %s5904_s16 = inlined_call_operand.hbm [shape: f32[16,96], index: 16, kind: output, shape index: {0}]   ;;  %s5905_s17 = inlined_call_operand.hbm [shape: f32[16,128], index: 17, kind: output, shape index: {1}]  }
   0x1   :  { %6021 = sst [smem:[#allocation90_spill]] %s5888_s0 }
   0x2   :  { %6022 = sst [smem:[#allocation91_spill]] %s5889_s1 }
   0x3   :  { %6023 = sst [smem:[#allocation92_spill]] %s5890_s2 }
   0x4   :  { %6024 = sst [smem:[#allocation93_spill]] %s5891_s3 }
   0x5   :  { %6025 = sst [smem:[#allocation94_spill]] %s5892_s4 }
   0x6   :  { %6026 = sst [smem:[#allocation95_spill]] %s5893_s5 }
   0x7   :  { %6027 = sst [smem:[#allocation96_spill]] %s5894_s6 }
   0x8   :  { %23 = vsyncpa [#allocation3], 0 }
   0x9   :  { %25 = vsyncpa [#allocation3 + $0x1], 0 }
   0xa   :  { %26 = vsyncpa [#allocation5], 0 }
   0xb   :  { %28 = vsyncpa [#allocation5 + $0x1], 0  ;;  %s3985_s24 = smov 0   ;;  %s3987_s25 = smov 0  }
   0xc   :  { %s3989_s26 = smov 0   ;;  %s3991_s27 = smov 0  }
   0xd LB: > { %6028 = sst [smem:[#allocation8_spill]] %s3882_s26  ;;  %s4006_s28 = sadd.s32 4294967295, %s3886_s27   ;;  %s3886_s27 = sphi %s3991_s27, %s6255_s27   ;;  %s3882_s26 = sphi %s3989_s26, %s6257_s26   ;;  %s3878_s25 = sphi %s3987_s25, %s6259_s25   ;;  %s3874_s24 = sphi %s3985_s24, %s6258_s24  }
   0xe   : > { %s3355_s29 = sadd.s32 4294967294, %s3886_s27   ;;  %s4010_s0 = sadd.s32 1, %s3886_s27  }
   0xf   : > { %6029 = sst [smem:[#allocation9_spill]] %s4010_s0  ;;  %s382_s30 = sadd.s32 1, %s3882_s26 }
  0x10   : > { %s379_s18 = ssub.s32 %s3886_s27, %s4010_s0  ;;  %p392_p0 = scmp.ne.s32.totalorder %s3882_s26, %s3878_s25 }
  0x11   : > { %p380_p1 = scmp.eq.s32.totalorder %s379_s18, 0  ;;  %p393_p2 = scmp.eq.s32.totalorder %s4006_s28, 1 }
  0x12   : > { %p398_p3 = scmp.ne.s32.totalorder %s3878_s25, %s3874_s24  ;;  %p399_p4 = scmp.eq.s32.totalorder %s3355_s29, 1 }
  0x13   : > { %s4021_s19 = scalar_select %p380_p1, %s3882_s26, %s382_s30  }
  0x14   : > { %p4023_p5 = por %p393_p2, %p392_p0  ;;  %p4027_p6 = por %p399_p4, %p398_p3 }
  0x15   : > { %6030 = sst [smem:[#allocation10_spill]] %s4021_s19  ;;  %p3358_p7 = scmp.ge.s32.totalorder %s3886_s27, 1 }
  0x16   : > { %s6032_s20 = scalar_select %p4027_p6, 1, 0 }
  0x17   : > { %p497_p8 = scmp.lt.s32.totalorder %s3886_s27, 3 }
  0x18   : > { %6033 = sst [smem:[#allocation11_spill]] %s6032_s20 }
  0x19   : > { %p498_p9 = pnand %p3358_p7, %p497_p8 }
  0x1b   : > { %501 = sbr.rel (%p498_p9) target bundleno = 2505 (0x9c9), region = 84 }
  0x20   : > { %s6034_s4 = sld [smem:[#allocation94_spill]]  ;;  %vm895_vm0 = vcmask 1043456   ;;  %s554_s30 = smul.u32 56, %s4006_s28  ;;  %vm726_vm1 = vcmask 97280   ;;  %v1143_v14 = vld [vmem:[%s5896_s8 + $0x18] sm:$0xff]  ;;  %v1142_v15 = vld [vmem:[%s5896_s8 + $0x10] sm:$0xff] }
  0x21   : > { %s6035_s0 = sld [smem:[#allocation90_spill]]  ;;  %1325 = vmatpush.msra.mxu1 %v1143_v14  ;;  %v1141_v17 = vld [vmem:[%s5896_s8 + $0x8] sm:$0xff]  ;;  %v1140_v18 = vld [vmem:[%s5896_s8] sm:$0xff]  ;;  %vm1144_vm2 = vcmask 261120   ;;  %vm2247_vm5 = vcmask 523264   ;;  %s6020_s26 = smov 64  }
  0x22   : > { %p555_p10 = scmp.lt.s32.totalorder %s554_s30, 111  ;;  %s6036_s5 = sld [smem:[#allocation95_spill]] }
  0x23   : > { %1326 = vmatpush.msra.mxu1 %v1142_v15  ;;  %s6086_s2 = sld [smem:[#allocation92_spill]] }
  0x24   : > { %s6261_s30 = smov (!%p555_p10, %s554_s30), 111  ;;  %s6153_s6 = sld [smem:[#allocation96_spill]] }
  0x25   : > { %s3361_s18 = sshll.u32 %s6261_s30, 3  ;;  %1327 = vmatpush.msra.mxu1 %v1141_v17  ;;  %s6124_s30 = sld [smem:[#allocation91_spill]] }
  0x26   : > { %v721_v0 = vld [vmem:[%s6034_s4 + $0x8] sm:$0xf]  ;;  %v720_v1 = vld [vmem:[%s6034_s4] sm:$0xff]  ;;  %s6154_s3 = sld [smem:[#allocation93_spill]] }
  0x27   : > { %3366 = vmatpush.msk.msra.mxu0 %vm895_vm0, %v721_v0  ;;  %s4043_s20 = scalar_lea.vmem %s6035_s0, %s3361_s18  ;;  %1328 = vmatpush.msra.mxu1 %v1140_v18  ;;  %s3560_s18 = sshll.u32 %s4006_s28, 3 }
  0x28   : > { %v664_v2 = vld [vmem:[%s4043_s20] sm:$0xff]  ;;  %v665_v3 = vld [vmem:[%s4043_s20 + $0x8] sm:$0xff]  ;;  %v666_v4 = vld [vmem:[%s4043_s20 + $0x10] sm:$0xff]  ;;  %s3258_s19 = scalar_lea.hbm %s5905_s17, %s3560_s18 }
  0x29   : > { %914 = vmatpush.msra.mxu0 %v720_v1  ;;  %v667_v5 = vld [vmem:[%s4043_s20 + $0x18] sm:$0xff]  ;;  %v668_v6 = vld [vmem:[%s4043_s20 + $0x20] sm:$0xff]  ;;  %v669_v7 = vld [vmem:[%s4043_s20 + $0x28] sm:$0xff] }
  0x2a   : > { %3367 = vmatmul.msk.f32.vlgmr.msra.gmra.mxu0 %vm726_vm1, %v664_v2  ;;  %v670_v8 = vld [vmem:[%s4043_s20 + $0x30] sm:$0xff]  ;;  %v671_v9 = vld [vmem:[%s4043_s20 + $0x38] sm:$0xff]  ;;  %v672_v10 = vld [vmem:[%s4043_s20 + $0x40] sm:$0xff] }
  0x2b   : > { %v673_v11 = vld [vmem:[%s4043_s20 + $0x48] sm:$0xff]  ;;  %v674_v12 = vld [vmem:[%s4043_s20 + $0x50] sm:$0xff]  ;;  %v675_v13 = vld [vmem:[%s4043_s20 + $0x58] sm:$0xff] }
  0x2c   : > { %v676_v16 = vld [vmem:[%s4043_s20 + $0x60] sm:$0xff]  ;;  %v677_v19 = vld [vmem:[%s4043_s20 + $0x68] sm:$0xff]  ;;  %v678_v20 = vld [vmem:[%s4043_s20 + $0x70] sm:$0xff] }
  0x2d   : > { %v679_v21 = vld [vmem:[%s4043_s20 + $0x78] sm:$0xff]  ;;  %v4092_v22 = vld [vmem:[%s6036_s5] ss:$0 sm:$0xff]  ;;  %v681_v28 = vld [vmem:[%s4043_s20 + $0x88] sm:$0xff] }
  0x2e   : > { %v680_v24 = vld [vmem:[%s4043_s20 + $0x80] sm:$0xff]  ;;  %v682_v32 = vld [vmem:[%s4043_s20 + $0x90] sm:$0xff]  ;;  %v683_v36 = vld [vmem:[%s4043_s20 + $0x98] sm:$0xff] }
  0x2f   : > { %v684_v40 = vld [vmem:[%s4043_s20 + $0xa0] sm:$0xff]  ;;  %v685_v44 = vld [vmem:[%s4043_s20 + $0xa8] sm:$0xff]  ;;  %v686_v48 = vld [vmem:[%s4043_s20 + $0xb0] sm:$0xff] }
  0x30   : > { %v687_v52 = vld [vmem:[%s4043_s20 + $0xb8] sm:$0xff]  ;;  %v688_v56 = vld [vmem:[%s4043_s20 + $0xc0] sm:$0xff]  ;;  %v689_v60 = vld [vmem:[%s4043_s20 + $0xc8] sm:$0xff] }
  0x31   : > { %v690_v0 = vld [vmem:[%s4043_s20 + $0xd0] sm:$0xff]  ;;  %v693_v15 = vld [vmem:[%s4043_s20 + $0xe8] sm:$0xff] }
  0x32   : > { %3368 = vmatmul.msk.f32.gmra.mxu0 %vm726_vm1, %v665_v3 }
  0x3a   : > { %3369 = vmatmul.msk.f32.gmra.mxu0 %vm726_vm1, %v666_v4  ;;  %v691_v4 = vld [vmem:[%s4043_s20 + $0xd8] sm:$0xff] }
  0x42   : > { %3370 = vmatmul.msk.f32.gmra.mxu0 %vm726_vm1, %v667_v5 }
  0x4a   : > { %3371 = vmatmul.msk.f32.gmra.mxu0 %vm726_vm1, %v668_v6 }
  0x52   : > { %3372 = vmatmul.msk.f32.gmra.mxu0 %vm726_vm1, %v669_v7 }
  0x5a   : > { %3373 = vmatmul.msk.f32.gmra.mxu0 %vm726_vm1, %v670_v8  ;;  %v692_v8 = vld [vmem:[%s4043_s20 + $0xe0] sm:$0xff] }
  0x62   : > { %3374 = vmatmul.msk.f32.gmra.mxu0 %vm726_vm1, %v671_v9 }
  0x6a   : > { %3375 = vmatmul.msk.f32.gmra.mxu0 %vm726_vm1, %v672_v10  ;;  %v1557_v10 = vld [vmem:[%s5897_s9 + $0x18] sm:$0xff] }
  0x6b   : > { %1738 = vmatpush.msra.mxu2 %v1557_v10 }
  0x72   : > { %3376 = vmatmul.msk.f32.gmra.mxu0 %vm726_vm1, %v673_v11 }
  0x7a   : > { %3377 = vmatmul.msk.f32.gmra.mxu0 %vm726_vm1, %v674_v12  ;;  %v1556_v12 = vld [vmem:[%s5897_s9 + $0x10] sm:$0xff] }
  0x7b   : > { %1739 = vmatpush.msra.mxu2 %v1556_v12 }
  0x82   : > { %3378 = vmatmul.msk.f32.gmra.mxu0 %vm726_vm1, %v675_v13  ;;  %v1555_v13 = vld [vmem:[%s5897_s9 + $0x8] sm:$0xff] }
  0x83   : > { %1740 = vmatpush.msra.mxu2 %v1555_v13 }
  0x8a   : > { %3379 = vmatmul.msk.f32.gmra.mxu0 %vm726_vm1, %v676_v16  ;;  %v1554_v16 = vld [vmem:[%s5897_s9] sm:$0xff] }
  0x8b   : > { %1741 = vmatpush.msra.mxu2 %v1554_v16 }
  0x92   : > { %3380 = vmatmul.msk.f32.gmra.mxu0 %vm726_vm1, %v677_v19 }
  0x9a   : > { %3381 = vmatmul.msk.f32.gmra.mxu0 %vm726_vm1, %v678_v20  ;;  %v694_v20 = vld [vmem:[%s4043_s20 + $0xf0] sm:$0xff] }
  0xa2   : > { %3382 = vmatmul.msk.f32.gmra.mxu0 %vm726_vm1, %v679_v21 }
  0xa7   : > { %v916_v23 = vpop.f32.mrf.mxu0 }
  0xa8   : > { %v4096_v25 = vadd.f32 %v4092_v22, %v916_v23 }
  0xaa   : > { %6037 = vst [vmem:[#allocation12_spill] sm:$0xff] %v4096_v25  ;;  %v5930_v26 = vmax.f32 %v4096_v25, 0.0  ;;  %3383 = vmatmul.msk.f32.gmra.mxu0 %vm726_vm1, %v680_v24 }
  0xac   : > { %3423 = vmatmul.msk.f32.vlgmr.msra.gmra.mxu1 %vm1144_vm2, %v5930_v26 }
  0xaf   : > { %v919_v27 = vpop.f32.mrf.mxu0 }
  0xb0   : > { %v4105_v29 = vadd.f32 %v4092_v22, %v919_v27  ;;  %v695_v27 = vld [vmem:[%s4043_s20 + $0xf8] sm:$0xff] }
  0xb2   : > { %6038 = vst [vmem:[#allocation13_spill] sm:$0xff] %v4105_v29  ;;  %v5931_v30 = vmax.f32 %v4105_v29, 0.0  ;;  %3384 = vmatmul.msk.f32.gmra.mxu0 %vm726_vm1, %v681_v28 }
  0xb4   : > { %3424 = vmatmul.msk.f32.gmra.mxu1 %vm1144_vm2, %v5931_v30 }
  0xb7   : > { %v922_v31 = vpop.f32.mrf.mxu0 }
  0xb8   : > { %v4114_v33 = vadd.f32 %v4092_v22, %v922_v31 }
  0xba   : > { %6039 = vst [vmem:[#allocation14_spill] sm:$0xff] %v4114_v33  ;;  %v5933_v34 = vmax.f32 %v4114_v33, 0.0  ;;  %3385 = vmatmul.msk.f32.gmra.mxu0 %vm726_vm1, %v682_v32 }
  0xbc   : > { %3425 = vmatmul.msk.f32.gmra.mxu1 %vm1144_vm2, %v5933_v34 }
  0xbf   : > { %v925_v35 = vpop.f32.mrf.mxu0 }
  0xc0   : > { %v4123_v37 = vadd.f32 %v4092_v22, %v925_v35  ;;  %v696_v35 = vld [vmem:[%s4043_s20 + $0x100] sm:$0xff] }
  0xc2   : > { %6040 = vst [vmem:[#allocation15_spill] sm:$0xff] %v4123_v37  ;;  %v5935_v38 = vmax.f32 %v4123_v37, 0.0  ;;  %3386 = vmatmul.msk.f32.gmra.mxu0 %vm726_vm1, %v683_v36 }
  0xc4   : > { %3426 = vmatmul.msk.f32.gmra.mxu1 %vm1144_vm2, %v5935_v38 }
  0xc7   : > { %v928_v39 = vpop.f32.mrf.mxu0 }
  0xc8   : > { %v4132_v41 = vadd.f32 %v4092_v22, %v928_v39 }
  0xca   : > { %6041 = vst [vmem:[#allocation16_spill] sm:$0xff] %v4132_v41  ;;  %v5937_v42 = vmax.f32 %v4132_v41, 0.0  ;;  %3387 = vmatmul.msk.f32.gmra.mxu0 %vm726_vm1, %v684_v40 }
  0xcc   : > { %3427 = vmatmul.msk.f32.gmra.mxu1 %vm1144_vm2, %v5937_v42 }
  0xcf   : > { %v931_v43 = vpop.f32.mrf.mxu0 }
  0xd0   : > { %v4141_v45 = vadd.f32 %v4092_v22, %v931_v43 }
  0xd2   : > { %6042 = vst [vmem:[#allocation17_spill] sm:$0xff] %v4141_v45  ;;  %v5939_v46 = vmax.f32 %v4141_v45, 0.0  ;;  %3388 = vmatmul.msk.f32.gmra.mxu0 %vm726_vm1, %v685_v44  ;;  %v697_v44 = vld [vmem:[%s4043_s20 + $0x108] sm:$0xff] }
  0xd4   : > { %3428 = vmatmul.msk.f32.gmra.mxu1 %vm1144_vm2, %v5939_v46 }
  0xd7   : > { %v934_v47 = vpop.f32.mrf.mxu0 }
  0xd8   : > { %v4150_v49 = vadd.f32 %v4092_v22, %v934_v47 }
  0xda   : > { %6043 = vst [vmem:[#allocation18_spill] sm:$0xff] %v4150_v49  ;;  %v5941_v50 = vmax.f32 %v4150_v49, 0.0  ;;  %3389 = vmatmul.msk.f32.gmra.mxu0 %vm726_vm1, %v686_v48 }
  0xdc   : > { %3429 = vmatmul.msk.f32.gmra.mxu1 %vm1144_vm2, %v5941_v50 }
  0xdf   : > { %v937_v51 = vpop.f32.mrf.mxu0 }
  0xe0   : > { %v4159_v53 = vadd.f32 %v4092_v22, %v937_v51 }
  0xe2   : > { %6044 = vst [vmem:[#allocation19_spill] sm:$0xff] %v4159_v53  ;;  %v5942_v54 = vmax.f32 %v4159_v53, 0.0  ;;  %3390 = vmatmul.msk.f32.gmra.mxu0 %vm726_vm1, %v687_v52 }
  0xe4   : > { %3430 = vmatmul.msk.f32.gmra.mxu1 %vm1144_vm2, %v5942_v54 }
  0xe7   : > { %v940_v55 = vpop.f32.mrf.mxu0 }
  0xe8   : > { %v4168_v57 = vadd.f32 %v4092_v22, %v940_v55 }
  0xea   : > { %6045 = vst [vmem:[#allocation20_spill] sm:$0xff] %v4168_v57  ;;  %v5944_v58 = vmax.f32 %v4168_v57, 0.0  ;;  %3391 = vmatmul.msk.f32.gmra.mxu0 %vm726_vm1, %v688_v56  ;;  %v698_v56 = vld [vmem:[%s4043_s20 + $0x110] sm:$0xff] }
  0xec   : > { %3431 = vmatmul.msk.f32.gmra.mxu1 %vm1144_vm2, %v5944_v58 }
  0xef   : > { %v943_v59 = vpop.f32.mrf.mxu0 }
  0xf0   : > { %v4177_v61 = vadd.f32 %v4092_v22, %v943_v59 }
  0xf2   : > { %6046 = vst [vmem:[#allocation21_spill] sm:$0xff] %v4177_v61  ;;  %v5946_v62 = vmax.f32 %v4177_v61, 0.0  ;;  %3392 = vmatmul.msk.f32.gmra.mxu0 %vm726_vm1, %v689_v60 }
  0xf4   : > { %3432 = vmatmul.msk.f32.gmra.mxu1 %vm1144_vm2, %v5946_v62 }
  0xf7   : > { %v946_v63 = vpop.f32.mrf.mxu0 }
  0xf8   : > { %v4186_v1 = vadd.f32 %v4092_v22, %v946_v63 }
  0xfa   : > { %6047 = vst [vmem:[#allocation22_spill] sm:$0xff] %v4186_v1  ;;  %v5948_v2 = vmax.f32 %v4186_v1, 0.0  ;;  %3393 = vmatmul.msk.f32.gmra.mxu0 %vm726_vm1, %v690_v0 }
  0xfc   : > { %3433 = vmatmul.msk.f32.gmra.mxu1 %vm1144_vm2, %v5948_v2 }
  0xff   : > { %v949_v3 = vpop.f32.mrf.mxu0 }
 0x100   : > { %v4195_v5 = vadd.f32 %v4092_v22, %v949_v3 }
 0x102   : > { %6048 = vst [vmem:[#allocation23_spill] sm:$0xff] %v4195_v5  ;;  %v5950_v6 = vmax.f32 %v4195_v5, 0.0  ;;  %3394 = vmatmul.msk.f32.gmra.mxu0 %vm726_vm1, %v691_v4  ;;  %v699_v4 = vld [vmem:[%s4043_s20 + $0x118] sm:$0xff] }
 0x104   : > { %3434 = vmatmul.msk.f32.gmra.mxu1 %vm1144_vm2, %v5950_v6 }
 0x107   : > { %v952_v7 = vpop.f32.mrf.mxu0 }
 0x108   : > { %v4204_v9 = vadd.f32 %v4092_v22, %v952_v7 }
 0x10a   : > { %6049 = vst [vmem:[#allocation24_spill] sm:$0xff] %v4204_v9  ;;  %v5952_v11 = vmax.f32 %v4204_v9, 0.0  ;;  %3395 = vmatmul.msk.f32.gmra.mxu0 %vm726_vm1, %v692_v8 }
 0x10c   : > { %3435 = vmatmul.msk.f32.gmra.mxu1 %vm1144_vm2, %v5952_v11 }
 0x10f   : > { %v955_v14 = vpop.f32.mrf.mxu0 }
 0x110   : > { %v4225_v17 = vadd.f32 %v4092_v22, %v955_v14  ;;  %v700_v14 = vld [vmem:[%s4043_s20 + $0x120] sm:$0xff] }
 0x112   : > { %6050 = vst [vmem:[#allocation25_spill] sm:$0xff] %v4225_v17  ;;  %v5953_v18 = vmax.f32 %v4225_v17, 0.0  ;;  %3396 = vmatmul.msk.f32.gmra.mxu0 %vm726_vm1, %v693_v15 }
 0x114   : > { %3436 = vmatmul.msk.f32.gmra.mxu1 %vm1144_vm2, %v5953_v18 }
 0x117   : > { %v958_v19 = vpop.f32.mrf.mxu0 }
 0x118   : > { %v4234_v21 = vadd.f32 %v4092_v22, %v958_v19 }
 0x11a   : > { %6051 = vst [vmem:[#allocation26_spill] sm:$0xff] %v4234_v21  ;;  %v5955_v23 = vmax.f32 %v4234_v21, 0.0  ;;  %3397 = vmatmul.msk.f32.gmra.mxu0 %vm726_vm1, %v694_v20 }
 0x11c   : > { %3437 = vmatmul.msk.f32.gmra.mxu1 %vm1144_vm2, %v5955_v23 }
 0x11f   : > { %v961_v24 = vpop.f32.mrf.mxu0 }
 0x120   : > { %v4243_v28 = vadd.f32 %v4092_v22, %v961_v24 }
 0x122   : > { %6052 = vst [vmem:[#allocation27_spill] sm:$0xff] %v4243_v28  ;;  %v5957_v31 = vmax.f32 %v4243_v28, 0.0  ;;  %3398 = vmatmul.msk.f32.gmra.mxu0 %vm726_vm1, %v695_v27  ;;  %v701_v27 = vld [vmem:[%s4043_s20 + $0x128] sm:$0xff] }
 0x124   : > { %3438 = vmatmul.msk.f32.gmra.mxu1 %vm1144_vm2, %v5957_v31 }
 0x127   : > { %v964_v32 = vpop.f32.mrf.mxu0 }
 0x128   : > { %v4252_v36 = vadd.f32 %v4092_v22, %v964_v32 }
 0x129   : > { %v1330_v39 = vpop.f32.mrf.mxu1 }
 0x12a   : > { %6053 = vst [vmem:[#allocation28_spill] sm:$0xff] %v4252_v36  ;;  %v5911_v40 = vmax.f32 %v4252_v36, 0.0  ;;  %3661 = vtanh.f32 %v1330_v39  ;;  %3399 = vmatmul.msk.f32.gmra.mxu0 %vm726_vm1, %v696_v35 }
 0x12c   : > { %3439 = vmatmul.msk.f32.gmra.mxu1 %vm1144_vm2, %v5911_v40 }
 0x12f   : > { %v967_v43 = vpop.f32.mrf.mxu0 }
 0x130   : > { %v3662_v47 = vpop.eup %3661  ;;  %v4261_v48 = vadd.f32 %v4092_v22, %v967_v43 }
 0x131   : > { %v1333_v51 = vpop.f32.mrf.mxu1  ;;  %3479 = vmatmul.msk.f32.vlgmr.msra.gmra.mxu2 %vm1144_vm2, %v3662_v47  ;;  %v702_v47 = vld [vmem:[%s4043_s20 + $0x130] sm:$0xff] }
 0x132   : > { %6054 = vst [vmem:[#allocation29_spill] sm:$0xff] %v4261_v48  ;;  %v5912_v52 = vmax.f32 %v4261_v48, 0.0  ;;  %3663 = vtanh.f32 %v1333_v51  ;;  %3400 = vmatmul.msk.f32.gmra.mxu0 %vm726_vm1, %v697_v44 }
 0x134   : > { %3440 = vmatmul.msk.f32.gmra.mxu1 %vm1144_vm2, %v5912_v52 }
 0x137   : > { %v970_v55 = vpop.f32.mrf.mxu0 }
 0x138   : > { %v3664_v59 = vpop.eup %3663  ;;  %v4271_v60 = vadd.f32 %v4092_v22, %v970_v55 }
 0x139   : > { %v1336_v63 = vpop.f32.mrf.mxu1  ;;  %3480 = vmatmul.msk.f32.gmra.mxu2 %vm1144_vm2, %v3664_v59 }
 0x13a   : > { %6055 = vst [vmem:[#allocation30_spill] sm:$0xff] %v4271_v60  ;;  %v5913_v0 = vmax.f32 %v4271_v60, 0.0  ;;  %3665 = vtanh.f32 %v1336_v63  ;;  %3401 = vmatmul.msk.f32.gmra.mxu0 %vm726_vm1, %v698_v56 }
 0x13c   : > { %3441 = vmatmul.msk.f32.gmra.mxu1 %vm1144_vm2, %v5913_v0 }
 0x13f   : > { %v973_v3 = vpop.f32.mrf.mxu0 }
 0x140   : > { %v3666_v7 = vpop.eup %3665  ;;  %v4281_v8 = vadd.f32 %v4092_v22, %v973_v3  ;;  %v703_v3 = vld [vmem:[%s4043_s20 + $0x138] sm:$0xff] }
 0x141   : > { %v1339_v10 = vpop.f32.mrf.mxu1  ;;  %3481 = vmatmul.msk.f32.gmra.mxu2 %vm1144_vm2, %v3666_v7 }
 0x142   : > { %6056 = vst [vmem:[#allocation31_spill] sm:$0xff] %v4281_v8  ;;  %v5914_v12 = vmax.f32 %v4281_v8, 0.0  ;;  %3667 = vtanh.f32 %v1339_v10  ;;  %3402 = vmatmul.msk.f32.gmra.mxu0 %vm726_vm1, %v699_v4 }
 0x144   : > { %3442 = vmatmul.msk.f32.gmra.mxu1 %vm1144_vm2, %v5914_v12 }
 0x147   : > { %v976_v13 = vpop.f32.mrf.mxu0 }
 0x148   : > { %v3668_v15 = vpop.eup %3667  ;;  %v4291_v16 = vadd.f32 %v4092_v22, %v976_v13 }
 0x149   : > { %v1342_v19 = vpop.f32.mrf.mxu1  ;;  %3482 = vmatmul.msk.f32.gmra.mxu2 %vm1144_vm2, %v3668_v15  ;;  %v704_v15 = vld [vmem:[%s4043_s20 + $0x140] sm:$0xff] }
 0x14a   : > { %6057 = vst [vmem:[#allocation32_spill] sm:$0xff] %v4291_v16  ;;  %v5915_v20 = vmax.f32 %v4291_v16, 0.0  ;;  %3669 = vtanh.f32 %v1342_v19  ;;  %3403 = vmatmul.msk.f32.gmra.mxu0 %vm726_vm1, %v700_v14 }
 0x14c   : > { %3443 = vmatmul.msk.f32.gmra.mxu1 %vm1144_vm2, %v5915_v20 }
 0x14f   : > { %v979_v24 = vpop.f32.mrf.mxu0 }
 0x150   : > { %v3670_v32 = vpop.eup %3669  ;;  %v4301_v35 = vadd.f32 %v4092_v22, %v979_v24 }
 0x151   : > { %v1345_v39 = vpop.f32.mrf.mxu1  ;;  %3483 = vmatmul.msk.f32.gmra.mxu2 %vm1144_vm2, %v3670_v32 }
 0x152   : > { %6058 = vst [vmem:[#allocation33_spill] sm:$0xff] %v4301_v35  ;;  %v5916_v43 = vmax.f32 %v4301_v35, 0.0  ;;  %3671 = vtanh.f32 %v1345_v39  ;;  %3404 = vmatmul.msk.f32.gmra.mxu0 %vm726_vm1, %v701_v27 }
 0x154   : > { %3444 = vmatmul.msk.f32.gmra.mxu1 %vm1144_vm2, %v5916_v43 }
 0x157   : > { %v982_v44 = vpop.f32.mrf.mxu0 }
 0x158   : > { %v3672_v51 = vpop.eup %3671  ;;  %v4311_v55 = vadd.f32 %v4092_v22, %v982_v44  ;;  %v705_v44 = vld [vmem:[%s4043_s20 + $0x148] sm:$0xff] }
 0x159   : > { %v1348_v56 = vpop.f32.mrf.mxu1  ;;  %3484 = vmatmul.msk.f32.gmra.mxu2 %vm1144_vm2, %v3672_v51 }
 0x15a   : > { %6059 = vst [vmem:[#allocation34_spill] sm:$0xff] %v4311_v55  ;;  %v5917_v59 = vmax.f32 %v4311_v55, 0.0  ;;  %3673 = vtanh.f32 %v1348_v56  ;;  %3405 = vmatmul.msk.f32.gmra.mxu0 %vm726_vm1, %v702_v47 }
 0x15c   : > { %3445 = vmatmul.msk.f32.gmra.mxu1 %vm1144_vm2, %v5917_v59  ;;  %v711_v59 = vld [vmem:[%s4043_s20 + $0x178] sm:$0xff] }
 0x15f   : > { %v985_v63 = vpop.f32.mrf.mxu0 }
 0x160   : > { %v3674_v4 = vpop.eup %3673  ;;  %v4321_v7 = vadd.f32 %v4092_v22, %v985_v63 }
 0x161   : > { %v1351_v10 = vpop.f32.mrf.mxu1  ;;  %3485 = vmatmul.msk.f32.gmra.mxu2 %vm1144_vm2, %v3674_v4  ;;  %v706_v4 = vld [vmem:[%s4043_s20 + $0x150] sm:$0xff] }
 0x162   : > { %6060 = vst [vmem:[#allocation35_spill] sm:$0xff] %v4321_v7  ;;  %v5918_v13 = vmax.f32 %v4321_v7, 0.0  ;;  %3675 = vtanh.f32 %v1351_v10  ;;  %3406 = vmatmul.msk.f32.gmra.mxu0 %vm726_vm1, %v703_v3 }
 0x164   : > { %3446 = vmatmul.msk.f32.gmra.mxu1 %vm1144_vm2, %v5918_v13 }
 0x167   : > { %v988_v14 = vpop.f32.mrf.mxu0 }
 0x168   : > { %v3676_v19 = vpop.eup %3675  ;;  %v4331_v24 = vadd.f32 %v4092_v22, %v988_v14 }
 0x169   : > { %v1354_v27 = vpop.f32.mrf.mxu1  ;;  %3486 = vmatmul.msk.f32.gmra.mxu2 %vm1144_vm2, %v3676_v19 }
 0x16a   : > { %6061 = vst [vmem:[#allocation36_spill] sm:$0xff] %v4331_v24  ;;  %v5919_v32 = vmax.f32 %v4331_v24, 0.0  ;;  %3677 = vtanh.f32 %v1354_v27  ;;  %3407 = vmatmul.msk.f32.gmra.mxu0 %vm726_vm1, %v704_v15 }
 0x16c   : > { %3447 = vmatmul.msk.f32.gmra.mxu1 %vm1144_vm2, %v5919_v32  ;;  %v712_v32 = vld [vmem:[%s4043_s20 + $0x180] sm:$0xff] }
 0x16f   : > { %v991_v39 = vpop.f32.mrf.mxu0 }
 0x170   : > { %v3678_v47 = vpop.eup %3677  ;;  %v4341_v51 = vadd.f32 %v4092_v22, %v991_v39  ;;  %v707_v39 = vld [vmem:[%s4043_s20 + $0x158] sm:$0xff] }
 0x171   : > { %v1357_v56 = vpop.f32.mrf.mxu1  ;;  %3487 = vmatmul.msk.f32.gmra.mxu2 %vm1144_vm2, %v3678_v47 }
 0x172   : > { %6062 = vst [vmem:[#allocation37_spill] sm:$0xff] %v4341_v51  ;;  %v5920_v63 = vmax.f32 %v4341_v51, 0.0  ;;  %3679 = vtanh.f32 %v1357_v56  ;;  %3408 = vmatmul.msk.f32.gmra.mxu0 %vm726_vm1, %v705_v44 }
 0x174   : > { %3448 = vmatmul.msk.f32.gmra.mxu1 %vm1144_vm2, %v5920_v63 }
 0x177   : > { %v994_v3 = vpop.f32.mrf.mxu0 }
 0x178   : > { %v3680_v10 = vpop.eup %3679  ;;  %v4351_v14 = vadd.f32 %v4092_v22, %v994_v3 }
 0x179   : > { %v1360_v15 = vpop.f32.mrf.mxu1  ;;  %3488 = vmatmul.msk.f32.gmra.mxu2 %vm1144_vm2, %v3680_v10  ;;  %v708_v10 = vld [vmem:[%s4043_s20 + $0x160] sm:$0xff] }
 0x17a   : > { %6063 = vst [vmem:[#allocation38_spill] sm:$0xff] %v4351_v14  ;;  %v5921_v19 = vmax.f32 %v4351_v14, 0.0  ;;  %3681 = vtanh.f32 %v1360_v15  ;;  %3409 = vmatmul.msk.f32.gmra.mxu0 %vm726_vm1, %v706_v4 }
 0x17c   : > { %3449 = vmatmul.msk.f32.gmra.mxu1 %vm1144_vm2, %v5921_v19 }
 0x17f   : > { %v997_v27 = vpop.f32.mrf.mxu0 }
 0x180   : > { %v3682_v44 = vpop.eup %3681  ;;  %v4361_v47 = vadd.f32 %v4092_v22, %v997_v27 }
 0x181   : > { %v1363_v56 = vpop.f32.mrf.mxu1  ;;  %3489 = vmatmul.msk.f32.gmra.mxu2 %vm1144_vm2, %v3682_v44 }
 0x182   : > { %6064 = vst [vmem:[#allocation39_spill] sm:$0xff] %v4361_v47  ;;  %v5922_v3 = vmax.f32 %v4361_v47, 0.0  ;;  %3683 = vtanh.f32 %v1363_v56  ;;  %3410 = vmatmul.msk.f32.gmra.mxu0 %vm726_vm1, %v707_v39  ;;  %v709_v56 = vld [vmem:[%s4043_s20 + $0x168] sm:$0xff] }
 0x184   : > { %3450 = vmatmul.msk.f32.gmra.mxu1 %vm1144_vm2, %v5922_v3 }
 0x187   : > { %v1000_v4 = vpop.f32.mrf.mxu0 }
 0x188   : > { %v3684_v15 = vpop.eup %3683  ;;  %v4371_v40 = vadd.f32 %v4092_v22, %v1000_v4 }
 0x189   : > { %v1366_v27 = vpop.f32.mrf.mxu1  ;;  %3490 = vmatmul.msk.f32.gmra.mxu2 %vm1144_vm2, %v3684_v15 }
 0x18a   : > { %6065 = vst [vmem:[#allocation40_spill] sm:$0xff] %v4371_v40  ;;  %v5923_v44 = vmax.f32 %v4371_v40, 0.0  ;;  %3685 = vtanh.f32 %v1366_v27  ;;  %3411 = vmatmul.msk.f32.gmra.mxu0 %vm726_vm1, %v708_v10  ;;  %v5958_v10 = vmov 1  }
 0x18b   : > { %3615 = vset.pattern.permute.xlu1 %v5958_v10  ;;  %3624 = vset.pattern.permute.xlu0 %v5958_v10 }
 0x18c   : > { %3451 = vmatmul.msk.f32.gmra.mxu1 %vm1144_vm2, %v5923_v44 }
 0x18f   : > { %v1003_v39 = vpop.f32.mrf.mxu0 }
 0x190   : > { %v3686_v52 = vpop.eup %3685  ;;  %v4381_v0 = vadd.f32 %v4092_v22, %v1003_v39  ;;  %v710_v39 = vld [vmem:[%s4043_s20 + $0x170] sm:$0xff] }
 0x191   : > { %v1369_v4 = vpop.f32.mrf.mxu1  ;;  %3491 = vmatmul.msk.f32.gmra.mxu2 %vm1144_vm2, %v3686_v52 }
 0x192   : > { %6066 = vst [vmem:[#allocation41_spill] sm:$0xff] %v4381_v0  ;;  %v5925_v15 = vmax.f32 %v4381_v0, 0.0  ;;  %3687 = vtanh.f32 %v1369_v4  ;;  %3412 = vmatmul.msk.f32.gmra.mxu0 %vm726_vm1, %v709_v56  ;;  %v5964_v4 = vmov 0  }
 0x193   : > { %3618 = vset.pattern.permute.xlu2 %v5964_v4 }
 0x194   : > { %3452 = vmatmul.msk.f32.gmra.mxu1 %vm1144_vm2, %v5925_v15 }
 0x197   : > { %v1006_v27 = vpop.f32.mrf.mxu0 }
 0x198   : > { %v3688_v12 = vpop.eup %3687  ;;  %v4393_v52 = vadd.f32 %v4092_v22, %v1006_v27 }
 0x199   : > { %v1372_v20 = vpop.f32.mrf.mxu1  ;;  %3492 = vmatmul.msk.f32.gmra.mxu2 %vm1144_vm2, %v3688_v12 }
 0x19a   : > { %6067 = vst [vmem:[#allocation42_spill] sm:$0xff] %v4393_v52  ;;  %v5927_v56 = vmax.f32 %v4393_v52, 0.0  ;;  %3689 = vtanh.f32 %v1372_v20  ;;  %3413 = vmatmul.msk.f32.gmra.mxu0 %vm726_vm1, %v710_v39 }
 0x19c   : > { %3453 = vmatmul.msk.f32.gmra.mxu1 %vm1144_vm2, %v5927_v56 }
 0x19f   : > { %v1009_v43 = vpop.f32.mrf.mxu0 }
 0x1a0   : > { %v3690_v27 = vpop.eup %3689  ;;  %v4404_v13 = vadd.f32 %v4092_v22, %v1009_v43 }
 0x1a1   : > { %v1375_v12 = vpop.f32.mrf.mxu1  ;;  %3493 = vmatmul.msk.f32.gmra.mxu2 %vm1144_vm2, %v3690_v27 }
 0x1a2   : > { %6068 = vst [vmem:[#allocation43_spill] sm:$0xff] %v4404_v13  ;;  %v5928_v20 = vmax.f32 %v4404_v13, 0.0  ;;  %3691 = vtanh.f32 %v1375_v12  ;;  %3414 = vmatmul.msk.f32.gmra.mxu0 %vm726_vm1, %v711_v59  ;;  %v713_v12 = vld [vmem:[%s4043_s20 + $0x188] sm:$0xff] }
 0x1a4   : > { %3454 = vmatmul.msk.f32.gmra.mxu1 %vm1144_vm2, %v5928_v20 }
 0x1a7   : > { %v1012_v39 = vpop.f32.mrf.mxu0 }
 0x1a8   : > { %v3692_v63 = vpop.eup %3691  ;;  %v4414_v19 = vadd.f32 %v4092_v22, %v1012_v39 }
 0x1a9   : > { %v1378_v43 = vpop.f32.mrf.mxu1  ;;  %3494 = vmatmul.msk.f32.gmra.mxu2 %vm1144_vm2, %v3692_v63 }
 0x1aa   : > { %6069 = vst [vmem:[#allocation44_spill] sm:$0xff] %v4414_v19  ;;  %v5924_v27 = vmax.f32 %v4414_v19, 0.0  ;;  %3693 = vtanh.f32 %v1378_v43  ;;  %3415 = vmatmul.msk.f32.gmra.mxu0 %vm726_vm1, %v712_v32 }
 0x1ac   : > { %3455 = vmatmul.msk.f32.gmra.mxu1 %vm1144_vm2, %v5924_v27 }
 0x1af   : > { %v1015_v59 = vpop.f32.mrf.mxu0 }
 0x1b0   : > { %v3694_v3 = vpop.eup %3693  ;;  %v4424_v44 = vadd.f32 %v4092_v22, %v1015_v59  ;;  %v714_v59 = vld [vmem:[%s4043_s20 + $0x190] sm:$0xff] }
 0x1b1   : > { %v1381_v39 = vpop.f32.mrf.mxu1  ;;  %3495 = vmatmul.msk.f32.gmra.mxu2 %vm1144_vm2, %v3694_v3 }
 0x1b2   : > { %6070 = vst [vmem:[#allocation45_spill] sm:$0xff] %v4424_v44  ;;  %v5926_v63 = vmax.f32 %v4424_v44, 0.0  ;;  %3695 = vtanh.f32 %v1381_v39  ;;  %3416 = vmatmul.msk.f32.gmra.mxu0 %vm726_vm1, %v713_v12 }
 0x1b4   : > { %3456 = vmatmul.msk.f32.gmra.mxu1 %vm1144_vm2, %v5926_v63  ;;  %v4432_v32 = vpop.f32.mrf.mxu2 }
 0x1b5   : > { %2332 = vperm.xlu1 %3615, %v4432_v32  }
 0x1b7   : > { %v1018_v43 = vpop.f32.mrf.mxu0 }
 0x1b8   : > { %v3696_v27 = vpop.eup %3695  ;;  %v4437_v15 = vadd.f32 %v4092_v22, %v1018_v43  ;;  %v715_v43 = vld [vmem:[%s4043_s20 + $0x198] sm:$0xff] }
 0x1b9   : > { %v1384_v3 = vpop.f32.mrf.mxu1  ;;  %3496 = vmatmul.msk.f32.gmra.mxu2 %vm1144_vm2, %v3696_v27 }
 0x1ba   : > { %6071 = vst [vmem:[#allocation46_spill] sm:$0xff] %v4437_v15  ;;  %v5929_v12 = vmax.f32 %v4437_v15, 0.0  ;;  %3697 = vtanh.f32 %v1384_v3  ;;  %3417 = vmatmul.msk.f32.gmra.mxu0 %vm726_vm1, %v714_v59  ;;  %v6088_v15 = vmov 1  }
 0x1bc   : > { %3457 = vmatmul.msk.f32.gmra.mxu1 %vm1144_vm2, %v5929_v12  ;;  %v1746_v39 = vpop.f32.mrf.mxu2 }
 0x1bd   : > { %3616 = vset.pattern.permute.xlu1 %v5964_v4 }
 0x1be   : > { %1918 = vperm.xlu1 %3616, %v1746_v39  }
 0x1bf   : > { %v1021_v63 = vpop.f32.mrf.mxu0 }
 0x1c0   : > { %v3698_v56 = vpop.eup %3697  ;;  %v4448_v20 = vadd.f32 %v4092_v22, %v1021_v63  ;;  %v716_v63 = vld [vmem:[%s4043_s20 + $0x1a0] sm:$0xff] }
 0x1c1   : > { %v1387_v27 = vpop.f32.mrf.mxu1  ;;  %3497 = vmatmul.msk.f32.gmra.mxu2 %vm1144_vm2, %v3698_v56 }
 0x1c2   : > { %6072 = vst [vmem:[#allocation47_spill] sm:$0xff] %v4448_v20  ;;  %v5932_v59 = vmax.f32 %v4448_v20, 0.0  ;;  %3699 = vtanh.f32 %v1387_v27  ;;  %3418 = vmatmul.msk.f32.gmra.mxu0 %vm726_vm1, %v715_v43 }
 0x1c4   : > { %3458 = vmatmul.msk.f32.gmra.mxu1 %vm1144_vm2, %v5932_v59  ;;  %v1749_v3 = vpop.f32.mrf.mxu2 }
 0x1c5   : > { %1923 = vperm.xlu2 %3618, %v1749_v3  }
 0x1c6   : > { %3617 = vset.pattern.permute.xlu1 %v5958_v10 }
 0x1c7   : > { %v1024_v12 = vpop.f32.mrf.mxu0  ;;  %2336 = vperm.xlu1 %3617, %v1746_v39   ;;  %v717_v39 = vld [vmem:[%s4043_s20 + $0x1a8] sm:$0xff] }
 0x1c8   : > { %v3700_v26 = vpop.eup %3699  ;;  %v4459_v56 = vadd.f32 %v4092_v22, %v1024_v12 }
 0x1c9   : > { %v1390_v30 = vpop.f32.mrf.mxu1  ;;  %3498 = vmatmul.msk.f32.gmra.mxu2 %vm1144_vm2, %v3700_v26 }
 0x1ca   : > { %6073 = vst [vmem:[#allocation48_spill] sm:$0xff] %v4459_v56  ;;  %v5934_v43 = vmax.f32 %v4459_v56, 0.0  ;;  %3701 = vtanh.f32 %v1390_v30  ;;  %3419 = vmatmul.msk.f32.gmra.mxu0 %vm726_vm1, %v716_v63 }
 0x1cc   : > { %3459 = vmatmul.msk.f32.gmra.mxu1 %vm1144_vm2, %v5934_v43  ;;  %v4467_v27 = vpop.f32.mrf.mxu2 }
 0x1cd   : > { %3619 = vset.pattern.permute.xlu2 %v5958_v10 }
 0x1ce   : > { %2340 = vperm.xlu2 %3619, %v1749_v3  }
 0x1cf   : > { %v1027_v12 = vpop.f32.mrf.mxu0 }
 0x1d0   : > { %v3702_v59 = vpop.eup %3701  ;;  %v4472_v26 = vadd.f32 %v4092_v22, %v1027_v12  ;;  %v718_v12 = vld [vmem:[%s4043_s20 + $0x1b0] sm:$0xff] }
 0x1d1   : > { %v1393_v34 = vpop.f32.mrf.mxu1  ;;  %3499 = vmatmul.msk.f32.gmra.mxu2 %vm1144_vm2, %v3702_v59 }
 0x1d2   : > { %6074 = vst [vmem:[#allocation49_spill] sm:$0xff] %v4472_v26  ;;  %v5936_v30 = vmax.f32 %v4472_v26, 0.0  ;;  %3703 = vtanh.f32 %v1393_v34  ;;  %3420 = vmatmul.msk.f32.gmra.mxu0 %vm726_vm1, %v717_v39 }
 0x1d4   : > { %3460 = vmatmul.msk.f32.gmra.mxu1 %vm1144_vm2, %v5936_v30  ;;  %v1755_v63 = vpop.f32.mrf.mxu2  ;;  %v719_v30 = vld [vmem:[%s4043_s20 + $0x1b8] sm:$0xff]  ;;  %s3892_s20 = smov 32  }
 0x1d5   : > { %2348 = vperm.xlu1 %3617, %v1755_v63  }
 0x1d6   : > { %2344 = vperm.xlu2 %3619, %v4467_v27  }
 0x1d7   : > { %v1030_v3 = vpop.f32.mrf.mxu0 }
 0x1d8   : > { %v3704_v43 = vpop.eup %3703  ;;  %v4483_v38 = vadd.f32 %v4092_v22, %v1030_v3 }
 0x1d9   : > { %v1396_v59 = vpop.f32.mrf.mxu1  ;;  %3500 = vmatmul.msk.f32.gmra.mxu2 %vm1144_vm2, %v3704_v43 }
 0x1da   : > { %6075 = vst [vmem:[#allocation50_spill] sm:$0xff] %v4483_v38  ;;  %v5938_v34 = vmax.f32 %v4483_v38, 0.0  ;;  %3705 = vtanh.f32 %v1396_v59  ;;  %3421 = vmatmul.msk.f32.gmra.mxu0 %vm726_vm1, %v718_v12 }
 0x1dc   : > { %3461 = vmatmul.msk.f32.gmra.mxu1 %vm1144_vm2, %v5938_v34  ;;  %v1758_v39 = vpop.f32.mrf.mxu2 }
 0x1dd   : > { %3621 = vset.pattern.permute.xlu1 %v5964_v4 }
 0x1de   : > { %3620 = vset.pattern.permute.xlu2 %v5964_v4  ;;  %1938 = vperm.xlu1 %3621, %v1758_v39  }
 0x1df   : > { %v1033_v3 = vpop.f32.mrf.mxu0  ;;  %1933 = vperm.xlu2 %3620, %v1755_v63  }
 0x1e0   : > { %v3706_v42 = vpop.eup %3705  ;;  %v4495_v43 = vadd.f32 %v4092_v22, %v1033_v3 }
 0x1e1   : > { %v1399_v59 = vpop.f32.mrf.mxu1  ;;  %3501 = vmatmul.msk.f32.gmra.mxu2 %vm1144_vm2, %v3706_v42 }
 0x1e2   : > { %6076 = vst [vmem:[#allocation51_spill] sm:$0xff] %v4495_v43  ;;  %v5940_v12 = vmax.f32 %v4495_v43, 0.0  ;;  %3707 = vtanh.f32 %v1399_v59  ;;  %3422 = vmatmul.msk.f32.gmra.mxu0 %vm726_vm1, %v719_v30  ;;  %v6090_v43 = vmov 0  }
 0x1e4   : > { %3462 = vmatmul.msk.f32.gmra.mxu1 %vm1144_vm2, %v5940_v12  ;;  %v4503_v34 = vpop.f32.mrf.mxu2 }
 0x1e7   : > { %v1036_v63 = vpop.f32.mrf.mxu0  ;;  %3622 = vset.pattern.permute.xlu2 %v5958_v10 }
 0x1e8   : > { %v3708_v46 = vpop.eup %3707  ;;  %v4507_v3 = vadd.f32 %v4092_v22, %v1036_v63  ;;  %2352 = vperm.xlu2 %3622, %v1758_v39  }
 0x1e9   : > { %v1402_v42 = vpop.f32.mrf.mxu1  ;;  %3502 = vmatmul.msk.f32.gmra.mxu2 %vm1144_vm2, %v3708_v46 }
 0x1ea   : > { %6077 = vst [vmem:[#allocation52_spill] sm:$0xff] %v4507_v3  ;;  %v5943_v59 = vmax.f32 %v4507_v3, 0.0  ;;  %3709 = vtanh.f32 %v1402_v42 }
 0x1ec   : > { %3463 = vmatmul.msk.f32.gmra.mxu1 %vm1144_vm2, %v5943_v59  ;;  %v1764_v30 = vpop.f32.mrf.mxu2 }
 0x1ed   : > { %2360 = vperm.xlu0 %3624, %v1764_v30  }
 0x1ef   : > { %v1039_v12 = vpop.f32.mrf.mxu0 }
 0x1f0   : > { %v3710_v50 = vpop.eup %3709  ;;  %v4515_v54 = vadd.f32 %v4092_v22, %v1039_v12  ;;  %2356 = vperm.xlu2 %3622, %v4503_v34  }
 0x1f1   : > { %v1405_v39 = vpop.f32.mrf.mxu1  ;;  %3503 = vmatmul.msk.f32.gmra.mxu2 %vm1144_vm2, %v3710_v50 }
 0x1f2   : > { %6078 = vst [vmem:[#allocation53_spill] sm:$0xff] %v4515_v54  ;;  %v5945_v46 = vmax.f32 %v4515_v54, 0.0  ;;  %3711 = vtanh.f32 %v1405_v39 }
 0x1f4   : > { %3464 = vmatmul.msk.f32.gmra.mxu1 %vm1144_vm2, %v5945_v46  ;;  %v1767_v63 = vpop.f32.mrf.mxu2 }
 0x1f5   : > { %1953 = vperm.xlu1 %3621, %v1767_v63  }
 0x1f7   : > { %v1042_v42 = vpop.f32.mrf.mxu0 }
 0x1f8   : > { %v3712_v59 = vpop.eup %3711  ;;  %v4524_v58 = vadd.f32 %v4092_v22, %v1042_v42  ;;  %3623 = vset.pattern.permute.xlu2 %v5964_v4 }
 0x1f9   : > { %1948 = vperm.xlu2 %3623, %v1764_v30   ;;  %v1408_v12 = vpop.f32.mrf.mxu1  ;;  %3504 = vmatmul.msk.f32.gmra.mxu2 %vm1144_vm2, %v3712_v59 }
 0x1fa   : > { %6079 = vst [vmem:[#allocation54_spill] sm:$0xff] %v4524_v58  ;;  %v5947_v50 = vmax.f32 %v4524_v58, 0.0  ;;  %3713 = vtanh.f32 %v1408_v12 }
 0x1fc   : > { %3465 = vmatmul.msk.f32.gmra.mxu1 %vm1144_vm2, %v5947_v50  ;;  %v4532_v39 = vpop.f32.mrf.mxu2 }
 0x1fd   : > { %3625 = vset.pattern.permute.xlu1 %v5958_v10 }
 0x1fe   : > { %2364 = vperm.xlu1 %3625, %v1767_v63  }
 0x1ff   : > { %v1045_v42 = vpop.f32.mrf.mxu0 }
 0x200   : > { %v3714_v46 = vpop.eup %3713  ;;  %v4536_v62 = vadd.f32 %v4092_v22, %v1045_v42 }
 0x201   : > { %v1411_v30 = vpop.f32.mrf.mxu1  ;;  %3505 = vmatmul.msk.f32.gmra.mxu2 %vm1144_vm2, %v3714_v46 }
 0x202   : > { %6080 = vst [vmem:[#allocation55_spill] sm:$0xff] %v4536_v62  ;;  %v5949_v59 = vmax.f32 %v4536_v62, 0.0  ;;  %3715 = vtanh.f32 %v1411_v30 }
 0x204   : > { %3466 = vmatmul.msk.f32.gmra.mxu1 %vm1144_vm2, %v5949_v59  ;;  %v1773_v12 = vpop.f32.mrf.mxu2 }
 0x205   : > { %1963 = vperm.xlu2 %3623, %v1773_v12  }
 0x206   : > { %2368 = vperm.xlu1 %3625, %v4532_v39  }
 0x207   : > { %v1048_v63 = vpop.f32.mrf.mxu0 }
 0x208   : > { %v3716_v50 = vpop.eup %3715  ;;  %v4545_v2 = vadd.f32 %v4092_v22, %v1048_v63 }
 0x209   : > { %v1414_v42 = vpop.f32.mrf.mxu1  ;;  %3506 = vmatmul.msk.f32.gmra.mxu2 %vm1144_vm2, %v3716_v50 }
 0x20a   : > { %6081 = vst [vmem:[#allocation56_spill] sm:$0xff] %v4545_v2  ;;  %v5951_v46 = vmax.f32 %v4545_v2, 0.0  ;;  %3717 = vtanh.f32 %v1414_v42 }
 0x20c   : > { %3467 = vmatmul.msk.f32.gmra.mxu1 %vm1144_vm2, %v5951_v46  ;;  %v1776_v30 = vpop.f32.mrf.mxu2 }
 0x20d   : > { %3626 = vset.pattern.permute.xlu2 %v5958_v10  ;;  %2376 = vperm.xlu0 %3624, %v1776_v30  }
 0x20e   : > { %2372 = vperm.xlu2 %3626, %v1773_v12   ;;  %3628 = vset.pattern.permute.xlu1 %v5964_v4 }
 0x20f   : > { %v1051_v59 = vpop.f32.mrf.mxu0 }
 0x210   : > { %v3718_v63 = vpop.eup %3717  ;;  %v4555_v6 = vadd.f32 %v4092_v22, %v1051_v59 }
 0x211   : > { %v1417_v50 = vpop.f32.mrf.mxu1  ;;  %3507 = vmatmul.msk.f32.gmra.mxu2 %vm1144_vm2, %v3718_v63 }
 0x212   : > { %6082 = vst [vmem:[#allocation57_spill] sm:$0xff] %v4555_v6  ;;  %v5954_v42 = vmax.f32 %v4555_v6, 0.0  ;;  %3719 = vtanh.f32 %v1417_v50 }
 0x214   : > { %3468 = vmatmul.msk.f32.gmra.mxu1 %vm1144_vm2, %v5954_v42  ;;  %v1779_v46 = vpop.f32.mrf.mxu2 }
 0x215   : > { %1973 = vperm.xlu1 %3628, %v1779_v46  }
 0x216   : > { %3627 = vset.pattern.permute.xlu2 %v5964_v4 }
 0x217   : > { %v1054_v12 = vpop.f32.mrf.mxu0  ;;  %1968 = vperm.xlu2 %3627, %v1776_v30  }
 0x218   : > { %v3720_v11 = vpop.eup %3719  ;;  %v4564_v59 = vadd.f32 %v4092_v22, %v1054_v12 }
 0x219   : > { %v1420_v18 = vpop.f32.mrf.mxu1  ;;  %3508 = vmatmul.msk.f32.gmra.mxu2 %vm1144_vm2, %v3720_v11 }
 0x21a   : > { %6083 = vst [vmem:[#allocation58_spill] sm:$0xff] %v4564_v59  ;;  %v5956_v63 = vmax.f32 %v4564_v59, 0.0  ;;  %3721 = vtanh.f32 %v1420_v18 }
 0x21c   : > { %3469 = vmatmul.msk.f32.gmra.mxu1 %vm1144_vm2, %v5956_v63  ;;  %v1782_v50 = vpop.f32.mrf.mxu2 }
 0x21d   : > { %3629 = vset.pattern.permute.xlu1 %v5958_v10 }
 0x21e   : > { %2380 = vperm.xlu1 %3629, %v1779_v46  }
 0x21f   : > { %v1057_v42 = vpop.f32.mrf.mxu0  ;;  %v4572_v30 = vpop.permute.xlu2 %1923  ;;  %3631 = vset.pattern.permute.xlu2 %v5958_v10 }
 0x220   : > { %v3722_v12 = vpop.eup %3721  ;;  %v4576_v23 = vadd.f32 %v4092_v22, %v1057_v42  ;;  %2384 = vperm.xlu2 %3631, %v1782_v50  }
 0x221   : > { %v1423_v11 = vpop.f32.mrf.mxu1  ;;  %3509 = vmatmul.msk.f32.gmra.mxu2 %vm1144_vm2, %v3722_v12  ;;  %v4591_v12 = vld [vmem:[%s6086_s2 + $0x10] sm:$0xff] }
 0x222   : > { %6084 = vst [vmem:[#allocation59_spill] sm:$0xff] %v4576_v23  ;;  %v5960_v18 = vmax.f32 %v4576_v23, 0.0  ;;  %3723 = vtanh.f32 %v1423_v11  ;;  %v4670_v23 = vld [vmem:[%s6086_s2 + $0x20] sm:$0xff] }
 0x224   : > { %3470 = vmatmul.msk.f32.gmra.mxu1 %vm1144_vm2, %v5960_v18  ;;  %v4583_v46 = vpop.f32.mrf.mxu2 }
 0x226   : > { %3630 = vset.pattern.permute.xlu1 %v5964_v4 }
 0x227   : > { %v1060_v63 = vpop.f32.mrf.mxu0  ;;  %v4586_v31 = vpop.permute.xlu1 %2332  ;;  %1978 = vperm.xlu1 %3630, %v1782_v50  }
 0x228   : > { %6085 = vst [vmem:[#allocation60_spill] sm:$0xff] %v4586_v31  ;;  %v3724_v42 = vpop.eup %3723  ;;  %v4594_v11 = vadd.f32 %v4092_v22, %v1060_v63  ;;  %v2341_v10 = vpop.permute.xlu2 %2340  ;;  %3634 = vset.pattern.permute.xlu2 %v5964_v4 }
 0x229   : > { %v4598_v18 = vmul.f32 %v2341_v10, %v4591_v12  ;;  %v1426_v19 = vpop.f32.mrf.mxu1  ;;  %3510 = vmatmul.msk.f32.gmra.mxu2 %vm1144_vm2, %v3724_v42 }
 0x22a   : > { %v5967_v50 = vmax.f32 %v4594_v11, 0.0  ;;  %3725 = vtanh.f32 %v1426_v19 }
 0x22b   : > { %6087 = vst [vmem:[#allocation61_spill] sm:$0xff] %v4598_v18 }
 0x22c   : > { %3471 = vmatmul.msk.f32.gmra.mxu1 %vm1144_vm2, %v5967_v50  ;;  %v4605_v44 = vpop.f32.mrf.mxu2 }
 0x22d   : > { %2392 = vperm.xlu0 %3624, %v4605_v44  }
 0x22f   : > { %v1063_v63 = vpop.f32.mrf.mxu0  ;;  %3632 = vset.pattern.permute.xlu1 %v6088_v15 }
 0x230   : > { %v3726_v4 = vpop.eup %3725  ;;  %v4610_v10 = vadd.f32 %v4092_v22, %v1063_v63  ;;  %v4612_v20 = vpop.permute.xlu1 %1918  ;;  %2388 = vperm.xlu1 %3632, %v4583_v46  }
 0x231   : > { %v4614_v42 = vpop.permute.xlu2 %2344  ;;  %v1429_v19 = vpop.f32.mrf.mxu1  ;;  %3511 = vmatmul.msk.f32.gmra.mxu2 %vm1144_vm2, %v3726_v4  ;;  %v4631_v4 = vld [vmem:[%s6086_s2 + $0x8] sm:$0xff] }
 0x232   : > { %6089 = vst [vmem:[#allocation62_spill] sm:$0xff] %v4614_v42  ;;  %v5973_v50 = vmax.f32 %v4610_v10, 0.0  ;;  %3727 = vtanh.f32 %v1429_v19 }
 0x234   : > { %3472 = vmatmul.msk.f32.gmra.mxu1 %vm1144_vm2, %v5973_v50  ;;  %v4622_v56 = vpop.f32.mrf.mxu2 }
 0x237   : > { %v1066_v63 = vpop.f32.mrf.mxu0 }
 0x238   : > { %v3728_v26 = vpop.eup %3727  ;;  %v4625_v38 = vadd.f32 %v4092_v22, %v1066_v63  ;;  %3633 = vset.pattern.permute.xlu1 %v6090_v43 }
 0x239   : > { %v2337_v3 = vpop.permute.xlu1 %2336  ;;  %v4633_v19 = vpop.permute.xlu2 %1933  ;;  %1993 = vperm.xlu1 %3633, %v4622_v56   ;;  %3512 = vmatmul.msk.f32.gmra.mxu2 %vm1144_vm2, %v3728_v26  ;;  %v3791_v26 = vld [vmem:[%s6036_s5] ss:$0 sm:$0xff] }
 0x23a   : > { %v5978_v50 = vmax.f32 %v4625_v38, 0.0  ;;  %v4639_v54 = vmul.f32 %v2337_v3, %v4631_v4  ;;  %v1432_v22 = vpop.f32.mrf.mxu1  ;;  %v4655_v3 = vld [vmem:[%s6086_s2 + $0x28] sm:$0xff]  ;;  %v6098_v25 = vmax.f32 %v4625_v38, 0.0 }
 0x23b   : > { %3729 = vtanh.f32 %v1432_v22 }
 0x23c   : > { %6091 = vst [vmem:[#allocation63_spill] sm:$0xff] %v4639_v54  ;;  %3473 = vmatmul.msk.f32.gmra.mxu1 %vm1144_vm2, %v5978_v50  ;;  %v4644_v63 = vpop.f32.mrf.mxu2 }
 0x23d   : > { %1998 = vperm.xlu2 %3634, %v4644_v63  }
 0x23f   : > { %v1069_v58 = vpop.f32.mrf.mxu0 }
 0x240   : > { %v4650_v62 = vadd.f32 %v3791_v26, %v1069_v58 }
 0x241   : > { %v3730_v22 = vpop.eup %3729 }
 0x242   : > { %v5986_v2 = vmax.f32 %v4650_v62, 0.0  ;;  %v1435_v50 = vpop.f32.mrf.mxu1  ;;  %3513 = vmatmul.msk.f32.gmra.mxu2 %vm1144_vm2, %v3730_v22  ;;  %v2353_v6 = vpop.permute.xlu2 %2352 }
 0x243   : > { %3731 = vtanh.f32 %v1435_v50  ;;  %v4660_v59 = vmul.f32 %v2353_v6, %v4655_v3 }
 0x244   : > { %3474 = vmatmul.msk.f32.gmra.mxu1 %vm1144_vm2, %v5986_v2  ;;  %v4665_v58 = vpop.f32.mrf.mxu2 }
 0x245   : > { %6092 = vst [vmem:[#allocation64_spill] sm:$0xff] %v4660_v59 }
 0x247   : > { %v1072_v36 = vpop.f32.mrf.mxu0  ;;  %v2349_v48 = vpop.permute.xlu1 %2348 }
 0x248   : > { %v1073_v60 = vadd.f32 %v3791_v26, %v1072_v36  ;;  %v4673_v22 = vmul.f32 %v2349_v48, %v4670_v23 }
 0x249   : > { %v3732_v50 = vpop.eup %3731 }
 0x24a   : > { %6093 = vst [vmem:[#allocation65_spill] sm:$0xff] %v4673_v22  ;;  %v1136_v6 = vmax.f32 %v1073_v60, 0.0  ;;  %v1438_v8 = vpop.f32.mrf.mxu1  ;;  %3514 = vmatmul.msk.f32.gmra.mxu2 %vm1144_vm2, %v3732_v50  ;;  %v4680_v16 = vpop.permute.xlu2 %2356 }
 0x24b   : > { %3733 = vtanh.f32 %v1438_v8  ;;  %6094 = vst [vmem:[#allocation66_spill] sm:$0xff] %v4680_v16 }
 0x24c   : > { %3475 = vmatmul.msk.f32.gmra.mxu1 %vm1144_vm2, %v1136_v6  ;;  %v4677_v2 = vpop.f32.mrf.mxu2 }
 0x24d   : > { %2008 = vperm.xlu1 %3633, %v4677_v2  }
 0x24f   : > { %v1075_v35 = vpop.f32.mrf.mxu0 }
 0x250   : > { %v1076_v55 = vadd.f32 %v3791_v26, %v1075_v35 }
 0x251   : > { %v3734_v36 = vpop.eup %3733 }
 0x252   : > { %v1137_v7 = vmax.f32 %v1076_v55, 0.0  ;;  %v1441_v48 = vpop.f32.mrf.mxu1  ;;  %3515 = vmatmul.msk.f32.gmra.mxu2 %vm1144_vm2, %v3734_v36  ;;  %v4693_v55 = vpop.permute.xlu1 %1938  ;;  %v4698_v36 = vld [vmem:[%s6086_s2 + $0x38] sm:$0xff] }
 0x253   : > { %3735 = vtanh.f32 %v1441_v48  ;;  %v4687_v50 = vpop.permute.xlu2 %1948 }
 0x254   : > { %3476 = vmatmul.msk.f32.gmra.mxu1 %vm1144_vm2, %v1137_v7  ;;  %v4684_v60 = vpop.f32.mrf.mxu2 }
 0x255   : > { %2013 = vperm.xlu2 %3634, %v4684_v60  }
 0x257   : > { %v1078_v8 = vpop.f32.mrf.mxu0 }
 0x258   : > { %v1079_v24 = vadd.f32 %v3791_v26, %v1078_v8 }
 0x259   : > { %v3736_v51 = vpop.eup %3735 }
 0x25a   : > { %v1138_v14 = vmax.f32 %v1079_v24, 0.0  ;;  %v1444_v47 = vpop.f32.mrf.mxu1  ;;  %3516 = vmatmul.msk.f32.gmra.mxu2 %vm1144_vm2, %v3736_v51 }
 0x25b   : > { %3737 = vtanh.f32 %v1444_v47 }
 0x25c   : > { %3477 = vmatmul.msk.f32.gmra.mxu1 %vm1144_vm2, %v1138_v14  ;;  %v4691_v35 = vpop.f32.mrf.mxu2 }
 0x25f   : > { %v1081_v48 = vpop.f32.mrf.mxu0  ;;  %v2361_v40 = vpop.permute.xlu0 %2360 }
 0x260   : > { %v1082_v8 = vadd.f32 %v3791_v26, %v1081_v48  ;;  %v4701_v24 = vmul.f32 %v2361_v40, %v4698_v36  ;;  %v4703_v0 = vpop.permute.xlu2 %1963  ;;  %v4715_v40 = vld [vmem:[%s6086_s2 + $0x50] sm:$0xff] }
 0x261   : > { %v3738_v51 = vpop.eup %3737 }
 0x262   : > { %6095 = vst [vmem:[#allocation67_spill] sm:$0xff] %v4701_v24  ;;  %v1139_v47 = vmax.f32 %v1082_v8, 0.0  ;;  %v1447_v52 = vpop.f32.mrf.mxu1  ;;  %3517 = vmatmul.msk.f32.gmra.mxu2 %vm1144_vm2, %v3738_v51 }
 0x263   : > { %3739 = vtanh.f32 %v1447_v52 }
 0x264   : > { %3478 = vmatmul.msk.f32.gmra.mxu1 %vm1144_vm2, %v1139_v47  ;;  %v4707_v13 = vpop.f32.mrf.mxu2  ;;  %3017 = vmatpush.msrb.mxu0 %v1139_v47 }
 0x265   : > { %2023 = vperm.xlu1 %3633, %v4707_v13  }
 0x266   : > { %3018 = vmatpush.msrb.mxu0 %v1138_v14  ;;  %v6097_v14 = vmax.f32 %v4650_v62, 0.0 }
 0x267   : > { %v4710_v26 = vpop.permute.xlu1 %1953 }
 0x268   : > { %v2373_v48 = vpop.permute.xlu2 %2372  ;;  %3019 = vmatpush.msrb.mxu0 %v1137_v7  ;;  %v4731_v7 = vld [vmem:[%s6086_s2 + $0x40] sm:$0xff] }
 0x269   : > { %v3740_v8 = vpop.eup %3739  ;;  %v4718_v52 = vmul.f32 %v2373_v48, %v4715_v40 }
 0x26a   : > { %v1450_v51 = vpop.f32.mrf.mxu1  ;;  %3518 = vmatmul.msk.f32.gmra.mxu2 %vm1144_vm2, %v3740_v8  ;;  %3020 = vmatpush.msrb.mxu0 %v1136_v6  ;;  %v6099_v8 = vmax.f32 %v4610_v10, 0.0  ;;  %v4749_v10 = vld [vmem:[%s6086_s2 + $0x68] sm:$0xff] }
 0x26b   : > { %6096 = vst [vmem:[#allocation68_spill] sm:$0xff] %v4718_v52  ;;  %3741 = vtanh.f32 %v1450_v51 }
 0x26c   : > { %v4721_v47 = vpop.f32.mrf.mxu2  ;;  %3021 = vmatpush.msrb.mxu0 %v6097_v14 }
 0x26d   : > { %2028 = vperm.xlu2 %3634, %v4721_v47  }
 0x26e   : > { %3022 = vmatpush.msrb.mxu0 %v6098_v25  ;;  %v6101_v25 = vmax.f32 %v4594_v11, 0.0 }
 0x270   : > { %v2365_v48 = vpop.permute.xlu1 %2364  ;;  %3023 = vmatpush.msrb.mxu0 %v6099_v8 }
 0x271   : > { %v3742_v6 = vpop.eup %3741  ;;  %v4736_v51 = vmul.f32 %v2365_v48, %v4731_v7  ;;  %v4738_v62 = vpop.permute.xlu2 %1968 }
 0x272   : > { %v1453_v14 = vpop.f32.mrf.mxu1  ;;  %3519 = vmatmul.msk.f32.gmra.mxu2 %vm1144_vm2, %v3742_v6  ;;  %3024 = vmatpush.msrb.mxu0 %v6101_v25 }
 0x273   : > { %6100 = vst [vmem:[#allocation69_spill] sm:$0xff] %v4736_v51  ;;  %3743 = vtanh.f32 %v1453_v14  ;;  %v4758_v14 = vld [vmem:[%s6086_s2 + $0x58] sm:$0xff] }
 0x274   : > { %v4743_v38 = vpop.f32.mrf.mxu2 }
 0x275   : > { %2428 = vperm.xlu0 %3624, %v4743_v38  }
 0x278   : > { %v4760_v25 = vpop.permute.xlu1 %2368 }
 0x279   : > { %v3744_v48 = vpop.eup %3743  ;;  %6103 = vst [vmem:[#allocation71_spill] sm:$0xff] %v4760_v25 }
 0x27a   : > { %v1456_v8 = vpop.f32.mrf.mxu1  ;;  %3520 = vmatmul.msk.f32.gmra.mxu2 %vm1144_vm2, %v3744_v48  ;;  %v2385_v29 = vpop.permute.xlu2 %2384 }
 0x27b   : > { %3745 = vtanh.f32 %v1456_v8  ;;  %v4753_v6 = vmul.f32 %v2385_v29, %v4749_v10 }
 0x27c   : > { %v1818_v11 = vpop.f32.mrf.mxu2 }
 0x27d   : > { %6102 = vst [vmem:[#allocation70_spill] sm:$0xff] %v4753_v6  ;;  %2038 = vperm.xlu1 %3633, %v1818_v11  }
 0x27f   : > { %v2377_v33 = vpop.permute.xlu0 %2376 }
 0x280   : > { %v4763_v37 = vmul.f32 %v2377_v33, %v4758_v14  ;;  %v4778_v33 = vld [vmem:[%s6086_s2 + $0x60] sm:$0xff] }
 0x281   : > { %v3746_v41 = vpop.eup %3745 }
 0x282   : > { %6104 = vst [vmem:[#allocation72_spill] sm:$0xff] %v4763_v37  ;;  %v1459_v48 = vpop.f32.mrf.mxu1  ;;  %3521 = vmatmul.msk.f32.gmra.mxu2 %vm1144_vm2, %v3746_v41 }
 0x283   : > { %3747 = vtanh.f32 %v1459_v48 }
 0x284   : > { %v1821_v29 = vpop.f32.mrf.mxu2 }
 0x285   : > { %3635 = vset.pattern.permute.xlu1 %v6088_v15  ;;  %2043 = vperm.xlu2 %3634, %v1821_v29  }
 0x286   : > { %2432 = vperm.xlu1 %3635, %v1818_v11  }
 0x287   : > { %v4767_v8 = vpop.permute.xlu1 %1973 }
 0x289   : > { %v3748_v45 = vpop.eup %3747 }
 0x28a   : > { %v1462_v49 = vpop.f32.mrf.mxu1  ;;  %3522 = vmatmul.msk.f32.gmra.mxu2 %vm1144_vm2, %v3748_v45 }
 0x28b   : > { %3749 = vtanh.f32 %v1462_v49 }
 0x28c   : > { %v4770_v53 = vpop.f32.mrf.mxu2 }
 0x28d   : > { %3636 = vset.pattern.permute.xlu2 %v6088_v15  ;;  %2440 = vperm.xlu0 %3624, %v4770_v53  }
 0x28e   : > { %2436 = vperm.xlu2 %3636, %v1821_v29   ;;  %3637 = vset.pattern.permute.xlu1 %v6090_v43 }
 0x290   : > { %v2381_v41 = vpop.permute.xlu1 %2380 }
 0x291   : > { %v3750_v11 = vpop.eup %3749  ;;  %v4781_v48 = vmul.f32 %v2381_v41, %v4778_v33 }
 0x292   : > { %v1465_v45 = vpop.f32.mrf.mxu1  ;;  %3523 = vmatmul.msk.f32.gmra.mxu2 %vm1144_vm2, %v3750_v11 }
 0x293   : > { %6105 = vst [vmem:[#allocation73_spill] sm:$0xff] %v4781_v48  ;;  %3751 = vtanh.f32 %v1465_v45 }
 0x294   : > { %v1827_v49 = vpop.f32.mrf.mxu2 }
 0x295   : > { %2053 = vperm.xlu1 %3637, %v1827_v49  }
 0x296   : > { %2444 = vperm.xlu2 %3636, %v1827_v49  }
 0x299   : > { %v3752_v29 = vpop.eup %3751 }
 0x29a   : > { %v1468_v57 = vpop.f32.mrf.mxu1  ;;  %3524 = vmatmul.msk.f32.gmra.mxu2 %vm1144_vm2, %v3752_v29 }
 0x29b   : > { %3753 = vtanh.f32 %v1468_v57 }
 0x29c   : > { %v1830_v61 = vpop.f32.mrf.mxu2 }
 0x29e   : > { %3638 = vset.pattern.permute.xlu2 %v6090_v43 }
 0x29f   : > { %2058 = vperm.xlu2 %3638, %v1830_v61  }
 0x2a1   : > { %v3754_v1 = vpop.eup %3753 }
 0x2a2   : > { %v1471_v5 = vpop.f32.mrf.mxu1  ;;  %3525 = vmatmul.msk.f32.gmra.mxu2 %vm1144_vm2, %v3754_v1 }
 0x2a3   : > { %3755 = vtanh.f32 %v1471_v5 }
 0x2a4   : > { %v4787_v41 = vpop.f32.mrf.mxu2 }
 0x2a5   : > { %2452 = vperm.xlu0 %3624, %v4787_v41  }
 0x2a7   : > { %3639 = vset.pattern.permute.xlu2 %v6088_v15 }
 0x2a8   : > { %2448 = vperm.xlu2 %3639, %v1830_v61  }
 0x2a9   : > { %v3756_v11 = vpop.eup %3755 }
 0x2aa   : > { %v1474_v45 = vpop.f32.mrf.mxu1  ;;  %3526 = vmatmul.msk.f32.gmra.mxu2 %vm1144_vm2, %v3756_v11 }
 0x2ab   : > { %3757 = vtanh.f32 %v1474_v45 }
 0x2ac   : > { %v1836_v57 = vpop.f32.mrf.mxu2 }
 0x2ad   : > { %2068 = vperm.xlu1 %3637, %v1836_v57  }
 0x2b0   : > { %3641 = vset.pattern.permute.xlu2 %v6090_v43 }
 0x2b1   : > { %v3758_v49 = vpop.eup %3757 }
 0x2b2   : > { %v1477_v29 = vpop.f32.mrf.mxu1  ;;  %3527 = vmatmul.msk.f32.gmra.mxu2 %vm1144_vm2, %v3758_v49 }
 0x2b3   : > { %3759 = vtanh.f32 %v1477_v29  ;;  %v4804_v29 = vpop.permute.xlu1 %1978 }
 0x2b4   : > { %v4794_v1 = vpop.f32.mrf.mxu2 }
 0x2b5   : > { %6106 = vst [vmem:[#allocation74_spill] sm:$0xff] %v4794_v1  ;;  %3640 = vset.pattern.permute.xlu1 %v6088_v15  ;;  %2073 = vperm.xlu2 %3641, %v4794_v1  }
 0x2b6   : > { %2456 = vperm.xlu1 %3640, %v1836_v57   ;;  %v4808_v57 = vpop.permute.xlu2 %1998 }
 0x2b7   : > { %6107 = vst [vmem:[#allocation75_spill] sm:$0xff] %v4808_v57 }
 0x2b9   : > { %v3760_v61 = vpop.eup %3759 }
 0x2ba   : > { %v1480_v5 = vpop.f32.mrf.mxu1  ;;  %3528 = vmatmul.msk.f32.gmra.mxu2 %vm1144_vm2, %v3760_v61 }
 0x2bb   : > { %3761 = vtanh.f32 %v1480_v5  ;;  %v4811_v5 = vpop.permute.xlu1 %2388 }
 0x2bc   : > { %v4799_v11 = vpop.f32.mrf.mxu2  ;;  %6108 = vst [vmem:[#allocation76_spill] sm:$0xff] %v4811_v5 }
 0x2be   : > { %3642 = vset.pattern.permute.xlu1 %v6090_v43  ;;  %v4816_v28 = vpop.permute.xlu2 %2013 }
 0x2bf   : > { %2078 = vperm.xlu1 %3642, %v4799_v11   ;;  %6109 = vst [vmem:[#allocation77_spill] sm:$0xff] %v4816_v28 }
 0x2c1   : > { %v3762_v45 = vpop.eup %3761 }
 0x2c2   : > { %v1483_v49 = vpop.f32.mrf.mxu1  ;;  %3529 = vmatmul.msk.f32.gmra.mxu2 %vm1144_vm2, %v3762_v45 }
 0x2c3   : > { %3763 = vtanh.f32 %v1483_v49  ;;  %v4821_v31 = vpop.permute.xlu1 %1993 }
 0x2c4   : > { %6110 = vst [vmem:[#allocation78_spill] sm:$0xff] %v4821_v31 }
 0x2c5   : > { %v4806_v9 = vpop.f32.mrf.mxu2 }
 0x2c7   : > { %v4823_v18 = vpop.permute.xlu2 %2028 }
 0x2c8   : > { %6111 = vst [vmem:[#allocation79_spill] sm:$0xff] %v4823_v18 }
 0x2c9   : > { %v3764_v17 = vpop.eup %3763 }
 0x2ca   : > { %v1486_v61 = vpop.f32.mrf.mxu1  ;;  %3530 = vmatmul.msk.f32.gmra.mxu2 %vm1144_vm2, %v3764_v17 }
 0x2cb   : > { %3765 = vtanh.f32 %v1486_v61  ;;  %v4829_v42 = vpop.permute.xlu1 %2008 }
 0x2cc   : > { %6112 = vst [vmem:[#allocation80_spill] sm:$0xff] %v4829_v42 }
 0x2cd   : > { %v4813_v21 = vpop.f32.mrf.mxu2 }
 0x2ce   : > { %2088 = vperm.xlu2 %3641, %v4813_v21  }
 0x2d1   : > { %v3766_v45 = vpop.eup %3765 }
 0x2d2   : > { %v1489_v54 = vpop.f32.mrf.mxu1  ;;  %3531 = vmatmul.msk.f32.gmra.mxu2 %vm1144_vm2, %v3766_v45 }
 0x2d3   : > { %3767 = vtanh.f32 %v1489_v54 }
 0x2d5   : > { %v4819_v49 = vpop.f32.mrf.mxu2 }
 0x2d7   : > { %v4837_v16 = vpop.permute.xlu1 %2023 }
 0x2d8   : > { %6113 = vst [vmem:[#allocation81_spill] sm:$0xff] %v4837_v16 }
 0x2d9   : > { %v3768_v17 = vpop.eup %3767 }
 0x2da   : > { %v1492_v61 = vpop.f32.mrf.mxu1  ;;  %3532 = vmatmul.msk.f32.gmra.mxu2 %vm1144_vm2, %v3768_v17  ;;  %v4842_v17 = vld [vmem:[%s6086_s2 + $0xd0] sm:$0xff] }
 0x2db   : > { %3769 = vtanh.f32 %v1492_v61 }
 0x2dd   : > { %v4826_v22 = vpop.f32.mrf.mxu2 }
 0x2de   : > { %2098 = vperm.xlu1 %3642, %v4826_v22  }
 0x2df   : > { %v4831_v59 = vpop.permute.xlu2 %2043 }
 0x2e1   : > { %v3770_v54 = vpop.eup %3769 }
 0x2e2   : > { %v1495_v45 = vpop.f32.mrf.mxu1  ;;  %3533 = vmatmul.msk.f32.gmra.mxu2 %vm1144_vm2, %v3770_v54 }
 0x2e3   : > { %3771 = vtanh.f32 %v1495_v45  ;;  %v4853_v45 = vld [vmem:[%s6086_s2 + $0xe0] sm:$0xff] }
 0x2e5   : > { %v4834_v24 = vpop.f32.mrf.mxu2 }
 0x2e6   : > { %2103 = vperm.xlu2 %3641, %v4834_v24  }
 0x2e8   : > { %v2437_v61 = vpop.permute.xlu2 %2436 }
 0x2e9   : > { %v3772_v51 = vpop.eup %3771  ;;  %v4845_v52 = vmul.f32 %v2437_v61, %v4842_v17 }
 0x2ea   : > { %3534 = vmatmul.msk.f32.gmra.mxu2 %vm1144_vm2, %v3772_v51  ;;  %v4866_v51 = vld [vmem:[%s6086_s2 + $0xc8] sm:$0xff] }
 0x2eb   : > { %6114 = vst [vmem:[#allocation82_spill] sm:$0xff] %v4845_v52 }
 0x2ec   : > { %6117 = vst [vmem:[#allocation85_spill] sm:$0xff] %v4866_v51 }
 0x2ed   : > { %v4848_v54 = vpop.f32.mrf.mxu2 }
 0x2ef   : > { %v4855_v25 = vpop.permute.xlu1 %2038 }
 0x2f0   : > { %6115 = vst [vmem:[#allocation83_spill] sm:$0xff] %v4855_v25  ;;  %v2445_v37 = vpop.permute.xlu2 %2444 }
 0x2f1   : > { %v4858_v48 = vmul.f32 %v2445_v37, %v4853_v45  ;;  %v4876_v37 = vld [vmem:[%s6086_s2 + $0xe8] sm:$0xff] }
 0x2f3   : > { %6116 = vst [vmem:[#allocation84_spill] sm:$0xff] %v4858_v48 }
 0x2f5   : > { %v4860_v6 = vpop.f32.mrf.mxu2 }
 0x2f6   : > { %2113 = vperm.xlu1 %3642, %v4860_v6  }
 0x2f8   : > { %v2433_v61 = vpop.permute.xlu1 %2432 }
 0x2f9   : > { %v4869_v52 = vmul.f32 %v2433_v61, %v4866_v51  ;;  %v4871_v5 = vpop.permute.xlu2 %2058 }
 0x2fb   : > { %6118 = vst [vmem:[#allocation86_spill] sm:$0xff] %v4869_v52 }
 0x2fd   : > { %v1866_v31 = vpop.f32.mrf.mxu2 }
 0x2fe   : > { %2118 = vperm.xlu2 %3641, %v1866_v31  }
 0x302   : > { %v2449_v48 = vpop.permute.xlu2 %2448 }
 0x303   : > { %v4879_v57 = vmul.f32 %v2449_v48, %v4876_v37 }
 0x305   : > { %6119 = vst [vmem:[#allocation87_spill] sm:$0xff] %v4879_v57  ;;  %v4881_v42 = vpop.f32.mrf.mxu2  ;;  %v4894_v57 = vld [vmem:[%s6086_s2 + $0xf8] sm:$0xff] }
 0x307   : > { %v4884_v61 = vpop.permute.xlu1 %2053 }
 0x30d   : > { %v1872_v28 = vpop.f32.mrf.mxu2 }
 0x30e   : > { %2128 = vperm.xlu1 %3642, %v1872_v28  }
 0x315   : > { %v1875_v16 = vpop.f32.mrf.mxu2 }
 0x316   : > { %3643 = vset.pattern.permute.xlu1 %v6088_v15  ;;  %2133 = vperm.xlu2 %3641, %v1875_v16  }
 0x317   : > { %2508 = vperm.xlu1 %3643, %v1875_v16  }
 0x31d   : > { %v1878_v52 = vpop.f32.mrf.mxu2 }
 0x31e   : > { %3644 = vset.pattern.permute.xlu2 %v6088_v15 }
 0x31f   : > { %2512 = vperm.xlu2 %3644, %v1878_v52   ;;  %v4887_v18 = vpop.permute.xlu1 %2068  ;;  %3645 = vset.pattern.permute.xlu1 %v6090_v43 }
 0x325   : > { %v1881_v48 = vpop.f32.mrf.mxu2 }
 0x326   : > { %2516 = vperm.xlu0 %3624, %v1881_v48   ;;  %2143 = vperm.xlu1 %3645, %v1881_v48  }
 0x327   : > { %3646 = vset.pattern.permute.xlu2 %v6090_v43 }
 0x328   : > { %v2457_v1 = vpop.permute.xlu1 %2456 }
 0x329   : > { %v4897_v16 = vmul.f32 %v2457_v1, %v4894_v57 }
 0x32d   : > { %v1884_v25 = vpop.f32.mrf.mxu2 }
 0x32e   : > { %2504 = vperm.xlu0 %3624, %v1872_v28   ;;  %3648 = vset.pattern.permute.xlu1 %v6088_v15 }
 0x32f   : > { %2148 = vperm.xlu2 %3646, %v1884_v25   ;;  %2420 = vperm.xlu1 %3648, %v4707_v13  }
 0x335   : > { %v4901_v51 = vpop.f32.mrf.mxu2 }
 0x336   : > { %2416 = vperm.xlu0 %3624, %v4691_v35  }
 0x337   : > { %3647 = vset.pattern.permute.xlu2 %v6088_v15  ;;  %2520 = vperm.xlu1 %3648, %v1884_v25  }
 0x338   : > { %2424 = vperm.xlu2 %3647, %v4721_v47  }
 0x33d   : > { %v4906_v48 = vpop.f32.mrf.mxu2 }
 0x33e   : > { %3649 = vset.pattern.permute.xlu0 %v6090_v43 }
 0x33f   : > { %1988 = vperm.xlu0 %3649, %v4605_v44   ;;  %3650 = vset.pattern.permute.xlu1 %v6090_v43 }
 0x340   : > { %2500 = vperm.xlu2 %3647, %v4881_v42   ;;  %2158 = vperm.xlu1 %3650, %v4906_v48  }
 0x345   : > { %v4913_v28 = vpop.f32.mrf.mxu2 }
 0x347   : > { %1983 = vperm.xlu0 %3649, %v4583_v46  }
 0x348   : > { %3651 = vset.pattern.permute.xlu2 %v6090_v43  ;;  %2163 = vperm.xlu1 %3650, %v4913_v28   ;;  %v4927_v43 = vpop.permute.xlu1 %2078 }
 0x34d   : > { %v1896_v13 = vpop.f32.mrf.mxu2 }
 0x34e   : > { %2168 = vperm.xlu2 %3651, %v1896_v13  }
 0x34f   : > { %1958 = vperm.xlu0 %3649, %v4532_v39  }
 0x355   : > { %v1899_v47 = vpop.f32.mrf.mxu2 }
 0x356   : > { %2173 = vperm.xlu2 %3651, %v1899_v47  }
 0x357   : > { %1943 = vperm.xlu0 %3649, %v4503_v34   ;;  %v4931_v34 = vpop.permute.xlu1 %2098 }
 0x35d   : > { %v4920_v44 = vpop.f32.mrf.mxu2 }
 0x35f   : > { %1928 = vperm.xlu0 %3649, %v4467_v27   ;;  %v4936_v27 = vpop.permute.xlu0 %2392 }
 0x365   : > { %v4923_v25 = vpop.f32.mrf.mxu2 }
 0x366   : > { %2183 = vperm.xlu1 %3650, %v4923_v25  }
 0x367   : > { %2063 = vperm.xlu0 %3649, %v4787_v41   ;;  %v4942_v41 = vpop.permute.xlu0 %2428 }
 0x368   : > { %v4938_v39 = vpop.permute.xlu1 %2113 }
 0x36d   : > { %v1908_v46 = vpop.f32.mrf.mxu2 }
 0x36e   : > { %3652 = vset.pattern.permute.xlu1 %v6088_v15  ;;  %2188 = vperm.xlu2 %3651, %v1908_v46  }
 0x36f   : > { %1913 = vperm.xlu0 %3649, %v4432_v32   ;;  %2496 = vperm.xlu1 %3652, %v1866_v31  }
 0x376   : > { %3653 = vset.pattern.permute.xlu2 %v6088_v15 }
 0x377   : > { %2048 = vperm.xlu0 %3649, %v4770_v53   ;;  %2408 = vperm.xlu1 %3652, %v4677_v2   ;;  %v4949_v53 = vpop.permute.xlu0 %2440  ;;  %v4955_v2 = vld [vmem:[%s6086_s2 + $0x160] sm:$0xff] }
 0x378   : > { %2412 = vperm.xlu2 %3653, %v4684_v60  }
 0x37f   : > { %2138 = vperm.xlu0 %3649, %v1878_v52   ;;  %2484 = vperm.xlu1 %3652, %v4834_v24   ;;  %v4962_v24 = vpop.permute.xlu0 %2452 }
 0x380   : > { %2488 = vperm.xlu2 %3653, %v4848_v54   ;;  %v4945_v31 = vpop.permute.xlu1 %2128 }
 0x387   : > { %2033 = vperm.xlu0 %3649, %v4743_v38   ;;  %2396 = vperm.xlu1 %3652, %v4622_v56   ;;  %v4968_v56 = vld [vmem:[%s6086_s2 + $0x170] sm:$0xff]  ;;  %v4981_v38 = vld [vmem:[%s6086_s2 + $0x158] sm:$0xff] }
 0x388   : > { %2400 = vperm.xlu2 %3653, %v4644_v63  }
 0x389   : > { %v2509_v32 = vpop.permute.xlu1 %2508 }
 0x38a   : > { %v4958_v60 = vmul.f32 %v2509_v32, %v4955_v2 }
 0x38c   : > { %6120 = vst [vmem:[#allocation88_spill] sm:$0xff] %v4958_v60  ;;  %v2203_v60 = vmul.f32 %v4767_v8, %v4778_v33  ;;  %v2199_v8 = vmul.f32 %v4710_v26, %v4731_v7  ;;  %v2196_v33 = vmul.f32 %v4693_v55, %v4655_v3  ;;  %v2195_v26 = vmul.f32 %v4633_v19, %v4670_v23  ;;  %v5059_v19 = vpop.permute.xlu2 %2073  ;;  %v5065_v55 = vld [vmem:[%s6086_s2] sm:$0xff] }
 0x38d   : > { %v2193_v3 = vmul.f32 %v4572_v30, %v4591_v12  ;;  %v2192_v23 = vmul.f32 %v4612_v20, %v4631_v4  ;;  %v2222_v20 = vmul.f32 %v4887_v18, %v4894_v57  ;;  %v5073_v12 = vld [vmem:[%s6086_s2 + $0xf0] sm:$0xff]  ;;  %v5084_v18 = vld [vmem:[%s6086_s2 + $0xd8] sm:$0xff]  ;;  %v2219_v57 = vmul.f32 %v4884_v61, %v4853_v45  ;;  %v5099_v45 = vld [vmem:[%s6124_s30] sm:$0xff] }
 0x38e   : > { %vm564_vm3 = vcmp.gt.f32.partialorder %v5099_v45, 0.0  ;;  %v3890_v61 = vmov 1.0  }
 0x38f   : > { %2123 = vperm.xlu0 %3649, %v4881_v42   ;;  %2464 = vperm.xlu1 %3652, %v4799_v11  }
 0x390   : > { %2476 = vperm.xlu2 %3653, %v4819_v49  }
 0x394   : > { %v5075_v4 = vpop.permute.xlu2 %2088 }
 0x397   : > { %2018 = vperm.xlu0 %3649, %v4691_v35   ;;  %2552 = vperm.xlu1 %3652, %v1908_v46  }
 0x398   : > { %2468 = vperm.xlu2 %3653, %v4806_v9   ;;  %v2517_v63 = vpop.permute.xlu0 %2516  ;;  %v4972_v52 = vpop.permute.xlu1 %2143 }
 0x399   : > { %v4975_v42 = vmul.f32 %v2517_v63, %v4968_v56 }
 0x39f   : > { %2108 = vperm.xlu0 %3649, %v4848_v54   ;;  %2540 = vperm.xlu1 %3652, %v1899_v47   ;;  %v4996_v47 = vld [vmem:[%s6086_s2 + $0x178] sm:$0xff] }
 0x3a0   : > { %2544 = vperm.xlu2 %3653, %v4920_v44   ;;  %v2505_v35 = vpop.permute.xlu0 %2504 }
 0x3a1   : > { %v4985_v1 = vmul.f32 %v2505_v35, %v4981_v38  ;;  %v4987_v11 = vpop.permute.xlu1 %2420  ;;  %v5013_v35 = vld [vmem:[%s6086_s2 + $0x70] sm:$0xff] }
 0x3a3   : > { %6121 = vst [vmem:[#allocation89_spill] sm:$0xff] %v4985_v1  ;;  %v2204_v1 = vmul.f32 %v4804_v29, %v4749_v10  ;;  %v5028_v10 = vld [vmem:[%s6086_s2 + $0x48] sm:$0xff] }
 0x3a7   : > { %2003 = vperm.xlu0 %3649, %v4665_v58   ;;  %2528 = vperm.xlu1 %3652, %v4906_v48   ;;  %v5006_v48 = vld [vmem:[%s6086_s2 + $0x78] sm:$0xff] }
 0x3a8   : > { %2536 = vperm.xlu2 %3653, %v1896_v13   ;;  %v4991_v54 = vpop.permute.xlu0 %2416 }
 0x3a9   : > { %v2521_v46 = vpop.permute.xlu1 %2520 }
 0x3aa   : > { %v4999_v32 = vmul.f32 %v2521_v46, %v4996_v47 }
 0x3af   : > { %2093 = vperm.xlu0 %3649, %v4819_v49  }
 0x3b0   : > { %2524 = vperm.xlu2 %3653, %v4901_v51  }
 0x3b1   : > { %v1989_v13 = vpop.permute.xlu0 %1988 }
 0x3b2   : > { %v2206_v63 = vmul.f32 %v1989_v13, %v5006_v48 }
 0x3b4   : > { %2251 = vmatpush.msra.mxu3 %v2206_v63  ;;  %v2201_v63 = vmul.f32 %v4703_v0, %v4715_v40  ;;  %v5039_v0 = vld [vmem:[%s6086_s2 + $0x30] sm:$0xff] }
 0x3b7   : > { %2083 = vperm.xlu0 %3649, %v4806_v9   ;;  %v2202_v9 = vmul.f32 %v4738_v62, %v4758_v14  ;;  %v2198_v62 = vmul.f32 %v4687_v50, %v4698_v36  ;;  %v5051_v50 = vld [vmem:[%s6086_s2 + $0x18] sm:$0xff] }
 0x3b9   : > { %v1984_v46 = vpop.permute.xlu0 %1983 }
 0x3ba   : > { %v2205_v49 = vmul.f32 %v1984_v46, %v5013_v35 }
 0x3bc   : > { %2252 = vmatpush.msra.mxu3 %v2205_v49  ;;  %v5114_v49 = vld [vmem:[%s6086_s2 + $0xc0] sm:$0xff] }
 0x3be   : > { %2253 = vmatpush.msra.mxu3 %v2204_v1 }
 0x3bf   : > { %2153 = vperm.xlu0 %3649, %v4901_v51  }
 0x3c0   : > { %2254 = vmatpush.msra.mxu3 %v2203_v60  ;;  %v2217_v60 = vmul.f32 %v4831_v59, %v4842_v17  ;;  %v6125_v17 = vld [vmem:[#allocation74_spill] sm:$0xff] }
 0x3c1   : > { %v1959_v13 = vpop.permute.xlu0 %1958 }
 0x3c2   : > { %2255 = vmatpush.msra.mxu3 %v2202_v9  ;;  %v2200_v29 = vmul.f32 %v1959_v13, %v5028_v10 }
 0x3c4   : > { %2256 = vmatpush.msra.mxu3 %v2201_v63  ;;  %v5120_v63 = vld [vmem:[%s6086_s2 + $0xb0] sm:$0xff] }
 0x3c6   : > { %2257 = vmatpush.msra.mxu3 %v2200_v29  ;;  %v6126_v29 = vld [vmem:[#allocation79_spill] sm:$0xff] }
 0x3c7   : > { %2178 = vperm.xlu0 %3649, %v4920_v44  }
 0x3c8   : > { %2258 = vmatpush.msra.mxu3 %v2199_v8 }
 0x3c9   : > { %v1944_v40 = vpop.permute.xlu0 %1943 }
 0x3ca   : > { %v2197_v14 = vmul.f32 %v1944_v40, %v5039_v0  ;;  %2259 = vmatpush.msra.mxu3 %v2198_v62  ;;  %v6127_v40 = vld [vmem:[#allocation81_spill] sm:$0xff] }
 0x3cc   : > { %2260 = vmatpush.msra.mxu3 %v2197_v14  ;;  %v2213_v14 = vmul.f32 %v6127_v40, %v5120_v63  ;;  %v2237_v40 = vmul.f32 %v4972_v52, %v4968_v56  ;;  %v5197_v56 = vld [vmem:[%s6086_s2 + $0x148] sm:$0xff]  ;;  %v5202_v52 = vld [vmem:[%s6086_s2 + $0x150] sm:$0xff] }
 0x3ce   : > { %2261 = vmatpush.msra.mxu3 %v2196_v33 }
 0x3cf   : > { %3654 = vset.pattern.permute.xlu0 %v6088_v15 }
 0x3d0   : > { %2262 = vmatpush.msra.mxu3 %v2195_v26  ;;  %2492 = vperm.xlu0 %3654, %v4860_v6  }
 0x3d1   : > { %v1929_v36 = vpop.permute.xlu0 %1928 }
 0x3d2   : > { %v2194_v7 = vmul.f32 %v1929_v36, %v5051_v50  ;;  %v5132_v36 = vld [vmem:[%s6086_s2 + $0xa0] sm:$0xff] }
 0x3d4   : > { %2263 = vmatpush.msra.mxu3 %v2194_v7  ;;  %v5137_v7 = vld [vmem:[%s6086_s2 + $0xa8] sm:$0xff] }
 0x3d6   : > { %2264 = vmatpush.msra.mxu3 %v2193_v3 }
 0x3d8   : > { %2265 = vmatpush.msra.mxu3 %v2192_v23  ;;  %2404 = vperm.xlu0 %3654, %v4665_v58  }
 0x3d9   : > { %v2064_v15 = vpop.permute.xlu0 %2063 }
 0x3da   : > { %v2221_v58 = vmul.f32 %v2064_v15, %v5073_v12  ;;  %v6128_v15 = vld [vmem:[#allocation77_spill] sm:$0xff] }
 0x3e0   : > { %2480 = vperm.xlu0 %3654, %v4826_v22   ;;  %v2220_v22 = vmul.f32 %v4871_v5, %v4876_v37  ;;  %v5091_v5 = vpop.permute.xlu2 %2103  ;;  %v6123_v37 = vld [vmem:[#allocation83_spill] sm:$0xff] }
 0x3e1   : > { %v1914_v6 = vpop.permute.xlu0 %1913 }
 0x3e2   : > { %v2191_v30 = vmul.f32 %v1914_v6, %v5065_v55  ;;  %v2211_v6 = vmul.f32 %v6128_v15, %v5132_v36 }
 0x3e4   : > { %2266 = vmatpush.msra.mxu3 %v2191_v30  ;;  %v6129_v30 = vld [vmem:[#allocation80_spill] sm:$0xff] }
 0x3e5   : > { %3535 = vmatmul.msk.f32.vlgmr.msra.gmra.mxu3 %vm564_vm3, %v3890_v61 }
 0x3e6   : > { %2271 = vmatpush.msrb.mxu3 %v2222_v20 }
 0x3e8   : > { %2272 = vmatpush.msrb.mxu3 %v2221_v58  ;;  %2472 = vperm.xlu0 %3654, %v4813_v21   ;;  %v6122_v21 = vld [vmem:[#allocation85_spill] sm:$0xff]  ;;  %v2119_v59 = vpop.permute.xlu2 %2118 }
 0x3e9   : > { %v2049_v51 = vpop.permute.xlu0 %2048  ;;  %v2216_v1 = vmul.f32 %v6123_v37, %v6122_v21  ;;  %v5165_v37 = vld [vmem:[%s6086_s2 + $0x80] sm:$0xff] }
 0x3ea   : > { %2273 = vmatpush.msrb.mxu3 %v2220_v22  ;;  %v2218_v44 = vmul.f32 %v2049_v51, %v5084_v18  ;;  %v5157_v51 = vld [vmem:[%s6086_s2 + $0x88] sm:$0xff] }
 0x3ec   : > { %2274 = vmatpush.msrb.mxu3 %v2219_v57  ;;  %v5152_v57 = vld [vmem:[%s6086_s2 + $0x90] sm:$0xff] }
 0x3ee   : > { %2275 = vmatpush.msrb.mxu3 %v2218_v44 }
 0x3f0   : > { %2276 = vmatpush.msrb.mxu3 %v2217_v60  ;;  %2548 = vperm.xlu0 %3654, %v4923_v25   ;;  %v5109_v25 = vld [vmem:[%s6086_s2 + $0xb8] sm:$0xff]  ;;  %v2134_v62 = vpop.permute.xlu2 %2133 }
 0x3f1   : > { %v2139_v46 = vpop.permute.xlu0 %2138  ;;  %v2214_v8 = vmul.f32 %v6126_v29, %v5109_v25 }
 0x3f2   : > { %2277 = vmatpush.msrb.mxu3 %v2216_v1  ;;  %v5170_v1 = vld [vmem:[%s6124_s30 + $0x8] sm:$0xff] }
 0x3f3   : > { %vm565_vm4 = vcmp.gt.f32.partialorder %v5170_v1, 0.0 }
 0x3f8   : > { %2460 = vperm.xlu0 %3654, %v6125_v17   ;;  %v5127_v26 = vpop.permute.xlu2 %2512  ;;  %v6130_v17 = vld [vmem:[#allocation75_spill] sm:$0xff] }
 0x3f9   : > { %v2034_v9 = vpop.permute.xlu0 %2033 }
 0x3fa   : > { %v2215_v13 = vmul.f32 %v2034_v9, %v5114_v49  ;;  %v2208_v9 = vmul.f32 %v6130_v17, %v5157_v51  ;;  %v5240_v17 = vld [vmem:[%s6086_s2 + $0x118] sm:$0xff] }
 0x3fc   : > { %2278 = vmatpush.msrb.mxu3 %v2215_v13  ;;  %v6131_v13 = vld [vmem:[#allocation78_spill] sm:$0xff] }
 0x3fd   : > { %v2207_v29 = vmul.f32 %v6131_v13, %v5165_v37  ;;  %v5245_v13 = vld [vmem:[%s6086_s2 + $0x120] sm:$0xff] }
 0x3fe   : > { %2279 = vmatpush.msrb.mxu3 %v2214_v8 }
 0x400   : > { %2280 = vmatpush.msrb.mxu3 %v2213_v14  ;;  %2532 = vperm.xlu0 %3654, %v4913_v28   ;;  %v5143_v28 = vld [vmem:[%s6086_s2 + $0x98] sm:$0xff]  ;;  %v2149_v58 = vpop.permute.xlu2 %2148  ;;  %v5186_v14 = vld [vmem:[%s6086_s2 + $0x168] sm:$0xff] }
 0x401   : > { %v2124_v33 = vpop.permute.xlu0 %2123  ;;  %v2210_v20 = vmul.f32 %v6129_v30, %v5143_v28  ;;  %v2238_v8 = vmul.f32 %v2149_v58, %v4996_v47  ;;  %v2236_v15 = vmul.f32 %v2139_v46, %v5186_v14  ;;  %v2235_v47 = vmul.f32 %v2134_v62, %v4955_v2  ;;  %v5208_v2 = vld [vmem:[%s6086_s2 + $0x140] sm:$0xff]  ;;  %v2159_v62 = vpop.permute.xlu1 %2158  ;;  %v5221_v58 = vld [vmem:[%s6086_s2 + $0x138] sm:$0xff] }
 0x402   : > { %v2233_v46 = vmul.f32 %v2124_v33, %v5202_v52  ;;  %v5216_v33 = vld [vmem:[%s6086_s2 + $0x130] sm:$0xff] }
 0x408   : > { %v5159_v44 = vpop.permute.xlu2 %2424 }
 0x409   : > { %v2019_v3 = vpop.permute.xlu0 %2018 }
 0x40a   : > { %v2212_v23 = vmul.f32 %v2019_v3, %v5137_v7 }
 0x40c   : > { %2281 = vmatpush.msrb.mxu3 %v2212_v23 }
 0x40e   : > { %2282 = vmatpush.msrb.mxu3 %v2211_v6  ;;  %v2234_v6 = vmul.f32 %v4945_v31, %v4981_v38  ;;  %v2232_v38 = vmul.f32 %v2119_v59, %v5197_v56  ;;  %v563_v59 = vld [vmem:[%s6124_s30 + $0x18] sm:$0xff] }
 0x40f   : > { %3551 = vmatmul.msk.f32.vlgmr.msrb.gmra.mxu0 %vm2247_vm5, %v563_v59  ;;  %vm567_vm7 = vcmp.gt.f32.partialorder %v563_v59, 0.0 }
 0x410   : > { %2283 = vmatpush.msrb.mxu3 %v2210_v20  ;;  %v5188_v3 = vpop.permute.xlu2 %2500  ;;  %v2231_v20 = vmul.f32 %v4938_v39, %v5208_v2  ;;  %v5230_v39 = vld [vmem:[%s6086_s2 + $0x128] sm:$0xff] }
 0x411   : > { %v2109_v22 = vpop.permute.xlu0 %2108 }
 0x418   : > { %v2169_v31 = vpop.permute.xlu2 %2168 }
 0x419   : > { %v2004_v60 = vpop.permute.xlu0 %2003 }
 0x41a   : > { %v2209_v21 = vmul.f32 %v2004_v60, %v5152_v57  ;;  %v2230_v60 = vmul.f32 %v2109_v22, %v5221_v58  ;;  %v2228_v22 = vmul.f32 %v4931_v34, %v5230_v39  ;;  %v2226_v34 = vmul.f32 %v5075_v4, %v5240_v17  ;;  %v5269_v4 = vld [vmem:[%s6124_s30 + $0x10] sm:$0xff] }
 0x41b   : > { %vm566_vm6 = vcmp.gt.f32.partialorder %v5269_v4, 0.0 }
 0x41c   : > { %2284 = vmatpush.msrb.mxu3 %v2209_v21  ;;  %v2229_v21 = vmul.f32 %v5091_v5, %v5216_v33  ;;  %v2164_v5 = vpop.permute.xlu1 %2163 }
 0x41e   : > { %2285 = vmatpush.msrb.mxu3 %v2208_v9 }
 0x420   : > { %2286 = vmatpush.msrb.mxu3 %v2207_v29  ;;  %v2174_v9 = vpop.permute.xlu2 %2173 }
 0x421   : > { %3536 = vmatmul.msk.f32.vlgmr.msrb.gmra.mxu3 %vm565_vm4, %v3890_v61  ;;  %v2094_v23 = vpop.permute.xlu0 %2093 }
 0x422   : > { %2291 = vmatpush.msra.mxu3 %v2238_v8  ;;  %v2227_v29 = vmul.f32 %v2094_v23, %v5245_v13  ;;  %v5264_v23 = vld [vmem:[%s6086_s2 + $0x100] sm:$0xff] }
 0x424   : > { %2292 = vmatpush.msra.mxu3 %v2237_v40  ;;  %v5253_v40 = vld [vmem:[%s6086_s2 + $0x108] sm:$0xff] }
 0x426   : > { %2293 = vmatpush.msra.mxu3 %v2236_v15  ;;  %v5258_v15 = vld [vmem:[%s6086_s2 + $0x110] sm:$0xff] }
 0x428   : > { %2294 = vmatpush.msra.mxu3 %v2235_v47 }
 0x429   : > { %v2084_v30 = vpop.permute.xlu0 %2083 }
 0x42a   : > { %2295 = vmatpush.msra.mxu3 %v2234_v6  ;;  %v2225_v47 = vmul.f32 %v2084_v30, %v5258_v15  ;;  %v2224_v6 = vmul.f32 %v4927_v43, %v5253_v40  ;;  %v2189_v30 = vpop.permute.xlu2 %2188 }
 0x42c   : > { %2296 = vmatpush.msra.mxu3 %v2233_v46  ;;  %v5276_v46 = vld [vmem:[%s6086_s2 + $0x1b8] sm:$0xff] }
 0x42d   : > { %v2246_v43 = vmul.f32 %v2189_v30, %v5276_v46 }
 0x42e   : > { %2297 = vmatpush.msra.mxu3 %v2232_v38  ;;  %v2223_v38 = vmul.f32 %v5059_v19, %v5264_v23 }
 0x430   : > { %2298 = vmatpush.msra.mxu3 %v2231_v20  ;;  %v5284_v20 = vld [vmem:[%s6086_s2 + $0x1b0] sm:$0xff] }
 0x431   : > { %v2154_v8 = vpop.permute.xlu0 %2153 }
 0x432   : > { %2299 = vmatpush.msra.mxu3 %v2230_v60  ;;  %v2184_v60 = vpop.permute.xlu1 %2183 }
 0x433   : > { %v2245_v19 = vmul.f32 %v2184_v60, %v5284_v20 }
 0x434   : > { %2300 = vmatpush.msra.mxu3 %v2229_v21 }
 0x436   : > { %2301 = vmatpush.msra.mxu3 %v2228_v22  ;;  %v5294_v22 = vld [vmem:[%s6086_s2 + $0x1a0] sm:$0xff] }
 0x438   : > { %2302 = vmatpush.msra.mxu3 %v2227_v29  ;;  %v5299_v29 = vld [vmem:[%s6086_s2 + $0x1a8] sm:$0xff] }
 0x439   : > { %v2179_v21 = vpop.permute.xlu0 %2178 }
 0x43a   : > { %2303 = vmatpush.msra.mxu3 %v2226_v34  ;;  %v2244_v34 = vmul.f32 %v2179_v21, %v5299_v29  ;;  %v5324_v21 = vld [vmem:[%s6086_s2 + $0x180] sm:$0xff] }
 0x43c   : > { %2304 = vmatpush.msra.mxu3 %v2225_v47  ;;  %v5305_v47 = vld [vmem:[%s6086_s2 + $0x198] sm:$0xff] }
 0x43d   : > { %v2242_v30 = vmul.f32 %v2169_v31, %v5305_v47  ;;  %v2239_v31 = vmul.f32 %v2154_v8, %v5324_v21  ;;  %v6134_v8 = vld [vmem:[#allocation73_spill] sm:$0xff] }
 0x43e   : > { %2305 = vmatpush.msra.mxu3 %v2224_v6  ;;  %v2243_v6 = vmul.f32 %v2174_v9, %v5294_v22 }
 0x440   : > { %2306 = vmatpush.msra.mxu3 %v2223_v38  ;;  %v5311_v38 = vld [vmem:[%s6086_s2 + $0x190] sm:$0xff] }
 0x441   : > { %3537 = vmatmul.msk.f32.vlgmr.msra.gmra.mxu3 %vm566_vm6, %v3890_v61  ;;  %v2241_v60 = vmul.f32 %v2164_v5, %v5311_v38  ;;  %v2570_v5 = vmul.f32 %v4936_v27, %v5006_v48  ;;  %v6138_v27 = vld [vmem:[#allocation69_spill] sm:$0xff]  ;;  %v6139_v48 = vld [vmem:[#allocation66_spill] sm:$0xff] }
 0x442   : > { %2319 = vmatpush.msrb.mxu3 %v2246_v43  ;;  %v5317_v43 = vld [vmem:[%s6086_s2 + $0x188] sm:$0xff]  ;;  %s5802_s2 = sand.u32 1, %s3878_s25  }
 0x443   : > { %v2240_v9 = vmul.f32 %v2159_v62, %v5317_v43  ;;  %v6132_v62 = vld [vmem:[#allocation76_spill] sm:$0xff]  ;;  %s6019_s21 = sshll.u32 %s5802_s2, 3 }
 0x444   : > { %2320 = vmatpush.msrb.mxu3 %v2245_v19  ;;  %v6017_v19 = vmov 0.0   ;;  %v2569_v59 = vmul.f32 %v6132_v62, %v5013_v35  ;;  %v6140_v35 = vld [vmem:[#allocation67_spill] sm:$0xff]  ;;  %v6142_v62 = vld [vmem:[#allocation62_spill] sm:$0xff]  ;;  %s5810_s22 = scalar_lea.vmem [#allocation4], %s6019_s21 }
 0x445   : > { %s3260_s23 = sshll.u32 %s5810_s22, 4  ;;  %s3261_s23 = int_to_ptr.vmem [resolvable:$true] %s3260_s23 }
 0x446   : > { %2321 = vmatpush.msrb.mxu3 %v2244_v34  ;;  %v5328_v34 = vsel %vm567_vm7, 1.0, %v6017_v19  ;;  %v6137_v19 = vld [vmem:[#allocation68_spill] sm:$0xff] }
 0x448   : > { %2322 = vmatpush.msrb.mxu3 %v2243_v6  ;;  %v6133_v6 = vld [vmem:[#allocation70_spill] sm:$0xff] }
 0x44a   : > { %2323 = vmatpush.msrb.mxu3 %v2242_v30  ;;  %v6135_v30 = vld [vmem:[#allocation72_spill] sm:$0xff] }
 0x44c   : > { %2324 = vmatpush.msrb.mxu3 %v2241_v60  ;;  %v6136_v60 = vld [vmem:[#allocation71_spill] sm:$0xff] }
 0x44e   : > { %2325 = vmatpush.msrb.mxu3 %v2240_v9  ;;  %v2564_v9 = vmul.f32 %v6136_v60, %v5028_v10  ;;  %v2497_v10 = vpop.permute.xlu1 %2496  ;;  %v6146_v60 = vld [vmem:[#allocation63_spill] sm:$0xff] }
 0x450   : > { %2326 = vmatpush.msrb.mxu3 %v2239_v31  ;;  %v2561_v31 = vmul.f32 %v6139_v48, %v5039_v0  ;;  %v2585_v0 = vmul.f32 %v4962_v24, %v5073_v12  ;;  %v6148_v48 = vld [vmem:[#allocation84_spill] sm:$0xff]  ;;  %v6150_v24 = vld [vmem:[#allocation86_spill] sm:$0xff] }
 0x451   : > { %3538 = vmatmul.msk.f32.vlgmr.msrb.gmra.mxu3 %vm2247_vm5, %v5328_v34 }
 0x452   : > { %2611 = vmatpush.msra.mxu3 %v2570_v5  ;;  %v6141_v5 = vld [vmem:[#allocation64_spill] sm:$0xff] }
 0x454   : > { %2612 = vmatpush.msra.mxu3 %v2569_v59  ;;  %v2558_v59 = vmul.f32 %v6142_v62, %v5051_v50  ;;  %v2413_v50 = vpop.permute.xlu2 %2412 }
 0x456   : > { %2613 = vmatpush.msra.mxu3 %v6133_v6  ;;  %v6143_v6 = vld [vmem:[#allocation65_spill] sm:$0xff] }
 0x458   : > { %2614 = vmatpush.msra.mxu3 %v6134_v8  ;;  %v6144_v8 = vld [vmem:[#allocation61_spill] sm:$0xff] }
 0x45a   : > { %2615 = vmatpush.msra.mxu3 %v6135_v30 }
 0x45c   : > { %2616 = vmatpush.msra.mxu3 %v6137_v19  ;;  %v6145_v19 = vld [vmem:[#allocation60_spill] sm:$0xff]  ;;  %v2489_v12 = vpop.permute.xlu2 %2488 }
 0x45d   : > { %v2555_v30 = vmul.f32 %v6145_v19, %v5065_v55  ;;  %v2582_v55 = vmul.f32 %v4949_v53, %v5084_v18  ;;  %v2577_v53 = vmul.f32 %v4987_v11, %v5120_v63  ;;  %v2596_v19 = vmul.f32 %v2497_v10, %v5197_v56 }
 0x45e   : > { %2617 = vmatpush.msra.mxu3 %v2564_v9  ;;  %v6147_v9 = vld [vmem:[#allocation87_spill] sm:$0xff] }
 0x460   : > { %2618 = vmatpush.msra.mxu3 %v6138_v27  ;;  %v2409_v27 = vpop.permute.xlu1 %2408 }
 0x462   : > { %2619 = vmatpush.msra.mxu3 %v6140_v35  ;;  %v6149_v35 = vld [vmem:[#allocation82_spill] sm:$0xff] }
 0x464   : > { %2620 = vmatpush.msra.mxu3 %v2561_v31  ;;  %v2493_v31 = vpop.permute.xlu0 %2492 }
 0x466   : > { %2621 = vmatpush.msra.mxu3 %v6141_v5  ;;  %v2578_v5 = vmul.f32 %v5159_v44, %v5109_v25 }
 0x468   : > { %2622 = vmatpush.msra.mxu3 %v6143_v6  ;;  %v2485_v62 = vpop.permute.xlu1 %2484  ;;  %v2575_v6 = vmul.f32 %v2413_v50, %v5132_v36  ;;  %v2600_v36 = vmul.f32 %v5127_v26, %v5186_v14  ;;  %v2594_v26 = vmul.f32 %v2489_v12, %v5221_v58 }
 0x469   : > { %v2593_v14 = vmul.f32 %v2485_v62, %v5216_v33 }
 0x46a   : > { %2623 = vmatpush.msra.mxu3 %v2558_v59  ;;  %v2576_v59 = vmul.f32 %v4991_v54, %v5137_v7 }
 0x46c   : > { %2624 = vmatpush.msra.mxu3 %v6144_v8  ;;  %v2405_v18 = vpop.permute.xlu0 %2404 }
 0x46d   : > { %v2573_v25 = vmul.f32 %v2405_v18, %v5152_v57  ;;  %v2597_v57 = vmul.f32 %v5188_v3, %v5202_v52 }
 0x46e   : > { %2625 = vmatpush.msra.mxu3 %v6146_v60 }
 0x470   : > { %2626 = vmatpush.msra.mxu3 %v2555_v30  ;;  %v2397_v44 = vpop.permute.xlu1 %2396  ;;  %v2595_v30 = vmul.f32 %v2493_v31, %v5208_v2 }
 0x471   : > { %3539 = vmatmul.msk.f32.vlgmr.msra.gmra.mxu3 %vm564_vm3, %v3890_v61  ;;  %v2571_v63 = vmul.f32 %v2397_v44, %v5165_v37 }
 0x472   : > { %2631 = vmatpush.msrb.mxu3 %v4897_v16  ;;  %v2579_v16 = vmul.f32 %v4942_v41, %v5114_v49  ;;  %v2574_v41 = vmul.f32 %v2409_v27, %v5143_v28  ;;  %v2401_v49 = vpop.permute.xlu2 %2400  ;;  %v6151_v28 = vld [vmem:[#allocation88_spill] sm:$0xff] }
 0x473   : > { %v2572_v8 = vmul.f32 %v2401_v49, %v5157_v51  ;;  %v6152_v51 = vld [vmem:[#allocation89_spill] sm:$0xff] }
 0x474   : > { %2632 = vmatpush.msrb.mxu3 %v2585_v0  ;;  %v2481_v11 = vpop.permute.xlu0 %2480 }
 0x475   : > { %v2592_v60 = vmul.f32 %v2481_v11, %v5230_v39 }
 0x476   : > { %2633 = vmatpush.msrb.mxu3 %v6147_v9 }
 0x478   : > { %2634 = vmatpush.msrb.mxu3 %v6148_v48  ;;  %v2465_v37 = vpop.permute.xlu1 %2464  ;;  %v2268_v48 = vpop.f32.mrf.mxu3 }
 0x479   : > { %v2588_v0 = vmul.f32 %v2465_v37, %v5253_v40  ;;  %v5451_v37 = vld [vmem:[%s6154_s3 + $0x40] sm:$0xff] }
 0x47a   : > { %2635 = vmatpush.msrb.mxu3 %v2582_v55  ;;  %v2477_v54 = vpop.permute.xlu2 %2476 }
 0x47b   : > { %v2591_v52 = vmul.f32 %v2477_v54, %v5245_v13  ;;  %v3038_v54 = vld [vmem:[%s6153_s6 + $0x18] sm:$0xff] }
 0x47c   : > { %2636 = vmatpush.msrb.mxu3 %v6149_v35  ;;  %v2473_v7 = vpop.permute.xlu0 %2472  ;;  %3058 = vmatpush.msrb.mxu2 %v3038_v54 }
 0x47d   : > { %v2590_v10 = vmul.f32 %v2473_v7, %v5240_v17  ;;  %v5427_v7 = vld [vmem:[%s6154_s3 + $0xc0] sm:$0xff] }
 0x47e   : > { %2637 = vmatpush.msrb.mxu3 %v6150_v24 }
 0x480   : > { %2638 = vmatpush.msrb.mxu3 %v2579_v16  ;;  %v2553_v3 = vpop.permute.xlu1 %2552 }
 0x481   : > { %v2610_v50 = vmul.f32 %v2553_v3, %v5276_v46  ;;  %v5494_v3 = vld [vmem:[%s6154_s3 + $0x68] sm:$0xff] }
 0x482   : > { %2639 = vmatpush.msrb.mxu3 %v2578_v5 }
 0x484   : > { %2640 = vmatpush.msrb.mxu3 %v2577_v53 }
 0x486   : > { %2641 = vmatpush.msrb.mxu3 %v2576_v59 }
 0x488   : > { %2642 = vmatpush.msrb.mxu3 %v2575_v6  ;;  %v2541_v39 = vpop.permute.xlu1 %2540 }
 0x489   : > { %v2607_v40 = vmul.f32 %v2541_v39, %v5294_v22 }
 0x48a   : > { %2643 = vmatpush.msrb.mxu3 %v2574_v41 }
 0x48c   : > { %2644 = vmatpush.msrb.mxu3 %v2573_v25 }
 0x48e   : > { %2645 = vmatpush.msrb.mxu3 %v2572_v8 }
 0x490   : > { %2646 = vmatpush.msrb.mxu3 %v2571_v63  ;;  %v2529_v46 = vpop.permute.xlu1 %2528 }
 0x491   : > { %3540 = vmatmul.msk.f32.vlgmr.msrb.gmra.mxu3 %vm565_vm4, %v3890_v61 }
 0x492   : > { %2651 = vmatpush.msra.mxu3 %v4999_v32  ;;  %v2469_v32 = vpop.permute.xlu2 %2468 }
 0x493   : > { %v2589_v2 = vmul.f32 %v2469_v32, %v5258_v15  ;;  %v5464_v32 = vld [vmem:[%s6154_s3] sm:$0xff] }
 0x494   : > { %2652 = vmatpush.msra.mxu3 %v4975_v42  ;;  %v2549_v42 = vpop.permute.xlu0 %2548 }
 0x495   : > { %v2609_v17 = vmul.f32 %v2549_v42, %v5284_v20  ;;  %v5482_v42 = vld [vmem:[%s6154_s3 + $0xa8] sm:$0xff] }
 0x496   : > { %2653 = vmatpush.msra.mxu3 %v2600_v36  ;;  %v5422_v36 = vld [vmem:[%s6154_s3 + $0xe0] sm:$0xff] }
 0x498   : > { %2654 = vmatpush.msra.mxu3 %v6151_v28  ;;  %v5434_v28 = vld [vmem:[%s6154_s3 + $0xa0] sm:$0xff] }
 0x49a   : > { %2655 = vmatpush.msra.mxu3 %v6152_v51  ;;  %v2545_v56 = vpop.permute.xlu2 %2544  ;;  %v5445_v51 = vld [vmem:[%s6154_s3 + $0x60] sm:$0xff] }
 0x49b   : > { %v2608_v15 = vmul.f32 %v2545_v56, %v5299_v29  ;;  %v5500_v56 = vld [vmem:[%s6154_s3 + $0x48] sm:$0xff] }
 0x49c   : > { %2656 = vmatpush.msra.mxu3 %v2597_v57  ;;  %v2461_v58 = vpop.permute.xlu0 %2460  ;;  %v5439_v57 = vld [vmem:[%s6154_s3 + $0x80] sm:$0xff] }
 0x49d   : > { %v2587_v33 = vmul.f32 %v2461_v58, %v5264_v23  ;;  %v5511_v58 = vld [vmem:[%s6154_s3 + $0x8] sm:$0xff] }
 0x49e   : > { %2657 = vmatpush.msra.mxu3 %v2596_v19  ;;  %v5458_v19 = vld [vmem:[%s6154_s3 + $0x20] sm:$0xff] }
 0x4a0   : > { %2658 = vmatpush.msra.mxu3 %v2595_v30  ;;  %v5470_v30 = vld [vmem:[%s6154_s3 + $0xe8] sm:$0xff] }
 0x4a2   : > { %2659 = vmatpush.msra.mxu3 %v2594_v26  ;;  %v2537_v13 = vpop.permute.xlu2 %2536  ;;  %v5476_v26 = vld [vmem:[%s6154_s3 + $0xc8] sm:$0xff] }
 0x4a3   : > { %v2606_v9 = vmul.f32 %v2537_v13, %v5305_v47  ;;  %v2691_v47 = vlaneseq }
 0x4a4   : > { %2660 = vmatpush.msra.mxu3 %v2593_v14  ;;  %v2533_v23 = vpop.permute.xlu0 %2532  ;;  %v2288_v22 = vpop.f32.mrf.mxu3  ;;  %v5488_v14 = vld [vmem:[%s6154_s3 + $0x88] sm:$0xff] }
 0x4a5   : > { %v2605_v27 = vmul.f32 %v2533_v23, %v5311_v38  ;;  %v2692_v31 = vand.u32 127, %v2691_v47  ;;  %v2289_v35 = vadd.f32 %v2288_v22, %v2268_v48  ;;  %v5534_v22 = vld [vmem:[%s6154_s3 + $0xd0] sm:$0xff] }
 0x4a6   : > { %2661 = vmatpush.msra.mxu3 %v2592_v60  ;;  %v5546_v47 = vld [vmem:[%s6154_s3 + $0x90] sm:$0xff] }
 0x4a7   : > { %vm2693_vm8 = vcmp.lt.s32.totalorder %v2692_v31, 49  ;;  %v5552_v31 = vld [vmem:[%s6154_s3 + $0x70] sm:$0xff] }
 0x4a8   : > { %2662 = vmatpush.msra.mxu3 %v2591_v52 }
 0x4aa   : > { %2663 = vmatpush.msra.mxu3 %v2590_v10  ;;  %v2525_v55 = vpop.permute.xlu2 %2524  ;;  %v5505_v10 = vld [vmem:[%s6154_s3 + $0x28] sm:$0xff] }
 0x4ab   : > { %v2603_v20 = vmul.f32 %v2525_v55, %v5324_v21 }
 0x4ac   : > { %2664 = vmatpush.msra.mxu3 %v2589_v2 }
 0x4ae   : > { %2665 = vmatpush.msra.mxu3 %v2588_v0 }
 0x4b0   : > { %2666 = vmatpush.msra.mxu3 %v2587_v33 }
 0x4b1   : > { %3541 = vmatmul.msk.f32.vlgmr.msra.gmra.mxu3 %vm566_vm6, %v3890_v61  ;;  %v2604_v61 = vmul.f32 %v2529_v46, %v5317_v43 }
 0x4b2   : > { %2679 = vmatpush.msrb.mxu3 %v2610_v50 }
 0x4b4   : > { %2680 = vmatpush.msrb.mxu3 %v2609_v17 }
 0x4b6   : > { %2681 = vmatpush.msrb.mxu3 %v2608_v15 }
 0x4b8   : > { %2682 = vmatpush.msrb.mxu3 %v2607_v40 }
 0x4ba   : > { %2683 = vmatpush.msrb.mxu3 %v2606_v9 }
 0x4bc   : > { %2684 = vmatpush.msrb.mxu3 %v2605_v27 }
 0x4be   : > { %2685 = vmatpush.msrb.mxu3 %v2604_v61  ;;  %v5524_v61 = vld [vmem:[%s6154_s3 + $0xf0] sm:$0xff] }
 0x4c0   : > { %2686 = vmatpush.msrb.mxu3 %v2603_v20  ;;  %v3037_v20 = vld [vmem:[%s6153_s6 + $0x10] sm:$0xff] }
 0x4c1   : > { %3542 = vmatmul.msk.f32.vlgmr.msrb.gmra.mxu3 %vm2247_vm5, %v5328_v34  ;;  %3059 = vmatpush.msrb.mxu2 %v3037_v20 }
 0x4c2   : > { %2759 = vmatpush.msra.mxu3 %v5422_v36 }
 0x4c4   : > { %v2308_v29 = vpop.f32.mrf.mxu3  ;;  %2760 = vmatpush.msra.mxu3 %v5427_v7 }
 0x4c5   : > { %v2309_v16 = vadd.f32 %v2308_v29, %v2289_v35  ;;  %v5540_v29 = vld [vmem:[%s6154_s3 + $0xb0] sm:$0xff] }
 0x4c6   : > { %2761 = vmatpush.msra.mxu3 %v5434_v28  ;;  %v5560_v35 = vld [vmem:[%s6154_s3 + $0x50] sm:$0xff] }
 0x4c8   : > { %2762 = vmatpush.msra.mxu3 %v5439_v57 }
 0x4ca   : > { %2763 = vmatpush.msra.mxu3 %v5445_v51 }
 0x4cc   : > { %2764 = vmatpush.msra.mxu3 %v5451_v37 }
 0x4ce   : > { %2765 = vmatpush.msra.mxu3 %v5458_v19 }
 0x4d0   : > { %2766 = vmatpush.msra.mxu3 %v5464_v32 }
 0x4d2   : > { %2779 = vmatpush.msrb.mxu3 %v5470_v30 }
 0x4d4   : > { %v2328_v38 = vpop.f32.mrf.mxu3  ;;  %2780 = vmatpush.msrb.mxu3 %v5476_v26 }
 0x4d5   : > { %v2329_v24 = vadd.f32 %v2328_v38, %v2309_v16  ;;  %v5566_v16 = vld [vmem:[%s6154_s3 + $0x30] sm:$0xff] }
 0x4d6   : > { %2781 = vmatpush.msrb.mxu3 %v5482_v42  ;;  %v634_v38 = vld [vmem:[%s6154_s3 + $0x10] sm:$0xff] }
 0x4d7   : > { %v2696_v12 = vsel %vm2693_vm8, %v2329_v24, -1e+30  ;;  %v663_v24 = vld [vmem:[%s6154_s3 + $0xf8] sm:$0xff] }
 0x4d8   : > { %v2698_v43 = vsel %vm2247_vm5, %v2696_v12, -inf  ;;  %2782 = vmatpush.msrb.mxu3 %v5488_v14 }
 0x4d9   : > { %2699 = vmax.xlane.f32.xlu0 %v2698_v43  ;;  %v655_v43 = vld [vmem:[%s6154_s3 + $0xb8] sm:$0xff] }
 0x4da   : > { %2783 = vmatpush.msrb.mxu3 %v5494_v3 }
 0x4dc   : > { %2784 = vmatpush.msrb.mxu3 %v5500_v56 }
 0x4de   : > { %2785 = vmatpush.msrb.mxu3 %v5505_v10 }
 0x4e0   : > { %2786 = vmatpush.msrb.mxu3 %v5511_v58 }
 0x4f4   : > { %v2628_v5 = vpop.f32.mrf.mxu3 }
 0x514   : > { %v2648_v21 = vpop.f32.mrf.mxu3 }
 0x515   : > { %v2649_v53 = vadd.f32 %v2648_v21, %v2628_v5  ;;  %v651_v5 = vld [vmem:[%s6154_s3 + $0x98] sm:$0xff] }
 0x516   : > { %v647_v21 = vld [vmem:[%s6154_s3 + $0x78] sm:$0xff] }
 0x534   : > { %v2668_v62 = vpop.f32.mrf.mxu3 }
 0x535   : > { %v2669_v18 = vadd.f32 %v2668_v62, %v2649_v53  ;;  %v643_v62 = vld [vmem:[%s6154_s3 + $0x58] sm:$0xff] }
 0x536   : > { %v639_v53 = vld [vmem:[%s6154_s3 + $0x38] sm:$0xff] }
 0x544   : > { %v2688_v59 = vpop.f32.mrf.mxu3 }
 0x545   : > { %v2689_v6 = vadd.f32 %v2688_v59, %v2669_v18  ;;  %v635_v18 = vld [vmem:[%s6154_s3 + $0x18] sm:$0xff] }
 0x547   : > { %v2697_v41 = vsel %vm2693_vm8, %v2689_v6, -1e+30 }
 0x548   : > { %v2704_v49 = vsel %vm2247_vm5, %v2697_v41, -inf }
 0x549   : > { %2705 = vmax.xlane.f32.xlu1 %v2704_v49 }
 0x54c   : > { %v2700_v25 = vpop.xlane.xlu0 %2699 }
 0x54d   : > { %v2701_v44 = vsub.f32 %v2696_v12, %v2700_v25  ;;  %v659_v12 = vld [vmem:[%s6154_s3 + $0xd8] sm:$0xff] }
 0x54f   : > { %v2702_v8 = vmul.f32 1.442695, %v2701_v44 }
 0x551   : > { %3773 = vpow2.f32 %v2702_v8 }
 0x557   : > { %v3774_v11 = vpop.eup %3773 }
 0x558   : > { %v2710_v63 = vsel %vm2247_vm5, %v3774_v11, 0.0 }
 0x559   : > { %2711 = vadd.xlane.f32.xlu2 %v2710_v63 }
 0x5bc   : > { %v2706_v60 = vpop.xlane.xlu1 %2705 }
 0x5bd   : > { %v2707_v52 = vsub.f32 %v2697_v41, %v2706_v60  ;;  %v6163_v60 = vld [vmem:[#allocation23_spill] sm:$0xff] }
 0x5bf   : > { %v2708_v2 = vmul.f32 1.442695, %v2707_v52  ;;  %v6165_v52 = vld [vmem:[#allocation22_spill] sm:$0xff] }
 0x5c1   : > { %3775 = vpow2.f32 %v2708_v2  ;;  %v6167_v2 = vld [vmem:[#allocation21_spill] sm:$0xff] }
 0x5c7   : > { %v5515_v0 = vpop.eup %3775 }
 0x5c8   : > { %v2729_v33 = vsel %vm2247_vm5, %v5515_v0, 0.0 }
 0x5c9   : > { %2730 = vadd.xlane.f32.xlu2 %v2729_v33 }
 0x5cc   : > { %v2712_v39 = vpop.xlane.xlu2 %2711 }
 0x5cd   : > { %3777 = vrcp.f32 %v2712_v39  ;;  %v2724_v15 = vand.u32 2147483648, %v2712_v39  ;;  %v2722_v23 = vand.u32 2147483647, %v2712_v39  ;;  %vm2718_vm10 = vweird.f32 %v2712_v39 }
 0x5cf   : > { %v2725_v46 = vor.u32 1.1754944e-38, %v2724_v15  ;;  %vm2723_vm12 = vcmp.eq.f32.partialorder %v2722_v23, 8.507059e+37  ;;  %v6175_v23 = vld [vmem:[#allocation17_spill] sm:$0xff] }
 0x5d3   : > { %v3778_v50 = vpop.eup %3777 }
 0x5d4   : > { %v2714_v13 = vmul.f32 %v3778_v50, %v2712_v39  ;;  %vm2719_vm9 = vweird.f32 %v3778_v50  ;;  %v6171_v39 = vld [vmem:[#allocation19_spill] sm:$0xff] }
 0x5d5   : > { %vm2720_vm11 = vmor %vm2718_vm10, %vm2719_vm9 }
 0x5d6   : > { %v2715_v17 = vsub.f32 1.0, %v2714_v13  ;;  %v3036_v13 = vld [vmem:[%s6153_s6 + $0x8] sm:$0xff] }
 0x5d7   : > { %3060 = vmatpush.msrb.mxu2 %v3036_v13 }
 0x5d8   : > { %v2716_v40 = vmul.f32 %v3778_v50, %v2715_v17  ;;  %v6173_v17 = vld [vmem:[#allocation18_spill] sm:$0xff] }
 0x5d9   : > { %v6174_v15 = vmax.f32 %v6173_v17, 0.0  ;;  %v6226_v17 = vld [vmem:[#allocation56_spill] sm:$0xff] }
 0x5da   : > { %v2717_v9 = vadd.f32 %v3778_v50, %v2716_v40 }
 0x5dc   : > { %v2721_v27 = vsel %vm2720_vm11, %v3778_v50, %v2717_v9  ;;  %v6172_v50 = vmax.f32 %v6171_v39, 0.0  ;;  %v6176_v9 = vmax.f32 %v6175_v23, 0.0 }
 0x5dd   : > { %v2726_v55 = vsel %vm2723_vm12, %v2725_v46, %v2721_v27  ;;  %v6177_v27 = vld [vmem:[#allocation16_spill] sm:$0xff] }
 0x5de   : > { %v5519_v48 = vmul.f32 %v3774_v11, %v2726_v55  ;;  %v6178_v55 = vmax.f32 %v6177_v27, 0.0  ;;  %v6232_v27 = vld [vmem:[#allocation53_spill] sm:$0xff] }
 0x5e0   : > { %3543 = vmatmul.msk.f32.vlgmr.msra.gmra.mxu3 %vm2247_vm5, %v5519_v48 }
 0x5e1   : > { %2799 = vmatpush.msra.mxu3 %v5524_v61 }
 0x5e3   : > { %2800 = vmatpush.msra.mxu3 %v5534_v22 }
 0x5e5   : > { %2801 = vmatpush.msra.mxu3 %v5540_v29 }
 0x5e7   : > { %2802 = vmatpush.msra.mxu3 %v5546_v47 }
 0x5e8   : > { %3544 = vmatmul.msk.f32.vlgmr.msrb.gmra.mxu3 %vm2247_vm5, %v5519_v48 }
 0x5e9   : > { %2803 = vmatpush.msra.mxu3 %v5552_v31 }
 0x5eb   : > { %2804 = vmatpush.msra.mxu3 %v5560_v35 }
 0x5ed   : > { %2805 = vmatpush.msra.mxu3 %v5566_v16 }
 0x5ef   : > { %2806 = vmatpush.msra.mxu3 %v634_v38 }
 0x5f0   : > { %3545 = vmatmul.msk.f32.vlgmr.msra.gmra.mxu3 %vm2247_vm5, %v5519_v48 }
 0x5f1   : > { %2819 = vmatpush.msrb.mxu3 %v663_v24 }
 0x5f3   : > { %2820 = vmatpush.msrb.mxu3 %v659_v12 }
 0x5f5   : > { %2821 = vmatpush.msrb.mxu3 %v655_v43 }
 0x5f7   : > { %2822 = vmatpush.msrb.mxu3 %v651_v5 }
 0x5f9   : > { %2823 = vmatpush.msrb.mxu3 %v647_v21 }
 0x5fb   : > { %2824 = vmatpush.msrb.mxu3 %v643_v62 }
 0x5fd   : > { %2825 = vmatpush.msrb.mxu3 %v639_v53 }
 0x5ff   : > { %2826 = vmatpush.msrb.mxu3 %v635_v18 }
 0x600   : > { %3546 = vmatmul.msk.f32.vlgmr.msrb.gmra.mxu3 %vm2247_vm5, %v5519_v48 }
 0x601   : > { %2846 = vmatpush.msra.mxu3 %v5422_v36 }
 0x603   : > { %2847 = vmatpush.msra.mxu3 %v5427_v7 }
 0x605   : > { %2848 = vmatpush.msra.mxu3 %v5434_v28 }
 0x607   : > { %2849 = vmatpush.msra.mxu3 %v5439_v57  ;;  %v6155_v57 = vld [vmem:[#allocation27_spill] sm:$0xff] }
 0x609   : > { %2850 = vmatpush.msra.mxu3 %v5445_v51  ;;  %v6156_v51 = vmax.f32 %v6155_v57, 0.0 }
 0x60b   : > { %2851 = vmatpush.msra.mxu3 %v5451_v37 }
 0x60d   : > { %2852 = vmatpush.msra.mxu3 %v5458_v19  ;;  %v6157_v19 = vld [vmem:[#allocation26_spill] sm:$0xff] }
 0x60f   : > { %2853 = vmatpush.msra.mxu3 %v5464_v32  ;;  %v6158_v32 = vmax.f32 %v6157_v19, 0.0 }
 0x611   : > { %2866 = vmatpush.msrb.mxu3 %v5470_v30  ;;  %v6159_v30 = vld [vmem:[#allocation25_spill] sm:$0xff] }
 0x613   : > { %2867 = vmatpush.msrb.mxu3 %v5476_v26  ;;  %v6160_v26 = vmax.f32 %v6159_v30, 0.0 }
 0x615   : > { %2868 = vmatpush.msrb.mxu3 %v5482_v42  ;;  %v6161_v42 = vld [vmem:[#allocation24_spill] sm:$0xff] }
 0x617   : > { %2869 = vmatpush.msrb.mxu3 %v5488_v14  ;;  %v6162_v14 = vmax.f32 %v6161_v42, 0.0 }
 0x619   : > { %2870 = vmatpush.msrb.mxu3 %v5494_v3  ;;  %v6164_v3 = vmax.f32 %v6163_v60, 0.0 }
 0x61b   : > { %2871 = vmatpush.msrb.mxu3 %v5500_v56  ;;  %v6166_v56 = vmax.f32 %v6165_v52, 0.0 }
 0x61d   : > { %2872 = vmatpush.msrb.mxu3 %v5505_v10 }
 0x61f   : > { %2873 = vmatpush.msrb.mxu3 %v5511_v58  ;;  %v6168_v58 = vmax.f32 %v6167_v2, 0.0 }
 0x63c   : > { %v2731_v59 = vpop.xlane.xlu2 %2730 }
 0x63d   : > { %3779 = vrcp.f32 %v2731_v59  ;;  %v2743_v25 = vand.u32 2147483648, %v2731_v59  ;;  %v2741_v8 = vand.u32 2147483647, %v2731_v59  ;;  %vm2737_vm14 = vweird.f32 %v2731_v59 }
 0x63f   : > { %v2744_v63 = vor.u32 1.1754944e-38, %v2743_v25  ;;  %vm2742_vm0 = vcmp.eq.f32.partialorder %v2741_v8, 8.507059e+37  ;;  %v6198_v25 = vld [vmem:[#allocation38_spill] sm:$0xff]  ;;  %v6200_v8 = vld [vmem:[#allocation37_spill] sm:$0xff] }
 0x643   : > { %v3780_v6 = vpop.eup %3779 }
 0x644   : > { %v2733_v41 = vmul.f32 %v3780_v6, %v2731_v59  ;;  %vm2738_vm13 = vweird.f32 %v3780_v6  ;;  %v6194_v59 = vld [vmem:[#allocation40_spill] sm:$0xff] }
 0x645   : > { %vm2739_vm15 = vmor %vm2737_vm14, %vm2738_vm13 }
 0x646   : > { %v2734_v49 = vsub.f32 1.0, %v2733_v41  ;;  %v6196_v41 = vld [vmem:[#allocation39_spill] sm:$0xff] }
 0x648   : > { %v2735_v44 = vmul.f32 %v3780_v6, %v2734_v49  ;;  %v6197_v49 = vmax.f32 %v6196_v41, 0.0 }
 0x64a   : > { %v2736_v11 = vadd.f32 %v3780_v6, %v2735_v44  ;;  %v6199_v44 = vmax.f32 %v6198_v25, 0.0 }
 0x64c   : > { %v2740_v54 = vsel %vm2739_vm15, %v3780_v6, %v2736_v11  ;;  %v6195_v6 = vmax.f32 %v6194_v59, 0.0  ;;  %v6202_v11 = vld [vmem:[#allocation36_spill] sm:$0xff] }
 0x64d   : > { %v2745_v36 = vsel %vm2742_vm0, %v2744_v63, %v2740_v54  ;;  %v6203_v63 = vmax.f32 %v6202_v11, 0.0  ;;  %v6204_v54 = vld [vmem:[#allocation35_spill] sm:$0xff]  ;;  %v3035_v11 = vld [vmem:[%s6153_s6] sm:$0xff] }
 0x64e   : > { %v5618_v7 = vmul.f32 %v5515_v0, %v2745_v36  ;;  %v6169_v0 = vld [vmem:[#allocation20_spill] sm:$0xff]  ;;  %v6205_v36 = vmax.f32 %v6204_v54, 0.0  ;;  %3061 = vmatpush.msrb.mxu2 %v3035_v11 }
 0x64f   : > { %v6170_v33 = vmax.f32 %v6169_v0, 0.0 }
 0x650   : > { %3547 = vmatmul.msk.f32.vlgmr.msra.gmra.mxu3 %vm2247_vm5, %v5618_v7 }
 0x651   : > { %2886 = vmatpush.msra.mxu3 %v5524_v61  ;;  %v6179_v61 = vld [vmem:[#allocation15_spill] sm:$0xff] }
 0x652   : > { %v6180_v20 = vmax.f32 %v6179_v61, 0.0  ;;  %v6234_v61 = vld [vmem:[#allocation52_spill] sm:$0xff] }
 0x653   : > { %2887 = vmatpush.msra.mxu3 %v5534_v22  ;;  %v6181_v22 = vld [vmem:[#allocation14_spill] sm:$0xff] }
 0x655   : > { %2888 = vmatpush.msra.mxu3 %v5540_v29  ;;  %v6182_v29 = vmax.f32 %v6181_v22, 0.0  ;;  %v6236_v22 = vld [vmem:[#allocation51_spill] sm:$0xff] }
 0x657   : > { %2889 = vmatpush.msra.mxu3 %v5546_v47  ;;  %v6183_v47 = vld [vmem:[#allocation13_spill] sm:$0xff] }
 0x658   : > { %3548 = vmatmul.msk.f32.vlgmr.msrb.gmra.mxu3 %vm2247_vm5, %v5618_v7 }
 0x659   : > { %2890 = vmatpush.msra.mxu3 %v5552_v31  ;;  %v6184_v31 = vmax.f32 %v6183_v47, 0.0  ;;  %v6238_v47 = vld [vmem:[#allocation50_spill] sm:$0xff] }
 0x65b   : > { %2891 = vmatpush.msra.mxu3 %v5560_v35  ;;  %v6185_v35 = vld [vmem:[#allocation12_spill] sm:$0xff] }
 0x65d   : > { %2892 = vmatpush.msra.mxu3 %v5566_v16  ;;  %v6186_v16 = vmax.f32 %v6185_v35, 0.0  ;;  %v6240_v35 = vld [vmem:[#allocation49_spill] sm:$0xff] }
 0x65f   : > { %2893 = vmatpush.msra.mxu3 %v634_v38  ;;  %v6187_v38 = vld [vmem:[#allocation43_spill] sm:$0xff] }
 0x660   : > { %3549 = vmatmul.msk.f32.vlgmr.msra.gmra.mxu3 %vm2247_vm5, %v5618_v7 }
 0x661   : > { %2906 = vmatpush.msrb.mxu3 %v663_v24  ;;  %v6188_v24 = vmax.f32 %v6187_v38, 0.0  ;;  %v6242_v38 = vld [vmem:[#allocation48_spill] sm:$0xff] }
 0x663   : > { %2907 = vmatpush.msrb.mxu3 %v659_v12  ;;  %v2768_v28 = vpop.f32.mrf.mxu3  ;;  %v6189_v12 = vmov 0.0  }
 0x665   : > { %2908 = vmatpush.msrb.mxu3 %v655_v43  ;;  %v3362_v43 = vsel %vm564_vm3, 1.0, %v6189_v12 }
 0x667   : > { %2909 = vmatpush.msrb.mxu3 %v651_v5  ;;  %v6190_v5 = vld [vmem:[#allocation42_spill] sm:$0xff] }
 0x669   : > { %2910 = vmatpush.msrb.mxu3 %v647_v21  ;;  %v6191_v21 = vmax.f32 %v6190_v5, 0.0  ;;  %v6244_v5 = vld [vmem:[#allocation47_spill] sm:$0xff] }
 0x66b   : > { %2911 = vmatpush.msrb.mxu3 %v643_v62  ;;  %v5637_v37 = vpop.f32.mrf.mxu3  ;;  %v6192_v62 = vld [vmem:[#allocation41_spill] sm:$0xff] }
 0x66d   : > { %2912 = vmatpush.msrb.mxu3 %v639_v53  ;;  %v6193_v53 = vmax.f32 %v6192_v62, 0.0  ;;  %v6246_v62 = vld [vmem:[#allocation46_spill] sm:$0xff] }
 0x66f   : > { %2913 = vmatpush.msrb.mxu3 %v635_v18  ;;  %v2831_v18 = vmul.f32 %v3362_v43, %v2768_v28  ;;  %v6206_v28 = vld [vmem:[#allocation34_spill] sm:$0xff] }
 0x670   : > { %3550 = vmatmul.msk.f32.vlgmr.msrb.gmra.mxu3 %vm2247_vm5, %v5618_v7  ;;  %v6207_v57 = vmax.f32 %v6206_v28, 0.0 }
 0x671   : > { %2931 = vmatpush.msra.mxu3 %v6156_v51  ;;  %v6208_v51 = vld [vmem:[#allocation33_spill] sm:$0xff] }
 0x672   : > { %v6209_v19 = vmax.f32 %v6208_v51, 0.0 }
 0x673   : > { %2932 = vmatpush.msra.mxu3 %v6158_v32  ;;  %v5649_v10 = vpop.f32.mrf.mxu3  ;;  %v6210_v32 = vld [vmem:[#allocation32_spill] sm:$0xff] }
 0x674   : > { %v6211_v30 = vmax.f32 %v6210_v32, 0.0 }
 0x675   : > { %2933 = vmatpush.msra.mxu3 %v6160_v26  ;;  %v6212_v26 = vld [vmem:[#allocation31_spill] sm:$0xff] }
 0x676   : > { %v6213_v42 = vmax.f32 %v6212_v26, 0.0  ;;  %v3165_v26 = vld [vmem:[%s5902_s14 + $0x28] sm:$0xff] }
 0x677   : > { %2934 = vmatpush.msra.mxu3 %v6162_v14  ;;  %v6214_v14 = vld [vmem:[#allocation30_spill] sm:$0xff] }
 0x678   : > { %v6215_v60 = vmax.f32 %v6214_v14, 0.0 }
 0x679   : > { %2935 = vmatpush.msra.mxu3 %v6164_v3  ;;  %v6216_v3 = vld [vmem:[#allocation29_spill] sm:$0xff] }
 0x67a   : > { %v6217_v52 = vmax.f32 %v6216_v3, 0.0  ;;  %v3163_v3 = vld [vmem:[%s5902_s14 + $0x18] sm:$0xff] }
 0x67b   : > { %2936 = vmatpush.msra.mxu3 %v6166_v56  ;;  %v6218_v56 = vld [vmem:[#allocation28_spill] sm:$0xff] }
 0x67c   : > { %v6219_v2 = vmax.f32 %v6218_v56, 0.0  ;;  %v3161_v56 = vld [vmem:[%s5902_s14 + $0x8] sm:$0xff] }
 0x67d   : > { %2937 = vmatpush.msra.mxu3 %v6168_v58  ;;  %v6220_v58 = vld [vmem:[#allocation59_spill] sm:$0xff] }
 0x67e   : > { %v6221_v0 = vmax.f32 %v6220_v58, 0.0 }
 0x67f   : > { %2938 = vmatpush.msra.mxu3 %v6170_v33  ;;  %v6222_v33 = vld [vmem:[#allocation58_spill] sm:$0xff] }
 0x680   : > { %v6223_v39 = vmax.f32 %v6222_v33, 0.0  ;;  %v3026_v33 = vpop.f32.mrf.mxu0 }
 0x681   : > { %2939 = vmatpush.msra.mxu3 %v6172_v50  ;;  %v6224_v50 = vld [vmem:[#allocation57_spill] sm:$0xff] }
 0x682   : > { %v6225_v13 = vmax.f32 %v6224_v50, 0.0 }
 0x683   : > { %2940 = vmatpush.msra.mxu3 %v6174_v15  ;;  %v2828_v40 = vpop.f32.mrf.mxu3  ;;  %v6227_v15 = vmax.f32 %v6226_v17, 0.0 }
 0x684   : > { %v2834_v46 = vmul.f32 %v5328_v34, %v2828_v40  ;;  %v6228_v40 = vld [vmem:[#allocation55_spill] sm:$0xff] }
 0x685   : > { %2941 = vmatpush.msra.mxu3 %v6176_v9  ;;  %v6229_v23 = vmax.f32 %v6228_v40, 0.0  ;;  %v6230_v9 = vld [vmem:[#allocation54_spill] sm:$0xff] }
 0x686   : > { %3552 = vmatmul.msk.f32.gmra.mxu0 %vm2247_vm5, %v2834_v46  ;;  %v6231_v46 = vmax.f32 %v6230_v9, 0.0 }
 0x687   : > { %2942 = vmatpush.msra.mxu3 %v6178_v55  ;;  %v6233_v55 = vmax.f32 %v6232_v27, 0.0 }
 0x689   : > { %2943 = vmatpush.msra.mxu3 %v6180_v20  ;;  %v6235_v20 = vmax.f32 %v6234_v61, 0.0 }
 0x68b   : > { %2944 = vmatpush.msra.mxu3 %v6182_v29  ;;  %v6237_v29 = vmax.f32 %v6236_v22, 0.0 }
 0x68d   : > { %2945 = vmatpush.msra.mxu3 %v6184_v31  ;;  %v6239_v31 = vmax.f32 %v6238_v47, 0.0 }
 0x68f   : > { %2946 = vmatpush.msra.mxu3 %v6186_v16  ;;  %v6241_v16 = vmax.f32 %v6240_v35, 0.0  ;;  %v3657_v35 = vld [vmem:[%s5899_s11] ss:$0 sm:$0xff] }
 0x690   : > { %2947 = vmatmul.f32.vlgmr.msra.gmra.mxu3 %v5099_v45  ;;  %v6201_v45 = vmax.f32 %v6200_v8, 0.0  ;;  %v3363_v8 = vsel %vm565_vm4, 1.0, %v6189_v12 }
 0x691   : > { %2957 = vmatpush.msrb.mxu3 %v6188_v24  ;;  %v6243_v24 = vmax.f32 %v6242_v38, 0.0 }
 0x693   : > { %2958 = vmatpush.msrb.mxu3 %v6191_v21  ;;  %v6245_v21 = vmax.f32 %v6244_v5, 0.0 }
 0x695   : > { %2959 = vmatpush.msrb.mxu3 %v6193_v53  ;;  %v6247_v53 = vmax.f32 %v6246_v62, 0.0 }
 0x697   : > { %2960 = vmatpush.msrb.mxu3 %v6195_v6  ;;  %v6250_v6 = vld [vmem:[#allocation44_spill] sm:$0xff] }
 0x698   : > { %2950 = vmatmul.f32.gmra.mxu3 %v2831_v18  ;;  %v6248_v18 = vld [vmem:[#allocation45_spill] sm:$0xff]  ;;  %v6251_v41 = vmax.f32 %v6250_v6, 0.0 }
 0x699   : > { %2961 = vmatpush.msrb.mxu3 %v6197_v49  ;;  %v6249_v59 = vmax.f32 %v6248_v18, 0.0 }
 0x69b   : > { %2962 = vmatpush.msrb.mxu3 %v6199_v44 }
 0x69d   : > { %2963 = vmatpush.msrb.mxu3 %v6201_v45  ;;  %v2832_v45 = vmul.f32 %v3363_v8, %v5637_v37  ;;  %v3166_v37 = vld [vmem:[%s5902_s14 + $0x30] sm:$0xff] }
 0x69f   : > { %2964 = vmatpush.msrb.mxu3 %v6203_v63 }
 0x6a1   : > { %2965 = vmatpush.msrb.mxu3 %v6205_v36  ;;  %v3167_v36 = vld [vmem:[%s5902_s14 + $0x38] sm:$0xff] }
 0x6a2   : > { %3183 = vmatpush.msrb.mxu1 %v3167_v36 }
 0x6a3   : > { %2966 = vmatpush.msrb.mxu3 %v6207_v57 }
 0x6a4   : > { %3184 = vmatpush.msrb.mxu1 %v3166_v37 }
 0x6a5   : > { %2967 = vmatpush.msrb.mxu3 %v6209_v19 }
 0x6a6   : > { %3185 = vmatpush.msrb.mxu1 %v3165_v26 }
 0x6a7   : > { %2968 = vmatpush.msrb.mxu3 %v6211_v30  ;;  %v3069_v30 = vld [vmem:[%s5898_s10 + $0x18] sm:$0xff] }
 0x6a8   : > { %3089 = vmatpush.msra.mxu2 %v3069_v30 }
 0x6a9   : > { %2969 = vmatpush.msrb.mxu3 %v6213_v42  ;;  %v3066_v42 = vld [vmem:[%s5898_s10] sm:$0xff] }
 0x6ab   : > { %2970 = vmatpush.msrb.mxu3 %v6215_v60  ;;  %v3164_v60 = vld [vmem:[%s5902_s14 + $0x20] sm:$0xff] }
 0x6ac   : > { %3186 = vmatpush.msrb.mxu1 %v3164_v60 }
 0x6ad   : > { %2971 = vmatpush.msrb.mxu3 %v6217_v52  ;;  %v3162_v52 = vld [vmem:[%s5902_s14 + $0x10] sm:$0xff] }
 0x6ae   : > { %3187 = vmatpush.msrb.mxu1 %v3163_v3 }
 0x6af   : > { %2972 = vmatpush.msrb.mxu3 %v6219_v2 }
 0x6b0   : > { %3188 = vmatpush.msrb.mxu1 %v3162_v52 }
 0x6b1   : > { %2983 = vmatpush.msra.mxu3 %v6221_v0 }
 0x6b2   : > { %3189 = vmatpush.msrb.mxu1 %v3161_v56  ;;  %v3659_v56 = vld [vmem:[%s5900_s12] ss:$0 sm:$0xff] }
 0x6b3   : > { %2984 = vmatpush.msra.mxu3 %v6223_v39 }
 0x6b5   : > { %2985 = vmatpush.msra.mxu3 %v6225_v13 }
 0x6b7   : > { %2986 = vmatpush.msra.mxu3 %v6227_v15 }
 0x6b9   : > { %2987 = vmatpush.msra.mxu3 %v6229_v23 }
 0x6bb   : > { %2988 = vmatpush.msra.mxu3 %v6231_v46  ;;  %v3160_v46 = vld [vmem:[%s5902_s14] sm:$0xff] }
 0x6bc   : > { %3190 = vmatpush.msrb.mxu1 %v3160_v46 }
 0x6bd   : > { %2989 = vmatpush.msra.mxu3 %v6233_v55 }
 0x6bf   : > { %2990 = vmatpush.msra.mxu3 %v6235_v20 }
 0x6c1   : > { %2991 = vmatpush.msra.mxu3 %v6237_v29 }
 0x6c3   : > { %2992 = vmatpush.msra.mxu3 %v6239_v31 }
 0x6c5   : > { %2993 = vmatpush.msra.mxu3 %v6241_v16 }
 0x6c7   : > { %2994 = vmatpush.msra.mxu3 %v6243_v24 }
 0x6c9   : > { %2995 = vmatpush.msra.mxu3 %v6245_v21 }
 0x6cb   : > { %2996 = vmatpush.msra.mxu3 %v6247_v53 }
 0x6cd   : > { %2997 = vmatpush.msra.mxu3 %v6249_v59  ;;  %v3656_v59 = vld [vmem:[%s5895_s7] ss:$0 sm:$0xff] }
 0x6cf   : > { %2998 = vmatpush.msra.mxu3 %v6251_v41 }
 0x6d3   : > { %v2855_v49 = vpop.f32.mrf.mxu3 }
 0x6d4   : > { %v2918_v25 = vmul.f32 %v3362_v43, %v2855_v49 }
 0x6d6   : > { %2953 = vmatmul.f32.gmra.mxu3 %v2918_v25 }
 0x6db   : > { %v2875_v44 = vpop.f32.mrf.mxu3 }
 0x6dc   : > { %v2919_v54 = vmul.f32 %v3363_v8, %v2875_v44 }
 0x6de   : > { %2973 = vmatmul.f32.vlgmr.msrb.gmra.mxu3 %v5170_v1  ;;  %v3364_v1 = vsel %vm566_vm6, 1.0, %v6189_v12 }
 0x6df   : > { %v2833_v57 = vmul.f32 %v3364_v1, %v5649_v10  ;;  %v3067_v10 = vld [vmem:[%s5898_s10 + $0x8] sm:$0xff] }
 0x6e3   : > { %v2895_v63 = vpop.f32.mrf.mxu3 }
 0x6e4   : > { %v2920_v51 = vmul.f32 %v3364_v1, %v2895_v63 }
 0x6e6   : > { %2976 = vmatmul.f32.gmra.mxu3 %v2832_v45 }
 0x6ee   : > { %2979 = vmatmul.f32.gmra.mxu3 %v2919_v54  ;;  %v3894_v54 = vmov 32.0  }
 0x6f3   : > { %v2915_v43 = vpop.f32.mrf.mxu3 }
 0x6f4   : > { %v2921_v28 = vmul.f32 %v5328_v34, %v2915_v43 }
 0x6f6   : > { %3553 = vmatmul.msk.f32.gmra.mxu0 %vm2247_vm5, %v2921_v28  ;;  %2999 = vmatmul.f32.vlgmr.msra.gmra.mxu3 %v5269_v4  ;;  %v3068_v4 = vld [vmem:[%s5898_s10 + $0x10] sm:$0xff] }
 0x6f7   : > { %3090 = vmatpush.msra.mxu2 %v3068_v4 }
 0x6f9   : > { %3091 = vmatpush.msra.mxu2 %v3067_v10 }
 0x6fb   : > { %3092 = vmatpush.msra.mxu2 %v3066_v42 }
 0x6fe   : > { %3002 = vmatmul.f32.gmra.mxu3 %v2833_v57 }
 0x703   : > { %v3029_v23 = vpop.f32.mrf.mxu0 }
 0x706   : > { %3005 = vmatmul.f32.gmra.mxu3 %v2920_v51 }
 0x713   : > { %v2948_v34 = vpop.f32.mrf.mxu3 }
 0x71b   : > { %v2951_v19 = vpop.f32.mrf.mxu3 }
 0x759   : > { %v2954_v32 = vpop.f32.mrf.mxu3 }
 0x761   : > { %v2974_v12 = vpop.f32.mrf.mxu3 }
 0x762   : > { %v2975_v0 = vadd.f32 %v2974_v12, %v2948_v34 }
 0x769   : > { %v2977_v14 = vpop.f32.mrf.mxu3 }
 0x76a   : > { %v2978_v17 = vadd.f32 %v2977_v14, %v2951_v19 }
 0x771   : > { %v2980_v2 = vpop.f32.mrf.mxu3 }
 0x772   : > { %v2981_v58 = vadd.f32 %v2980_v2, %v2954_v32 }
 0x773   : > { %v3032_v61 = vpop.f32.mrf.mxu0 }
 0x779   : > { %v3000_v39 = vpop.f32.mrf.mxu3 }
 0x77a   : > { %v3001_v50 = vadd.f32 %v3000_v39, %v2975_v0  ;;  %v3660_v0 = vld [vmem:[%s5901_s13] ss:$0 sm:$0xff] }
 0x77c   : > { %v3027_v13 = vadd.f32 %v3026_v33, %v3001_v50 }
 0x77e   : > { %3156 = vrot.lane.b32.xlu0 %v3027_v13, %s3892_s20  ;;  %3554 = vmatmul.msk.f32.vlgmr.msrb.gmra.mxu2 %vm1144_vm2, %v3027_v13 }
 0x781   : > { %v3003_v15 = vpop.f32.mrf.mxu3 }
 0x782   : > { %v3004_v40 = vadd.f32 %v3003_v15, %v2978_v17  ;;  %v3658_v17 = vld [vmem:[%s5903_s15] ss:$0 sm:$0xff] }
 0x784   : > { %v3030_v9 = vadd.f32 %v3029_v23, %v3004_v40 }
 0x786   : > { %3223 = vrot.lane.b32.xlu0 %v5618_v7, %s6020_s26  ;;  %3555 = vmatmul.msk.f32.vlgmr.msra.gmra.mxu2 %vm1144_vm2, %v3030_v9  ;;  %s3262_s26 = sshll.u32 %s3258_s19, 4  ;;  %s3263_s26 = int_to_ptr.hbm [resolvable:$true] %s3262_s26 }
 0x787   : > { %s3806_s29 = sshra.s32 %s3263_s26, 4  ;;  %s3807_s29 = int_to_ptr.hbm [resolvable:$true] %s3806_s29 }
 0x788   : > { %s3808_s5 = scalar_lea.hbm %s3807_s29, 8  ;;  %p3813_p0 = scmp.lt.s32.totalorder %s3807_s29, %s5905_s17 }
 0x789   : > { %v3006_v27 = vpop.f32.mrf.mxu3  ;;  %p3809_p11 = scmp.ne.s32.totalorder %s3807_s29, %s3808_s5 }
 0x78a   : > { %v3007_v55 = vadd.f32 %v3006_v27, %v2981_v58 }
 0x78b   : > { %p3810_p12 = pnand %p3809_p11, %p4023_p5 }
 0x78c   : > { %v3033_v20 = vadd.f32 %v3032_v61, %v3007_v55 }
 0x78d   : > { %p3811_p13 = pneg %p3810_p12 }
 0x7f0   : > { %v3157_v22 = vpop.permute.xlu0 %3156 }
 0x7f1   : > { %v3159_v29 = vsel %vm1144_vm2, %v3033_v20, %v3157_v22 }
 0x7f2   : > { %3557 = vmatmul.msk.f32.vlgmr.msrb.gmra.mxu1 %vm2247_vm5, %v3159_v29 }
 0x7f8   : > { %v3224_v7 = vpop.permute.xlu0 %3223 }
 0x7f9   : > { %v3226_v47 = vsel %vm2247_vm5, %v5519_v48, %v3224_v7 }
 0x7fa   : > { %3227 = vst [vmem:[%s5810_s22] sm:$0xff] %v3226_v47  ;;  %s3812_s22 = scalar_lea.hbm %s5905_s17, 16 }
 0x7fb   : > { %p3814_p1 = scmp.lt.s32.totalorder %s3812_s22, %s3808_s5 }
 0x7fd   : > { %p3815_p2 = por %p3814_p1, %p3813_p0 }
 0x7ff   : > { %p3816_p3 = pnand %p3815_p2, %p3811_p13 }
 0x801   : > { %v3063_v31 = vpop.f32.mrf.mxu2 }
 0x802   : > { %v3064_v44 = vadd.f32 %v3656_v59, %v3063_v31 }
 0x809   : > { %v3094_v16 = vpop.f32.mrf.mxu2 }
 0x80a   : > { %v3095_v38 = vadd.f32 %v3657_v35, %v3094_v16 }
 0x80c   : > { %v3556_v24 = vmul.f32 -1.442695, %v3095_v38 }
 0x80e   : > { %3781 = vpow2.f32 %v3556_v24 }
 0x814   : > { %v3782_v5 = vpop.eup %3781 }
 0x815   : > { %v3100_v21 = vadd.f32 1.0, %v3782_v5 }
 0x817   : > { %3783 = vrcp.f32 %v3100_v21  ;;  %v3112_v18 = vand.u32 2147483648, %v3100_v21  ;;  %v3110_v41 = vand.u32 2147483647, %v3100_v21  ;;  %vm3106_vm3 = vweird.f32 %v3100_v21 }
 0x818   : > { %3785 = vrcp.f32 %v3894_v54 }
 0x819   : > { %v3113_v25 = vor.u32 1.1754944e-38, %v3112_v18  ;;  %vm3111_vm6 = vcmp.eq.f32.partialorder %v3110_v41, 8.507059e+37 }
 0x81d   : > { %v3784_v62 = vpop.eup %3783 }
 0x81e   : > { %v3102_v53 = vmul.f32 %v3784_v62, %v3100_v21  ;;  %vm3107_vm1 = vweird.f32 %v3784_v62  ;;  %v3786_v43 = vpop.eup %3785 }
 0x81f   : > { %vm3108_vm4 = vmor %vm3106_vm3, %vm3107_vm1  ;;  %v3121_v36 = vmul.f32 32.0, %v3786_v43  ;;  %vm3125_vm7 = vweird.f32 %v3786_v43 }
 0x820   : > { %v3103_v48 = vsub.f32 1.0, %v3102_v53 }
 0x821   : > { %v3122_v28 = vsub.f32 1.0, %v3121_v36 }
 0x822   : > { %v3104_v6 = vmul.f32 %v3784_v62, %v3103_v48 }
 0x823   : > { %v3123_v1 = vmul.f32 %v3786_v43, %v3122_v28 }
 0x824   : > { %v3105_v49 = vadd.f32 %v3784_v62, %v3104_v6 }
 0x825   : > { %v3124_v37 = vadd.f32 %v3786_v43, %v3123_v1 }
 0x826   : > { %v3109_v8 = vsel %vm3108_vm4, %v3784_v62, %v3105_v49 }
 0x827   : > { %v3114_v45 = vsel %vm3111_vm6, %v3113_v25, %v3109_v8  ;;  %v3126_v57 = vsel %vm3125_vm7, %v3786_v43, %v3124_v37 }
 0x828   : > { %v3116_v11 = vadd.f32 %v3114_v45, %v3064_v44 }
 0x82a   : > { %v3117_v63 = vsel %vm1144_vm2, %v3116_v11, 0.0 }
 0x82b   : > { %3118 = vadd.xlane.f32.xlu1 %v3117_v63 }
 0x86f   : > { %v3192_v15 = vpop.f32.mrf.mxu1 }
 0x89e   : > { %v3119_v51 = vpop.xlane.xlu1 %3118 }
 0x89f   : > { %v3127_v34 = vmul.f32 %v3126_v57, %v3119_v51 }
 0x8a1   : > { %v3128_v19 = vsub.f32 %v3116_v11, %v3127_v34 }
 0x8a3   : > { %v3129_v32 = vmul.f32 %v3128_v19, %v3128_v19 }
 0x8a5   : > { %v3130_v30 = vsel %vm1144_vm2, %v3129_v32, 0.0 }
 0x8a6   : > { %3131 = vadd.xlane.f32.xlu2 %v3130_v30 }
 0x8be   : > { %3212 = vrot.lane.b32.xlu2 %v3114_v45, %s3892_s20  ;;  %s3234_s20 = scalar_lea.sflag [#allocation5], %s5802_s2 }
 0x919   : > { %v3132_v4 = vpop.xlane.xlu2 %3131 }
 0x91a   : > { %v3133_v12 = vmul.f32 %v3132_v4, %v3126_v57 }
 0x91c   : > { %v3134_v10 = vadd.f32 1e-05, %v3133_v12 }
 0x91e   : > { %3787 = vrsqrt.f32 %v3134_v10  ;;  %vm3141_vm9 = vweird.f32 %v3134_v10 }
 0x924   : > { %v3788_v26 = vpop.eup %3787 }
 0x925   : > { %v3136_v42 = vmul.f32 %v3788_v26, %v3134_v10  ;;  %vm3142_vm8 = vweird.f32 %v3788_v26 }
 0x926   : > { %vm3143_vm10 = vmor %vm3141_vm9, %vm3142_vm8 }
 0x927   : > { %v3137_v14 = vmul.f32 %v3788_v26, %v3136_v42 }
 0x929   : > { %v3138_v60 = vmul.f32 0.5, %v3137_v14 }
 0x92b   : > { %v3139_v3 = vsub.f32 1.5, %v3138_v60 }
 0x92d   : > { %v3140_v52 = vmul.f32 %v3788_v26, %v3139_v3 }
 0x92f   : > { %v3144_v2 = vsel %vm3143_vm10, %v3788_v26, %v3140_v52 }
 0x930   : > { %v3145_v58 = vmul.f32 %v3144_v2, %v3128_v19 }
 0x932   : > { %v3150_v33 = vmul.f32 %v3659_v56, %v3145_v58 }
 0x934   : > { %v3155_v39 = vadd.f32 %v3660_v0, %v3150_v33 }
 0x936   : > { %v3195_v50 = vmul.f32 %v3155_v39, %v3155_v39 }
 0x938   : > { %v3196_v13 = vsel %vm1144_vm2, %v3195_v50, 0.0 }
 0x939   : > { %3197 = vadd.xlane.f32.xlu1 %v3196_v13 }
 0x93a   : > { %3819 = shalt.err (!%p3816_p3)
}
 0x93b   : > { %3565 = dma.vmem_to_hbm [thread:$0]  (%p4023_p5), %s3261_s23, 128, %s3263_s26, %s3234_s20   ;;  %v3193_v40 = vadd.f32 %v3658_v17, %v3192_v15  ;;  %v3213_v47 = vpop.permute.xlu2 %3212  ;;  %vm3221_vm14 = vcmask 785408  }
 0x93c   : > { %s6252_s3 = smov 64   ;;  %s3244_s6 = scalar_lea.hbm %s5904_s16, %s3560_s18 }
 0x93d   : > { %s6253_s26 = sshll.u32 %s5802_s2, 3  ;;  %s3248_s29 = sshll.u32 %s3244_s6, 4  ;;  %s3249_s29 = int_to_ptr.hbm [resolvable:$true] %s3248_s29 }
 0x93e   : > { %s546_s23 = scalar_lea.vmem [#allocation2], %s6253_s26  ;;  %s3229_s28 = scalar_lea.sflag [#allocation3], %s5802_s2 }
 0x93f   : > { %s3246_s20 = sshll.u32 %s546_s23, 4  ;;  %s3834_s18 = sshra.s32 %s3249_s29, 4  ;;  %s3247_s20 = int_to_ptr.vmem [resolvable:$true] %s3246_s20  ;;  %s3835_s18 = int_to_ptr.hbm [resolvable:$true] %s3834_s18 }
 0x940   : > { %s3836_s21 = scalar_lea.hbm %s3835_s18, 8  ;;  %s3840_s19 = scalar_lea.hbm %s5904_s16, 16 }
 0x941   : > { %p3837_p4 = scmp.ne.s32.totalorder %s3835_s18, %s3836_s21  ;;  %p3841_p9 = scmp.lt.s32.totalorder %s3835_s18, %s5904_s16 }
 0x942   : > { %p3842_p10 = scmp.lt.s32.totalorder %s3840_s19, %s3836_s21 }
 0x943   : > { %p3838_p7 = pnand %p3837_p4, %p4023_p5 }
 0x944   : > { %p3843_p11 = por %p3842_p10, %p3841_p9 }
 0x945   : > { %p3839_p8 = pneg %p3838_p7 }
 0x947   : > { %p3844_p12 = pnand %p3843_p11, %p3839_p8 }
 0x952   : > { %3216 = vrot.lane.b32.xlu1 %v3193_v40, %s6252_s3 }
 0x9ac   : > { %v3198_v23 = vpop.xlane.xlu1 %3197 }
 0x9ad   : > { %v3199_v9 = vmax.f32 %v3198_v23, 1e-24 }
 0x9af   : > { %3789 = vrsqrt.f32 %v3199_v9  ;;  %vm3206_vm12 = vweird.f32 %v3199_v9 }
 0x9b5   : > { %v3790_v46 = vpop.eup %3789 }
 0x9b6   : > { %v3201_v27 = vmul.f32 %v3790_v46, %v3199_v9  ;;  %vm3207_vm11 = vweird.f32 %v3790_v46 }
 0x9b7   : > { %vm3208_vm13 = vmor %vm3206_vm12, %vm3207_vm11 }
 0x9b8   : > { %v3202_v55 = vmul.f32 %v3790_v46, %v3201_v27 }
 0x9ba   : > { %v3203_v61 = vmul.f32 0.5, %v3202_v55 }
 0x9bc   : > { %v3204_v20 = vsub.f32 1.5, %v3203_v61 }
 0x9be   : > { %v3205_v22 = vmul.f32 %v3790_v46, %v3204_v20 }
 0x9c0   : > { %v3209_v29 = vsel %vm3208_vm13, %v3790_v46, %v3205_v22 }
 0x9c1   : > { %v3210_v7 = vmul.f32 %v3209_v29, %v3155_v39 }
 0x9c3   : > { %v3219_v31 = vsel %vm1144_vm2, %v3210_v7, %v3213_v47 }
 0x9c4   : > { %v3217_v35 = vpop.permute.xlu1 %3216 }
 0x9c5   : > { %v3220_v16 = vsel %vm2247_vm5, %v3219_v31, %v3217_v35 }
 0x9c6   : > { %3222 = vst.msk [vmem:[%s546_s23] sm:$0xff] %vm3221_vm14, %v3220_v16 }
 0x9c7   : > { %3847 = shalt.err (!%p3844_p12)
}
 0x9c8   : > { %3564 = dma.vmem_to_hbm [thread:$0]  (%p4023_p5), %s3247_s20, 128, %s3249_s29, %s3229_s28  }
 0x9c9 PF: > { %p3575_p13 = scmp.ge.s32.totalorder %s3886_s27, 2  ;;  %s3274_s5 = sand.u32 1, %s3874_s24  }
 0x9ca   : > { %s3275_s6 = scalar_lea.sflag [#allocation3], %s3274_s5 }
 0x9cb   : > { %p3569_p0 = pnand %p3575_p13, %p4027_p6 }
 0x9cd   : > { %p3570_p1 = pneg %p3569_p0 }
 0x9cf   : > { %3865 = dma.done.wait (%p3570_p1), %s3275_s6, 128  }
 0x9d0   : > { %3867 = vsyncadd (%p3570_p1), %s3275_s6, 4294967168  ;;  %s3285_s26 = scalar_lea.sflag [#allocation5], %s3274_s5 }
 0x9d1   : > { %3869 = dma.done.wait (%p3570_p1), %s3285_s26, 128  }
 0x9d2   : > { %3871 = vsyncadd (%p3570_p1), %s3285_s26, 4294967168  ;;  %s6255_s27 = sld [smem:[#allocation9_spill]]  ;;  %s6258_s24 = smov %s3878_s25 }
 0x9d3   : > { %s6256_s23 = sld [smem:[#allocation8_spill]] }
 0x9d4   : > { %s6257_s26 = sld [smem:[#allocation10_spill]] }
 0x9d8   : > { %p31_p5 = scmp.ge.s32.totalorder %s6255_s27, 4  }
 0x9d9   : > { %s6259_s25 = smov %s6256_s23 }
 0x9da   :  { %33 = sbr.rel (!%p31_p5) target bundleno = 13 (0xd), region = 136 }
 0x9df   :  { %3291 = vsyncpa [#allocation3], 1 }
 0x9e0   :  { %3293 = vsyncpa [#allocation3 + $0x1], 1 }
 0x9e1   :  { %3294 = vsyncpa [#allocation5], 1 }
 0x9e2   :  { %3296 = vsyncpa [#allocation5 + $0x1], 1 }

</bundles_post_ra>
